<compile_context>
chip_gen: v7x
topology: tpu7x:2x2x1
jax: 0.10.0
libtpu: 0.0.40
codegen_flags: <defaults>
</compile_context>

<pallas_src>
import functools

import jax
import jax.numpy as jnp
from jax.experimental import pallas as pl
from jax.experimental.pallas import tpu as pltpu


def _vae_kernel(x_ref, eps_ref,
                w1_ref, b1_ref, w23_ref, b23_ref,
                w4_ref, b4_ref, w5_ref, b5_ref,
                xrec_ref, musigma_ref):
    zp = eps_ref.shape[-1]                                   # padded latent width (128)

    # x arrives f32 (avoids a per-call host-side cast pass); cast to bf16 just
    # before the MXU push.  Elementwise math stays f32 (v5e has no bf16 VPU).
    x = x_ref[...].astype(w1_ref.dtype)                      # (TB, D)  bf16
    eps = eps_ref[...].astype(jnp.float32)                   # (TB, ZP) f32

    # ---- encode ----
    h = jnp.dot(x, w1_ref[...], preferred_element_type=jnp.float32) + b1_ref[...]
    h = jnp.maximum(h, 0.0)                                  # ReLU (f32), (TB, HP)

    # Fused mu|sigma projection: one MXU push, lane-dense (TB, 2*ZP) result.
    musig = jnp.dot(h.astype(w23_ref.dtype), w23_ref[...],
                    preferred_element_type=jnp.float32) + b23_ref[...]
    musigma_ref[...] = musig.astype(musigma_ref.dtype)       # bf16, sliced on host

    # ---- reparameterize (vreg-aligned slices at lane offsets 0 / ZP) ----
    mu_p = musig[:, :zp]                                     # (TB, ZP), cols >= Z are 0
    sigma_p = musig[:, zp:]                                  # (TB, ZP), cols >= Z are 0
    z_p = mu_p + sigma_p * eps                               # padding cols stay 0

    # ---- decode ----
    h2 = jnp.dot(z_p.astype(w4_ref.dtype), w4_ref[...],
                 preferred_element_type=jnp.float32) + b4_ref[...]
    h2 = jnp.maximum(h2, 0.0)                                # ReLU (f32), (TB, HP)

    logits = jnp.dot(h2.astype(w5_ref.dtype), w5_ref[...],
                     preferred_element_type=jnp.float32) + b5_ref[...]
    # Exact sigmoid in f32 (kernel is HBM-bound; the divide is hidden).
    xrec_ref[...] = (1.0 / (1.0 + jnp.exp(-logits))).astype(xrec_ref.dtype)


def pack_params(params, *, h_pad=256, zp=128, op_dtype=jnp.bfloat16):
    """One-time host-side packing (do NOT call per forward step):
      * hidden dim padded H -> h_pad, latent padded Z -> zp (exact zero padding),
      * w2|w3 fused into a single (h_pad, 2*zp) weight (each half at its own
        128-lane group),
      * matmul weights cast to bf16, biases kept f32.
    """
    D, H = params["w1"].shape
    Z = params["w2"].shape[1]
    assert H <= h_pad and Z <= zp

    w1 = jnp.zeros((D, h_pad), jnp.float32).at[:, :H].set(params["w1"]).astype(op_dtype)
    b1 = jnp.zeros((1, h_pad), jnp.float32).at[:, :H].set(params["b1"])

    w23 = jnp.zeros((h_pad, 2 * zp), jnp.float32)
    w23 = (w23.at[:H, :Z].set(params["w2"])
               .at[:H, zp:zp + Z].set(params["w3"])).astype(op_dtype)
    b23 = jnp.zeros((1, 2 * zp), jnp.float32)
    b23 = b23.at[:, :Z].set(params["b2"]).at[:, zp:zp + Z].set(params["b3"])

    w4 = jnp.zeros((zp, h_pad), jnp.float32).at[:Z, :H].set(params["w4"]).astype(op_dtype)
    b4 = jnp.zeros((1, h_pad), jnp.float32).at[:, :H].set(params["b4"])

    w5 = jnp.zeros((h_pad, D), jnp.float32).at[:H, :].set(params["w5"]).astype(op_dtype)
    b5 = params["b5"].astype(jnp.float32)

    return dict(w1=w1, b1=b1, w23=w23, b23=b23, w4=w4, b4=b4, w5=w5, b5=b5)


def vae_forward(x, eps, packed, *, batch_tile=128):
    """Full VAE forward in one pallas_call, tiled over the batch axis.

    `packed` comes from pack_params().  Returns (x_rec, mu, sigma) in bf16.
    """
    B, D = x.shape
    Z = eps.shape[1]
    h_pad = packed["w1"].shape[1]
    zp = packed["w4"].shape[0]
    tb = min(batch_tile, B)
    assert B % tb == 0, "batch must be a multiple of batch_tile"

    # Only per-call prep: pad eps to one 128-lane group in bf16 (tiny).  Padding
    # values are irrelevant: mu/sigma padding columns are exactly 0.
    eps_p = jnp.zeros((B, zp), jnp.bfloat16).at[:, :Z].set(eps.astype(jnp.bfloat16))

    # Weights / biases are grid-invariant (constant block index) -> resident in
    # VMEM across grid steps.  pipeline_mode=pl.Buffered(1) on these specs would
    # save ~1 MB VMEM but is not binding at this size (v7x 64 MiB), so omitted.
    def full(shape):
        return pl.BlockSpec(shape, lambda i: (0,) * len(shape))

    in_specs = [
        pl.BlockSpec((tb, D), lambda i: (i, 0)),             # x (f32, cast in-kernel)
        pl.BlockSpec((tb, zp), lambda i: (i, 0)),            # eps (bf16, padded)
        full((D, h_pad)), full((1, h_pad)),                  # w1, b1
        full((h_pad, 2 * zp)), full((1, 2 * zp)),            # fused w2|w3, b2|b3
        full((zp, h_pad)), full((1, h_pad)),                 # w4, b4
        full((h_pad, D)), full((1, D)),                      # w5, b5
    ]
    out_specs = [
        pl.BlockSpec((tb, D), lambda i: (i, 0)),             # x_rec (bf16)
        pl.BlockSpec((tb, 2 * zp), lambda i: (i, 0)),        # mu|sigma merged (bf16)
    ]
    out_shape = (
        jax.ShapeDtypeStruct((B, D), jnp.bfloat16),
        jax.ShapeDtypeStruct((B, 2 * zp), jnp.bfloat16),
    )

    # Advisory cost estimate (padded dims = what the kernel actually executes).
    flops = 2 * B * (D * h_pad + h_pad * (2 * zp) + zp * h_pad + h_pad * D)
    transcendentals = 2 * B * D                              # exp + divide in sigmoid
    bytes_accessed = int(
        x.size * x.dtype.itemsize + eps_p.size * eps_p.dtype.itemsize
        + sum(int(v.size) * v.dtype.itemsize for v in packed.values())
        + B * D * 2 + B * 2 * zp * 2)                        # bf16 outputs
    cost = pl.CostEstimate(flops=flops, transcendentals=transcendentals,
                           bytes_accessed=bytes_accessed)

    x_rec, musigma = pl.pallas_call(
        _vae_kernel,
        out_shape=out_shape,
        grid=(B // tb,),
        in_specs=in_specs,
        out_specs=out_specs,
        compiler_params=pltpu.CompilerParams(
            dimension_semantics=("parallel",)),
        cost_estimate=cost,
    )(x, eps_p, packed["w1"], packed["b1"], packed["w23"], packed["b23"],
      packed["w4"], packed["b4"], packed["w5"], packed["b5"])

    mu = musigma[:, :Z]
    sigma = musigma[:, zp:zp + Z]
    return x_rec, mu, sigma


def init_params(key, input_size, h_dim, z_dim):
    """Deterministic init mimicking nn.Linear's U(-1/sqrt(fan_in), 1/sqrt(fan_in)).
    Weights stored as (in_features, out_features)."""
    def linear(k, fan_in, fan_out):
        kw, kb = jax.random.split(k)
        bound = 1.0 / jnp.sqrt(float(fan_in))
        w = jax.random.uniform(kw, (fan_in, fan_out), jnp.float32, -bound, bound)
        b = jax.random.uniform(kb, (1, fan_out), jnp.float32, -bound, bound)
        return w, b

    k1, k2, k3, k4, k5 = jax.random.split(key, 5)
    w1, b1 = linear(k1, input_size, h_dim)   # img_2hid
    w2, b2 = linear(k2, h_dim, z_dim)        # hid_2mu
    w3, b3 = linear(k3, h_dim, z_dim)        # hid_2sigma
    w4, b4 = linear(k4, z_dim, h_dim)        # z_2hid
    w5, b5 = linear(k5, h_dim, input_size)   # hid_2img
    return dict(w1=w1, b1=b1, w2=w2, b2=b2, w3=w3, b3=b3,
                w4=w4, b4=b4, w5=w5, b5=b5)


def vae_forward_ref(x, eps, p):
    """Pure-JAX reference with the same operand casts as the kernel
    (bf16 matmul operands + bf16-rounded eps, f32 accumulation/elementwise)."""
    bf = jnp.bfloat16

    def dot(a, w):
        return jnp.dot(a.astype(bf), w.astype(bf), preferred_element_type=jnp.float32)

    eps = eps.astype(bf).astype(jnp.float32)
    h = jax.nn.relu(dot(x, p["w1"]) + p["b1"])
    mu = dot(h, p["w2"]) + p["b2"]
    sigma = dot(h, p["w3"]) + p["b3"]
    z = mu + sigma * eps
    h2 = jax.nn.relu(dot(z, p["w4"]) + p["b4"])
    x_rec = jax.nn.sigmoid(dot(h2, p["w5"]) + p["b5"])
    return x_rec, mu, sigma


if __name__ == "__main__":
    # MNIST-style VAE shapes (module defaults h_dim=200, z_dim=20); batch large
    # enough for a 4-step parallel grid (>=2 pipelined steps per v7x TensorCore).
    B, INPUT_SIZE, H_DIM, Z_DIM = 512, 784, 200, 20

    key = jax.random.PRNGKey(0)
    kp, kx, ke = jax.random.split(key, 3)

    params = init_params(kp, INPUT_SIZE, H_DIM, Z_DIM)
    packed = jax.block_until_ready(pack_params(params))      # one-time packing

    x = jax.random.uniform(kx, (B, INPUT_SIZE), jnp.float32)  # image-like [0,1)
    # eps corresponds to torch.rand_like(sigma): uniform [0,1), generated
    # deterministically host-side and fed to the kernel for reproducibility.
    # TODO(synk): could be drawn in-kernel with pltpu.prng_random_bits, but that
    # would not be bit-compatible with a host RNG, so it stays an input.
    eps = jax.random.uniform(ke, (B, Z_DIM), jnp.float32)

    fwd = jax.jit(functools.partial(vae_forward, batch_tile=128))
    x_rec, mu, sigma = jax.block_until_ready(fwd(x, eps, packed))

    # Check against the pure-JAX reference (bf16 operands / bf16 outputs ->
    # moderate tolerances).
    r_rec, r_mu, r_sigma = vae_forward_ref(x, eps, params)
    assert x_rec.shape == (B, INPUT_SIZE)
    assert mu.shape == (B, Z_DIM) and sigma.shape == (B, Z_DIM)
    assert jnp.allclose(x_rec.astype(jnp.float32), r_rec, atol=1e-2, rtol=1e-2)
    assert jnp.allclose(mu.astype(jnp.float32), r_mu, atol=1e-2, rtol=1e-2)
    assert jnp.allclose(sigma.astype(jnp.float32), r_sigma, atol=1e-2, rtol=1e-2)

    print("KERNEL_OK")
</pallas_src>

<mosaic_0001>
module attributes {stable_mosaic.version = 11 : i64} {
  func.func @_vae_kernel(%arg0: i32, %arg1: memref<128x784xf32, #tpu.memory_space<vmem>>, %arg2: memref<128x128xbf16, #tpu.memory_space<vmem>>, %arg3: memref<784x256xbf16, #tpu.memory_space<vmem>>, %arg4: memref<1x256xf32, #tpu.memory_space<vmem>>, %arg5: memref<256x256xbf16, #tpu.memory_space<vmem>>, %arg6: memref<1x256xf32, #tpu.memory_space<vmem>>, %arg7: memref<128x256xbf16, #tpu.memory_space<vmem>>, %arg8: memref<1x256xf32, #tpu.memory_space<vmem>>, %arg9: memref<256x784xbf16, #tpu.memory_space<vmem>>, %arg10: memref<1x784xf32, #tpu.memory_space<vmem>>, %arg11: memref<128x784xbf16, #tpu.memory_space<vmem>>, %arg12: memref<128x256xbf16, #tpu.memory_space<vmem>>) attributes {dimension_semantics = [#tpu.dimension_semantics<parallel>], iteration_bounds = array<i64: 4>, scalar_prefetch = 0 : i64, scratch_operands = 0 : i64, tpu.core_type = #tpu.core_type<tc>, window_params = [{transform_indices = @transform_0, window_bounds = array<i64: 128, 784>}, {transform_indices = @transform_1, window_bounds = array<i64: 128, 128>}, {pipeline_mode = #tpu.pipeline_mode<synchronous>, transform_indices = @transform_2, window_bounds = array<i64: 784, 256>}, {pipeline_mode = #tpu.pipeline_mode<synchronous>, transform_indices = @transform_3, window_bounds = array<i64: 1, 256>}, {pipeline_mode = #tpu.pipeline_mode<synchronous>, transform_indices = @transform_4, window_bounds = array<i64: 256, 256>}, {pipeline_mode = #tpu.pipeline_mode<synchronous>, transform_indices = @transform_5, window_bounds = array<i64: 1, 256>}, {pipeline_mode = #tpu.pipeline_mode<synchronous>, transform_indices = @transform_6, window_bounds = array<i64: 128, 256>}, {pipeline_mode = #tpu.pipeline_mode<synchronous>, transform_indices = @transform_7, window_bounds = array<i64: 1, 256>}, {pipeline_mode = #tpu.pipeline_mode<synchronous>, transform_indices = @transform_8, window_bounds = array<i64: 256, 784>}, {pipeline_mode = #tpu.pipeline_mode<synchronous>, transform_indices = @transform_9, window_bounds = array<i64: 1, 784>}, {transform_indices = @transform_10, window_bounds = array<i64: 128, 784>}, {transform_indices = @transform_11, window_bounds = array<i64: 128, 256>}]} {
    %c0 = arith.constant 0 : index
    %c0_0 = arith.constant 0 : index
    %0 = vector.load %arg1[%c0, %c0_0] : memref<128x784xf32, #tpu.memory_space<vmem>>, vector<128x784xf32>
    %1 = arith.truncf %0 : vector<128x784xf32> to vector<128x784xbf16>
    %c0_1 = arith.constant 0 : index
    %c0_2 = arith.constant 0 : index
    %2 = vector.load %arg2[%c0_1, %c0_2] : memref<128x128xbf16, #tpu.memory_space<vmem>>, vector<128x128xbf16>
    %3 = arith.extf %2 : vector<128x128xbf16> to vector<128x128xf32>
    %c0_3 = arith.constant 0 : index
    %c0_4 = arith.constant 0 : index
    %4 = vector.load %arg3[%c0_3, %c0_4] : memref<784x256xbf16, #tpu.memory_space<vmem>>, vector<784x256xbf16>
    %cst = arith.constant dense<0.000000e+00> : vector<128x256xf32>
    %5 = tpu.matmul %1, %4, %cst {dimension_numbers = #tpu.dot_dimension_numbers<[1], [0], [0], [1], [0, 0, 1, 1], [], []>} : vector<128x784xbf16>, vector<784x256xbf16>, vector<128x256xf32> -> vector<128x256xf32>
    %c0_5 = arith.constant 0 : index
    %c0_6 = arith.constant 0 : index
    %6 = vector.load %arg4[%c0_5, %c0_6] : memref<1x256xf32, #tpu.memory_space<vmem>>, vector<1x256xf32>
    %7 = vector.broadcast %6 : vector<1x256xf32> to vector<128x256xf32>
    %8 = arith.addf %5, %7 : vector<128x256xf32>
    %cst_7 = arith.constant 0.000000e+00 : f32
    %9 = vector.broadcast %cst_7 : f32 to vector<128x256xf32>
    %10 = arith.maximumf %8, %9 : vector<128x256xf32>
    %11 = arith.truncf %10 : vector<128x256xf32> to vector<128x256xbf16>
    %c0_8 = arith.constant 0 : index
    %c0_9 = arith.constant 0 : index
    %12 = vector.load %arg5[%c0_8, %c0_9] : memref<256x256xbf16, #tpu.memory_space<vmem>>, vector<256x256xbf16>
    %cst_10 = arith.constant dense<0.000000e+00> : vector<128x256xf32>
    %13 = tpu.matmul %11, %12, %cst_10 {dimension_numbers = #tpu.dot_dimension_numbers<[1], [0], [0], [1], [0, 0, 1, 1], [], []>} : vector<128x256xbf16>, vector<256x256xbf16>, vector<128x256xf32> -> vector<128x256xf32>
    %c0_11 = arith.constant 0 : index
    %c0_12 = arith.constant 0 : index
    %14 = vector.load %arg6[%c0_11, %c0_12] : memref<1x256xf32, #tpu.memory_space<vmem>>, vector<1x256xf32>
    %15 = vector.broadcast %14 : vector<1x256xf32> to vector<128x256xf32>
    %16 = arith.addf %13, %15 : vector<128x256xf32>
    %17 = arith.truncf %16 : vector<128x256xf32> to vector<128x256xbf16>
    %c0_13 = arith.constant 0 : index
    %c0_14 = arith.constant 0 : index
    %18 = vector.load %arg12[%c0_13, %c0_14] : memref<128x256xbf16, #tpu.memory_space<vmem>>, vector<128x256xbf16>
    tpu.vector_store %arg12[%c0_13, %c0_14], %17 {strides = array<i32>} : memref<128x256xbf16, #tpu.memory_space<vmem>>, vector<128x256xbf16>,
    %19 = vector.extract_strided_slice %16 {offsets = [0, 0], sizes = [128, 128], strides = [1, 1]} : vector<128x256xf32> to vector<128x128xf32>
    %20 = vector.extract_strided_slice %16 {offsets = [0, 128], sizes = [128, 128], strides = [1, 1]} : vector<128x256xf32> to vector<128x128xf32>
    %21 = arith.mulf %20, %3 : vector<128x128xf32>
    %22 = arith.addf %19, %21 : vector<128x128xf32>
    %23 = arith.truncf %22 : vector<128x128xf32> to vector<128x128xbf16>
    %c0_15 = arith.constant 0 : index
    %c0_16 = arith.constant 0 : index
    %24 = vector.load %arg7[%c0_15, %c0_16] : memref<128x256xbf16, #tpu.memory_space<vmem>>, vector<128x256xbf16>
    %cst_17 = arith.constant dense<0.000000e+00> : vector<128x256xf32>
    %25 = tpu.matmul %23, %24, %cst_17 {dimension_numbers = #tpu.dot_dimension_numbers<[1], [0], [0], [1], [0, 0, 1, 1], [], []>} : vector<128x128xbf16>, vector<128x256xbf16>, vector<128x256xf32> -> vector<128x256xf32>
    %c0_18 = arith.constant 0 : index
    %c0_19 = arith.constant 0 : index
    %26 = vector.load %arg8[%c0_18, %c0_19] : memref<1x256xf32, #tpu.memory_space<vmem>>, vector<1x256xf32>
    %27 = vector.broadcast %26 : vector<1x256xf32> to vector<128x256xf32>
    %28 = arith.addf %25, %27 : vector<128x256xf32>
    %cst_20 = arith.constant 0.000000e+00 : f32
    %29 = vector.broadcast %cst_20 : f32 to vector<128x256xf32>
    %30 = arith.maximumf %28, %29 : vector<128x256xf32>
    %31 = arith.truncf %30 : vector<128x256xf32> to vector<128x256xbf16>
    %c0_21 = arith.constant 0 : index
    %c0_22 = arith.constant 0 : index
    %32 = vector.load %arg9[%c0_21, %c0_22] : memref<256x784xbf16, #tpu.memory_space<vmem>>, vector<256x784xbf16>
    %cst_23 = arith.constant dense<0.000000e+00> : vector<128x784xf32>
    %33 = tpu.matmul %31, %32, %cst_23 {dimension_numbers = #tpu.dot_dimension_numbers<[1], [0], [0], [1], [0, 0, 1, 1], [], []>} : vector<128x256xbf16>, vector<256x784xbf16>, vector<128x784xf32> -> vector<128x784xf32>
    %c0_24 = arith.constant 0 : index
    %c0_25 = arith.constant 0 : index
    %34 = vector.load %arg10[%c0_24, %c0_25] : memref<1x784xf32, #tpu.memory_space<vmem>>, vector<1x784xf32>
    %35 = vector.broadcast %34 : vector<1x784xf32> to vector<128x784xf32>
    %36 = arith.addf %33, %35 : vector<128x784xf32>
    %cst_26 = arith.constant 0.000000e+00 : f32
    %37 = vector.broadcast %cst_26 : f32 to vector<128x784xf32>
    %38 = arith.subf %37, %36 : vector<128x784xf32>
    %39 = math.exp %38 : vector<128x784xf32>
    %cst_27 = arith.constant 1.000000e+00 : f32
    %40 = vector.broadcast %cst_27 : f32 to vector<128x784xf32>
    %41 = arith.addf %40, %39 : vector<128x784xf32>
    %cst_28 = arith.constant 1.000000e+00 : f32
    %42 = vector.broadcast %cst_28 : f32 to vector<128x784xf32>
    %43 = arith.divf %42, %41 : vector<128x784xf32>
    %44 = arith.truncf %43 : vector<128x784xf32> to vector<128x784xbf16>
    %c0_29 = arith.constant 0 : index
    %c0_30 = arith.constant 0 : index
    %45 = vector.load %arg11[%c0_29, %c0_30] : memref<128x784xbf16, #tpu.memory_space<vmem>>, vector<128x784xbf16>
    tpu.vector_store %arg11[%c0_29, %c0_30], %44 {strides = array<i32>} : memref<128x784xbf16, #tpu.memory_space<vmem>>, vector<128x784xbf16>,
    return
  }
  func.func @transform_0(%arg0: i32) -> (i32, i32) {
    %c0_i32 = arith.constant 0 : i32
    %c0_i32_0 = arith.constant 0 : i32
    return %arg0, %c0_i32 : i32, i32
  }
  func.func @transform_1(%arg0: i32) -> (i32, i32) {
    %c0_i32 = arith.constant 0 : i32
    %c0_i32_0 = arith.constant 0 : i32
    return %arg0, %c0_i32 : i32, i32
  }
  func.func @transform_2(%arg0: i32) -> (i32, i32) {
    %c0_i32 = arith.constant 0 : i32
    %c0_i32_0 = arith.constant 0 : i32
    %c0_i32_1 = arith.constant 0 : i32
    return %c0_i32, %c0_i32_0 : i32, i32
  }
  func.func @transform_3(%arg0: i32) -> (i32, i32) {
    %c0_i32 = arith.constant 0 : i32
    %c0_i32_0 = arith.constant 0 : i32
    %c0_i32_1 = arith.constant 0 : i32
    return %c0_i32, %c0_i32_0 : i32, i32
  }
  func.func @transform_4(%arg0: i32) -> (i32, i32) {
    %c0_i32 = arith.constant 0 : i32
    %c0_i32_0 = arith.constant 0 : i32
    %c0_i32_1 = arith.constant 0 : i32
    return %c0_i32, %c0_i32_0 : i32, i32
  }
  func.func @transform_5(%arg0: i32) -> (i32, i32) {
    %c0_i32 = arith.constant 0 : i32
    %c0_i32_0 = arith.constant 0 : i32
    %c0_i32_1 = arith.constant 0 : i32
    return %c0_i32, %c0_i32_0 : i32, i32
  }
  func.func @transform_6(%arg0: i32) -> (i32, i32) {
    %c0_i32 = arith.constant 0 : i32
    %c0_i32_0 = arith.constant 0 : i32
    %c0_i32_1 = arith.constant 0 : i32
    return %c0_i32, %c0_i32_0 : i32, i32
  }
  func.func @transform_7(%arg0: i32) -> (i32, i32) {
    %c0_i32 = arith.constant 0 : i32
    %c0_i32_0 = arith.constant 0 : i32
    %c0_i32_1 = arith.constant 0 : i32
    return %c0_i32, %c0_i32_0 : i32, i32
  }
  func.func @transform_8(%arg0: i32) -> (i32, i32) {
    %c0_i32 = arith.constant 0 : i32
    %c0_i32_0 = arith.constant 0 : i32
    %c0_i32_1 = arith.constant 0 : i32
    return %c0_i32, %c0_i32_0 : i32, i32
  }
  func.func @transform_9(%arg0: i32) -> (i32, i32) {
    %c0_i32 = arith.constant 0 : i32
    %c0_i32_0 = arith.constant 0 : i32
    %c0_i32_1 = arith.constant 0 : i32
    return %c0_i32, %c0_i32_0 : i32, i32
  }
  func.func @transform_10(%arg0: i32) -> (i32, i32) {
    %c0_i32 = arith.constant 0 : i32
    %c0_i32_0 = arith.constant 0 : i32
    return %arg0, %c0_i32 : i32, i32
  }
  func.func @transform_11(%arg0: i32) -> (i32, i32) {
    %c0_i32 = arith.constant 0 : i32
    %c0_i32_0 = arith.constant 0 : i32
    return %arg0, %c0_i32 : i32, i32
  }
}

</mosaic_0001>

<bundles_post_ra>
// kernel: vae_forward.1
= control target key start
LH: loop header
LB: loop body
LE: loop exit
PB: predicated region body
PF: predicated region fallthrough
CT: control target
= control target key end

     0   :  { %s6451_s17 = smov 0   ;;  %s8151_s0 = inlined_call_operand.vmem [shape: f32[512,784], index: 0, kind: input, shape index: {}]   ;;  %s8152_s1 = inlined_call_operand.vmem [shape: bf16[512,128], index: 1, kind: input, shape index: {}]   ;;  %s8153_s2 = inlined_call_operand.vmem [shape: bf16[784,256], index: 2, kind: input, shape index: {}]   ;;  %s8154_s3 = inlined_call_operand.vmem [shape: f32[1,256], index: 3, kind: input, shape index: {}]   ;;  %s8155_s4 = inlined_call_operand.vmem [shape: bf16[256,256], index: 4, kind: input, shape index: {}]   ;;  %s8156_s5 = inlined_call_operand.vmem [shape: f32[1,256], index: 5, kind: input, shape index: {}]   ;;  %s8157_s6 = inlined_call_operand.vmem [shape: bf16[128,256], index: 6, kind: input, shape index: {}]   ;;  %s8158_s7 = inlined_call_operand.vmem [shape: f32[1,256], index: 7, kind: input, shape index: {}]   ;;  %s8159_s8 = inlined_call_operand.vmem [shape: bf16[256,784], index: 8, kind: input, shape index: {}]   ;;  %s8160_s9 = inlined_call_operand.vmem [shape: f32[1,784], index: 9, kind: input, shape index: {}]   ;;  %s8161_s10 = inlined_call_operand.vmem [shape: bf16[512,784], index: 10, kind: output, shape index: {0}]   ;;  %s8162_s11 = inlined_call_operand.vmem [shape: bf16[512,256], index: 11, kind: output, shape index: {1}]  }
   0x1 LB: > { %s4869_s18 = sadd.s32 4294967295, %s6388_s17   ;;  %p4873_p0 = scmp.ge.s32.totalorder %s6388_s17, 1  ;;  %s6388_s17 = sphi %s6451_s17, %s22_s17  }
   0x2   : > { %p353_p1 = scmp.lt.s32.totalorder %s6388_s17, 5 }
   0x4   : > { %p354_p2 = pnand %p4873_p0, %p353_p1 }
   0x5   : > { %v5554_v0 = vld [vmem:[%s8153_s2 + $0x4] ss:$8 sps:$4 sm:$0xff] (!%p354_p2)   ;;  %v5556_v1 = vld [vmem:[%s8153_s2] ss:$8 sps:$4 sm:$0xff] (!%p354_p2)   ;;  %v5557_v2 = vld [vmem:[%s8153_s2 + $0x14] ss:$8 sps:$4 sm:$0xff] (!%p354_p2)  }
   0x6   : > { %357 = sbr.rel (%p354_p2) target bundleno = 1392 (0x570), region = 60  ;;  %1259 = vmatprep.subr.bf16.mxu0 (!%p354_p2), %v5554_v0  ;;  %v5559_v3 = vld [vmem:[%s8153_s2 + $0x10] ss:$8 sps:$4 sm:$0xff] (!%p354_p2)   ;;  %s4874_s27 = sshll.u32 (!%p354_p2), %s4869_s18, 4  ;;  %v5560_v4 = vld [vmem:[%s8153_s2 + $0x24] ss:$8 sps:$4 sm:$0xff] (!%p354_p2)  }
   0x7   : > { %1260 = vmatpush1.bf16.msra.mxu0 (!%p354_p2), %v5556_v1  ;;  %p407_p3 = scmp.lt.s32.totalorder (!%p354_p2), %s4874_s27, 63  ;;  %v5562_v5 = vld [vmem:[%s8153_s2 + $0x20] ss:$8 sps:$4 sm:$0xff] (!%p354_p2)   ;;  %v5563_v6 = vld [vmem:[%s8153_s2 + $0x34] ss:$8 sps:$4 sm:$0xff] (!%p354_p2)   ;;  %vm1234_vm0 = vcmask (!%p354_p2), 130048  }
   0x8   : > { %1261 = vmatprep.subr.bf16.mxu0 (!%p354_p2), %v5557_v2  ;;  %v5565_v7 = vld [vmem:[%s8153_s2 + $0x30] ss:$8 sps:$4 sm:$0xff] (!%p354_p2)   ;;  %v5566_v8 = vld [vmem:[%s8153_s2 + $0x44] ss:$8 sps:$4 sm:$0xff] (!%p354_p2)   ;;  %v5568_v9 = vld [vmem:[%s8153_s2 + $0x40] ss:$8 sps:$4 sm:$0xff] (!%p354_p2)  }
   0x9   : > { %v5569_v10 = vld [vmem:[%s8153_s2 + $0x54] ss:$8 sps:$4 sm:$0xff] (!%p354_p2)   ;;  %v5571_v11 = vld [vmem:[%s8153_s2 + $0x50] ss:$8 sps:$4 sm:$0xff] (!%p354_p2)   ;;  %v5572_v12 = vld [vmem:[%s8153_s2 + $0x64] ss:$8 sps:$4 sm:$0xff] (!%p354_p2)  }
   0xa   : > { %v5574_v16 = vld [vmem:[%s8153_s2 + $0x60] ss:$8 sps:$4 sm:$0xff] (!%p354_p2)   ;;  %v5575_v17 = vld [vmem:[%s8153_s2 + $0x74] ss:$8 sps:$4 sm:$0xff] (!%p354_p2)   ;;  %v5577_v18 = vld [vmem:[%s8153_s2 + $0x70] ss:$8 sps:$4 sm:$0xff] (!%p354_p2)  }
   0xb   : > { %1262 = vmatpush1.bf16.msra.mxu0 (!%p354_p2), %v5559_v3  ;;  %v5578_v19 = vld [vmem:[%s8153_s2 + $0x84] ss:$8 sps:$4 sm:$0xff] (!%p354_p2)   ;;  %v5580_v20 = vld [vmem:[%s8153_s2 + $0x80] ss:$8 sps:$4 sm:$0xff] (!%p354_p2)   ;;  %v5581_v21 = vld [vmem:[%s8153_s2 + $0x94] ss:$8 sps:$4 sm:$0xff] (!%p354_p2)  }
   0xc   : > { %1263 = vmatprep.subr.bf16.mxu0 (!%p354_p2), %v5560_v4  ;;  %v5583_v22 = vld [vmem:[%s8153_s2 + $0x90] ss:$8 sps:$4 sm:$0xff] (!%p354_p2)   ;;  %v5584_v23 = vld [vmem:[%s8153_s2 + $0xa4] ss:$8 sps:$4 sm:$0xff] (!%p354_p2)   ;;  %v5586_v24 = vld [vmem:[%s8153_s2 + $0xa0] ss:$8 sps:$4 sm:$0xff] (!%p354_p2)  }
   0xd   : > { %s8164_s27 = smov (!%p407_p3, %s4874_s27), 63  ;;  %v5587_v25 = vld [vmem:[%s8153_s2 + $0xb4] ss:$8 sps:$4 sm:$0xff]   ;;  %v5589_v26 = vld [vmem:[%s8153_s2 + $0xb0] ss:$8 sps:$4 sm:$0xff]   ;;  %vm4701_vm1 = vcmask 125952  }
   0xe   : > { %s5543_s20 = smul.u32 56, %s8164_s27  ;;  %v5590_v27 = vld [vmem:[%s8153_s2 + $0xc4] ss:$8 sps:$4 sm:$0xff]   ;;  %v5592_v28 = vld [vmem:[%s8153_s2 + $0xc0] ss:$8 sps:$4 sm:$0xff]   ;;  %s4877_s12 = sshll.u32 %s8164_s27, 2 }
   0xf   : > { %1264 = vmatpush1.bf16.msra.mxu0 %v5562_v5  ;;  %v5593_v29 = vld [vmem:[%s8153_s2 + $0xd4] ss:$8 sps:$4 sm:$0xff]   ;;  %v5595_v30 = vld [vmem:[%s8153_s2 + $0xd0] ss:$8 sps:$4 sm:$0xff]   ;;  %v5596_v31 = vld [vmem:[%s8153_s2 + $0xe4] ss:$8 sps:$4 sm:$0xff]  }
  0x10   : > { %1265 = vmatprep.subr.bf16.mxu0 %v5563_v6  ;;  %s6498_s28 = scalar_lea.vmem %s8151_s0, %s5543_s20  ;;  %v5598_v32 = vld [vmem:[%s8153_s2 + $0xe0] ss:$8 sps:$4 sm:$0xff]   ;;  %v5599_v33 = vld [vmem:[%s8153_s2 + $0xf4] ss:$8 sps:$4 sm:$0xff]   ;;  %v5601_v34 = vld [vmem:[%s8153_s2 + $0xf0] ss:$8 sps:$4 sm:$0xff]   ;;  %s7177_s20 = scalar_lea.vmem %s8152_s1, %s4877_s12 }
  0x11   : > { %v435_v13 = vld [vmem:[%s6498_s28 + $0x8] sm:$0xff]  ;;  %v442_v14 = vld [vmem:[%s6498_s28 + $0x40] sm:$0xff]  ;;  %v441_v36 = vld [vmem:[%s6498_s28 + $0x38] sm:$0xff]  ;;  %s5231_s21 = sshll.u32 %s8164_s27, 3  ;;  %s5544_s12 = smul.u32 28, %s8164_s27 }
  0x12   : > { %v547_v15 = vpack.c.bf16 %v442_v14, %v435_v13  ;;  %v434_v35 = vld [vmem:[%s6498_s28] sm:$0xff]  ;;  %v449_v38 = vld [vmem:[%s6498_s28 + $0x78] sm:$0xff]  ;;  %v456_v39 = vld [vmem:[%s6498_s28 + $0xb0] sm:$0xff]  ;;  %s7192_s23 = scalar_lea.vmem %s8162_s11, %s5231_s21 }
  0x13   : > { %1266 = vmatpush1.bf16.msra.mxu0 %v5565_v7  ;;  %v5604_v37 = vld [vmem:[%s8153_s2 + $0x104] ss:$8 sps:$4 sm:$0xff]   ;;  %v546_v40 = vpack.c.bf16 %v441_v36, %v434_v35  ;;  %v5602_v41 = vld [vmem:[%s8153_s2 + $0x100] ss:$8 sps:$4 sm:$0xff]   ;;  %v554_v42 = vpack.c.bf16 %v456_v39, %v449_v38  ;;  %v5607_v43 = vld [vmem:[%s8153_s2 + $0x114] ss:$8 sps:$4 sm:$0xff]   ;;  %s7695_s14 = scalar_lea.vmem %s8161_s10, %s5544_s12 }
  0x14   : > { %1267 = vmatprep.subr.bf16.mxu0 %v5566_v8  ;;  %1291 = vmatprep.mubr.bf16.mxu0 %v547_v15  ;;  %v5605_v44 = vld [vmem:[%s8153_s2 + $0x110] ss:$8 sps:$4 sm:$0xff]   ;;  %v455_v46 = vld [vmem:[%s6498_s28 + $0xa8] sm:$0xff]  ;;  %v470_v49 = vld [vmem:[%s6498_s28 + $0x120] sm:$0xff] }
  0x15   : > { %v448_v45 = vld [vmem:[%s6498_s28 + $0x70] sm:$0xff]  ;;  %v5610_v47 = vld [vmem:[%s8153_s2 + $0x124] ss:$8 sps:$4 sm:$0xff]   ;;  %v5608_v51 = vld [vmem:[%s8153_s2 + $0x120] ss:$8 sps:$4 sm:$0xff]  }
  0x16   : > { %v463_v48 = vld [vmem:[%s6498_s28 + $0xe8] sm:$0xff]  ;;  %v553_v50 = vpack.c.bf16 %v455_v46, %v448_v45  ;;  %v5613_v53 = vld [vmem:[%s8153_s2 + $0x134] ss:$8 sps:$4 sm:$0xff]   ;;  %v5611_v54 = vld [vmem:[%s8153_s2 + $0x130] ss:$8 sps:$4 sm:$0xff]  }
  0x17   : > { %1268 = vmatpush1.bf16.msra.mxu0 %v5568_v9  ;;  %v561_v52 = vpack.c.bf16 %v470_v49, %v463_v48  ;;  %v462_v55 = vld [vmem:[%s6498_s28 + $0xe0] sm:$0xff]  ;;  %v469_v56 = vld [vmem:[%s6498_s28 + $0x118] sm:$0xff]  ;;  %v484_v59 = vld [vmem:[%s6498_s28 + $0x190] sm:$0xff] }
  0x18   : > { %1269 = vmatprep.subr.bf16.mxu0 %v5569_v10  ;;  %v5616_v57 = vld [vmem:[%s8153_s2 + $0x144] ss:$8 sps:$4 sm:$0xff]   ;;  %v477_v58 = vld [vmem:[%s6498_s28 + $0x158] sm:$0xff]  ;;  %v560_v60 = vpack.c.bf16 %v469_v56, %v462_v55  ;;  %v5614_v61 = vld [vmem:[%s8153_s2 + $0x140] ss:$8 sps:$4 sm:$0xff]  }
  0x19   : > { %v568_v62 = vpack.c.bf16 %v484_v59, %v477_v58  ;;  %v5619_v63 = vld [vmem:[%s8153_s2 + $0x154] ss:$8 sps:$4 sm:$0xff]   ;;  %v5617_v0 = vld [vmem:[%s8153_s2 + $0x150] ss:$8 sps:$4 sm:$0xff]   ;;  %v483_v2 = vld [vmem:[%s6498_s28 + $0x188] sm:$0xff] }
  0x1a   : > { %v476_v1 = vld [vmem:[%s6498_s28 + $0x150] sm:$0xff]  ;;  %v5622_v3 = vld [vmem:[%s8153_s2 + $0x164] ss:$8 sps:$4 sm:$0xff]   ;;  %v5620_v7 = vld [vmem:[%s8153_s2 + $0x160] ss:$8 sps:$4 sm:$0xff]  }
  0x1b   : > { %1270 = vmatpush1.bf16.msra.mxu0 %v5571_v11  ;;  %v491_v4 = vld [vmem:[%s6498_s28 + $0x1c8] sm:$0xff]  ;;  %v498_v5 = vld [vmem:[%s6498_s28 + $0x200] sm:$0xff]  ;;  %v567_v6 = vpack.c.bf16 %v483_v2, %v476_v1  ;;  %v5625_v9 = vld [vmem:[%s8153_s2 + $0x174] ss:$8 sps:$4 sm:$0xff]  }
  0x1c   : > { %1271 = vmatprep.subr.bf16.mxu0 %v5572_v12  ;;  %v575_v8 = vpack.c.bf16 %v498_v5, %v491_v4  ;;  %v5623_v10 = vld [vmem:[%s8153_s2 + $0x170] ss:$8 sps:$4 sm:$0xff]   ;;  %v490_v11 = vld [vmem:[%s6498_s28 + $0x1c0] sm:$0xff]  ;;  %v5643_v38 = vld [vmem:[%s8153_s2 + $0x1d4] ss:$8 sps:$4 sm:$0xff]  }
  0x1d   : > { %v497_v12 = vld [vmem:[%s6498_s28 + $0x1f8] sm:$0xff]  ;;  %v5628_v13 = vld [vmem:[%s8153_s2 + $0x184] ss:$8 sps:$4 sm:$0xff]   ;;  %v512_v15 = vld [vmem:[%s6498_s28 + $0x270] sm:$0xff] }
  0x1e   : > { %v505_v14 = vld [vmem:[%s6498_s28 + $0x238] sm:$0xff]  ;;  %v540_v35 = vld [vmem:[%s6498_s28 + $0x350] sm:$0xff]  ;;  %v5638_v36 = vld [vmem:[%s8153_s2 + $0x1c0] ss:$8 sps:$4 sm:$0xff]  }
  0x1f   : > { %1272 = vmatpush1.bf16.msra.mxu0 %v5574_v16  ;;  %v5626_v16 = vld [vmem:[%s8153_s2 + $0x180] ss:$8 sps:$4 sm:$0xff]   ;;  %v444_v45 = vld [vmem:[%s6498_s28 + $0x50] sm:$0xff] }
  0x20   : > { %1273 = vmatprep.subr.bf16.mxu0 %v5575_v17  ;;  %v574_v17 = vpack.c.bf16 %v497_v12, %v490_v11  ;;  %v5644_v46 = vld [vmem:[%s8153_s2 + $0x1e0] ss:$8 sps:$4 sm:$0xff]   ;;  %v5649_v48 = vld [vmem:[%s8153_s2 + $0x1f4] ss:$8 sps:$4 sm:$0xff]  }
  0x21   : > { %v458_v55 = vld [vmem:[%s6498_s28 + $0xc0] sm:$0xff]  ;;  %v5655_v58 = vld [vmem:[%s8153_s2 + $0x214] ss:$8 sps:$4 sm:$0xff]  }
  0x22   : > { %v5650_v56 = vld [vmem:[%s8153_s2 + $0x200] ss:$8 sps:$4 sm:$0xff]   ;;  %v472_v1 = vld [vmem:[%s6498_s28 + $0x130] sm:$0xff] }
  0x23   : > { %1274 = vmatpush1.bf16.msra.mxu0 %v5577_v18  ;;  %v5631_v18 = vld [vmem:[%s8153_s2 + $0x194] ss:$8 sps:$4 sm:$0xff]   ;;  %v5656_v2 = vld [vmem:[%s8153_s2 + $0x220] ss:$8 sps:$4 sm:$0xff]  }
  0x24   : > { %1275 = vmatprep.subr.bf16.mxu0 %v5578_v19  ;;  %v582_v19 = vpack.c.bf16 %v512_v15, %v505_v14  ;;  %v5661_v4 = vld [vmem:[%s8153_s2 + $0x234] ss:$8 sps:$4 sm:$0xff]   ;;  %v486_v11 = vld [vmem:[%s6498_s28 + $0x1a0] sm:$0xff] }
  0x25   : > { %v5662_v12 = vld [vmem:[%s8153_s2 + $0x240] ss:$8 sps:$4 sm:$0xff]   ;;  %v5667_v14 = vld [vmem:[%s8153_s2 + $0x254] ss:$8 sps:$4 sm:$0xff]  }
  0x27   : > { %1276 = vmatpush1.bf16.msra.mxu0 %v5580_v20  ;;  %v5629_v20 = vld [vmem:[%s8153_s2 + $0x190] ss:$8 sps:$4 sm:$0xff]  }
  0x28   : > { %1277 = vmatprep.subr.bf16.mxu0 %v5581_v21  ;;  %v504_v21 = vld [vmem:[%s6498_s28 + $0x230] sm:$0xff] }
  0x2b   : > { %1278 = vmatpush1.bf16.msra.mxu0 %v5583_v22  ;;  %v511_v22 = vld [vmem:[%s6498_s28 + $0x268] sm:$0xff] }
  0x2c   : > { %1279 = vmatprep.subr.bf16.mxu0 %v5584_v23  ;;  %v5634_v23 = vld [vmem:[%s8153_s2 + $0x1a4] ss:$8 sps:$4 sm:$0xff]  }
  0x2f   : > { %1280 = vmatpush1.bf16.msra.mxu0 %v5586_v24  ;;  %v519_v24 = vld [vmem:[%s6498_s28 + $0x2a8] sm:$0xff] }
  0x30   : > { %1281 = vmatprep.subr.bf16.mxu0 %v5587_v25  ;;  %v526_v25 = vld [vmem:[%s6498_s28 + $0x2e0] sm:$0xff] }
  0x33   : > { %1282 = vmatpush1.bf16.msra.mxu0 %v5589_v26  ;;  %v5632_v26 = vld [vmem:[%s8153_s2 + $0x1a0] ss:$8 sps:$4 sm:$0xff]  }
  0x34   : > { %1283 = vmatprep.subr.bf16.mxu0 %v5590_v27  ;;  %v581_v27 = vpack.c.bf16 %v511_v22, %v504_v21  ;;  %v500_v21 = vld [vmem:[%s6498_s28 + $0x210] sm:$0xff]  ;;  %v5668_v22 = vld [vmem:[%s8153_s2 + $0x260] ss:$8 sps:$4 sm:$0xff]  }
  0x37   : > { %1284 = vmatpush1.bf16.msra.mxu0 %v5592_v28  ;;  %v5637_v28 = vld [vmem:[%s8153_s2 + $0x1b4] ss:$8 sps:$4 sm:$0xff]  }
  0x38   : > { %1285 = vmatprep.subr.bf16.mxu0 %v5593_v29  ;;  %v589_v29 = vpack.c.bf16 %v526_v25, %v519_v24  ;;  %v5673_v24 = vld [vmem:[%s8153_s2 + $0x274] ss:$8 sps:$4 sm:$0xff]  }
  0x3b   : > { %1286 = vmatpush1.bf16.msra.mxu0 %v5595_v30  ;;  %v5635_v30 = vld [vmem:[%s8153_s2 + $0x1b0] ss:$8 sps:$4 sm:$0xff]  }
  0x3c   : > { %1287 = vmatprep.subr.bf16.mxu0 %v5596_v31  ;;  %v518_v31 = vld [vmem:[%s6498_s28 + $0x2a0] sm:$0xff] }
  0x3f   : > { %1288 = vmatpush1.bf16.msra.mxu0 %v5598_v32  ;;  %v525_v32 = vld [vmem:[%s6498_s28 + $0x2d8] sm:$0xff] }
  0x40   : > { %1289 = vmatprep.subr.bf16.mxu0 %v5599_v33  ;;  %v5640_v33 = vld [vmem:[%s8153_s2 + $0x1c4] ss:$8 sps:$4 sm:$0xff]  }
  0x43   : > { %1290 = vmatpush1.bf16.msra.mxu0 %v5601_v34  ;;  %v533_v34 = vld [vmem:[%s6498_s28 + $0x318] sm:$0xff] }
  0x44   : > { %1372 = vmatprep.subr.bf16.mxu0 %v5604_v37  ;;  %v588_v37 = vpack.c.bf16 %v525_v32, %v518_v31  ;;  %v596_v39 = vpack.c.bf16 %v540_v35, %v533_v34  ;;  %v514_v31 = vld [vmem:[%s6498_s28 + $0x280] sm:$0xff]  ;;  %v5679_v35 = vld [vmem:[%s8153_s2 + $0x294] ss:$8 sps:$4 sm:$0xff]  }
  0x46   : > { %1292 = vmatmul.mubr.bf16.vlgmr.msra.gmra.mrb[0].mxu0 %v546_v40  ;;  %v5641_v40 = vld [vmem:[%s8153_s2 + $0x1d0] ss:$8 sps:$4 sm:$0xff]  }
  0x47   : > { %1373 = vmatpush1.bf16.msra.mxu0 %v5602_v41  ;;  %1301 = vmatprep.mubr.bf16.mxu0 %v554_v42  ;;  %v532_v41 = vld [vmem:[%s6498_s28 + $0x310] sm:$0xff]  ;;  %v539_v42 = vld [vmem:[%s6498_s28 + $0x348] sm:$0xff] }
  0x48   : > { %1374 = vmatprep.subr.bf16.mxu0 %v5607_v43  ;;  %v5646_v43 = vld [vmem:[%s8153_s2 + $0x1e4] ss:$8 sps:$4 sm:$0xff]  }
  0x4b   : > { %1375 = vmatpush1.bf16.msra.mxu0 %v5605_v44  ;;  %v437_v44 = vld [vmem:[%s6498_s28 + $0x18] sm:$0xff] }
  0x4c   : > { %1376 = vmatprep.subr.bf16.mxu0 %v5610_v47  ;;  %v595_v47 = vpack.c.bf16 %v539_v42, %v532_v41  ;;  %v549_v49 = vpack.c.bf16 %v444_v45, %v437_v44  ;;  %v528_v41 = vld [vmem:[%s6498_s28 + $0x2f0] sm:$0xff] }
  0x4d   : > { %v5685_v45 = vld [vmem:[%s8153_s2 + $0x2b4] ss:$8 sps:$4 sm:$0xff]  }
  0x4e   : > { %1302 = vmatmul.mubr.bf16.gmra.mrb[4].mxu0 %v553_v50  ;;  %v5647_v50 = vld [vmem:[%s8153_s2 + $0x1f0] ss:$8 sps:$4 sm:$0xff]  }
  0x4f   : > { %1377 = vmatpush1.bf16.msra.mxu0 %v5608_v51  ;;  %1311 = vmatprep.mubr.bf16.mxu0 %v561_v52  ;;  %v436_v51 = vld [vmem:[%s6498_s28 + $0x10] sm:$0xff]  ;;  %v443_v52 = vld [vmem:[%s6498_s28 + $0x48] sm:$0xff] }
  0x50   : > { %1378 = vmatprep.subr.bf16.mxu0 %v5613_v53  ;;  %v5652_v53 = vld [vmem:[%s8153_s2 + $0x204] ss:$8 sps:$4 sm:$0xff]  }
  0x53   : > { %1379 = vmatpush1.bf16.msra.mxu0 %v5611_v54  ;;  %v451_v54 = vld [vmem:[%s6498_s28 + $0x88] sm:$0xff] }
  0x54   : > { %1380 = vmatprep.subr.bf16.mxu0 %v5616_v57  ;;  %v548_v57 = vpack.c.bf16 %v443_v52, %v436_v51  ;;  %v556_v59 = vpack.c.bf16 %v458_v55, %v451_v54  ;;  %v542_v51 = vld [vmem:[%s6498_s28 + $0x360] sm:$0xff]  ;;  %v5691_v55 = vld [vmem:[%s8153_s2 + $0x2d4] ss:$8 sps:$4 sm:$0xff]  }
  0x56   : > { %1312 = vmatmul.mubr.bf16.gmra.mrb[8].mxu0 %v560_v60  ;;  %v5653_v60 = vld [vmem:[%s8153_s2 + $0x210] ss:$8 sps:$4 sm:$0xff]  }
  0x57   : > { %1381 = vmatpush1.bf16.msra.mxu0 %v5614_v61  ;;  %1321 = vmatprep.mubr.bf16.mxu0 %v568_v62  ;;  %v450_v61 = vld [vmem:[%s6498_s28 + $0x80] sm:$0xff]  ;;  %v457_v62 = vld [vmem:[%s6498_s28 + $0xb8] sm:$0xff] }
  0x58   : > { %1382 = vmatprep.subr.bf16.mxu0 %v5619_v63  ;;  %v5658_v63 = vld [vmem:[%s8153_s2 + $0x224] ss:$8 sps:$4 sm:$0xff]  }
  0x5b   : > { %1383 = vmatpush1.bf16.msra.mxu0 %v5617_v0  ;;  %v465_v0 = vld [vmem:[%s6498_s28 + $0xf8] sm:$0xff] }
  0x5c   : > { %1384 = vmatprep.subr.bf16.mxu0 %v5622_v3  ;;  %v555_v3 = vpack.c.bf16 %v457_v62, %v450_v61  ;;  %v563_v5 = vpack.c.bf16 %v472_v1, %v465_v0  ;;  %v446_v61 = vld [vmem:[%s6498_s28 + $0x60] sm:$0xff]  ;;  %v5697_v1 = vld [vmem:[%s8153_s2 + $0x2f4] ss:$8 sps:$4 sm:$0xff]  }
  0x5e   : > { %1322 = vmatmul.mubr.bf16.gmra.mrb[12].mxu0 %v567_v6  ;;  %v5659_v6 = vld [vmem:[%s8153_s2 + $0x230] ss:$8 sps:$4 sm:$0xff]  }
  0x5f   : > { %1385 = vmatpush1.bf16.msra.mxu0 %v5620_v7  ;;  %1331 = vmatprep.mubr.bf16.mxu0 %v575_v8  ;;  %v464_v7 = vld [vmem:[%s6498_s28 + $0xf0] sm:$0xff]  ;;  %v471_v8 = vld [vmem:[%s6498_s28 + $0x128] sm:$0xff] }
  0x60   : > { %1386 = vmatprep.subr.bf16.mxu0 %v5625_v9  ;;  %v5664_v9 = vld [vmem:[%s8153_s2 + $0x244] ss:$8 sps:$4 sm:$0xff]  }
  0x63   : > { %1387 = vmatpush1.bf16.msra.mxu0 %v5623_v10  ;;  %v479_v10 = vld [vmem:[%s6498_s28 + $0x168] sm:$0xff] }
  0x64   : > { %1388 = vmatprep.subr.bf16.mxu0 %v5628_v13  ;;  %v562_v13 = vpack.c.bf16 %v471_v8, %v464_v7  ;;  %v570_v15 = vpack.c.bf16 %v486_v11, %v479_v10  ;;  %v445_v7 = vld [vmem:[%s6498_s28 + $0x58] sm:$0xff]  ;;  %v5700_v8 = vld [vmem:[%s8153_s2 + $0x304] ss:$8 sps:$4 sm:$0xff]   ;;  %v460_v10 = vld [vmem:[%s6498_s28 + $0xd0] sm:$0xff] }
  0x65   : > { %v5706_v11 = vld [vmem:[%s8155_s4 + $0x10] ss:$8 sps:$4 sm:$0xff]  }
  0x66   : > { %1332 = vmatmul.mubr.bf16.gmra.mrb[16].mxu0 %v574_v17  ;;  %v478_v17 = vld [vmem:[%s6498_s28 + $0x160] sm:$0xff] }
  0x67   : > { %1389 = vmatpush1.bf16.msra.mxu0 %v5626_v16  ;;  %1341 = vmatprep.mubr.bf16.mxu0 %v582_v19  ;;  %v5665_v16 = vld [vmem:[%s8153_s2 + $0x250] ss:$8 sps:$4 sm:$0xff]   ;;  %v5670_v19 = vld [vmem:[%s8153_s2 + $0x264] ss:$8 sps:$4 sm:$0xff]  }
  0x68   : > { %1390 = vmatprep.subr.bf16.mxu0 %v5631_v18  ;;  %v485_v18 = vld [vmem:[%s6498_s28 + $0x198] sm:$0xff] }
  0x6b   : > { %1391 = vmatpush1.bf16.msra.mxu0 %v5629_v20  ;;  %v493_v20 = vld [vmem:[%s6498_s28 + $0x1d8] sm:$0xff] }
  0x6c   : > { %1392 = vmatprep.subr.bf16.mxu0 %v5634_v23  ;;  %v569_v23 = vpack.c.bf16 %v485_v18, %v478_v17  ;;  %v577_v25 = vpack.c.bf16 %v500_v21, %v493_v20  ;;  %v5710_v17 = vld [vmem:[%s8155_s4 + $0x34] ss:$8 sps:$4 sm:$0xff]   ;;  %v467_v20 = vld [vmem:[%s6498_s28 + $0x108] sm:$0xff]  ;;  %v474_v21 = vld [vmem:[%s6498_s28 + $0x140] sm:$0xff] }
  0x6d   : > { %v452_v18 = vld [vmem:[%s6498_s28 + $0x90] sm:$0xff] }
  0x6e   : > { %1342 = vmatmul.mubr.bf16.gmra.mrb[20].mxu0 %v581_v27  ;;  %v492_v27 = vld [vmem:[%s6498_s28 + $0x1d0] sm:$0xff] }
  0x6f   : > { %1393 = vmatpush1.bf16.msra.mxu0 %v5632_v26  ;;  %1351 = vmatprep.mubr.bf16.mxu0 %v589_v29  ;;  %v5671_v26 = vld [vmem:[%s8153_s2 + $0x270] ss:$8 sps:$4 sm:$0xff]   ;;  %v5676_v29 = vld [vmem:[%s8153_s2 + $0x284] ss:$8 sps:$4 sm:$0xff]  }
  0x70   : > { %1394 = vmatprep.subr.bf16.mxu0 %v5637_v28  ;;  %v499_v28 = vld [vmem:[%s6498_s28 + $0x208] sm:$0xff] }
  0x71   : > { %v576_v32 = vpack.c.bf16 %v499_v28, %v492_v27  ;;  %v5716_v27 = vld [vmem:[%s8155_s4 + $0x54] ss:$8 sps:$4 sm:$0xff]   ;;  %v466_v28 = vld [vmem:[%s6498_s28 + $0x100] sm:$0xff] }
  0x73   : > { %1395 = vmatpush1.bf16.msra.mxu0 %v5635_v30  ;;  %v507_v30 = vld [vmem:[%s6498_s28 + $0x248] sm:$0xff] }
  0x74   : > { %1396 = vmatprep.subr.bf16.mxu0 %v5640_v33  ;;  %v5674_v33 = vld [vmem:[%s8153_s2 + $0x280] ss:$8 sps:$4 sm:$0xff]   ;;  %v584_v34 = vpack.c.bf16 %v514_v31, %v507_v30  ;;  %v481_v30 = vld [vmem:[%s6498_s28 + $0x178] sm:$0xff]  ;;  %v488_v31 = vld [vmem:[%s6498_s28 + $0x1b0] sm:$0xff] }
  0x76   : > { %1352 = vmatmul.mubr.bf16.gmra.mrb[24].mxu0 %v588_v37  ;;  %v506_v37 = vld [vmem:[%s6498_s28 + $0x240] sm:$0xff] }
  0x77   : > { %1397 = vmatpush1.bf16.msra.mxu0 %v5638_v36  ;;  %1361 = vmatprep.mubr.bf16.mxu0 %v596_v39  ;;  %v5677_v36 = vld [vmem:[%s8153_s2 + $0x290] ss:$8 sps:$4 sm:$0xff]   ;;  %v5682_v39 = vld [vmem:[%s8153_s2 + $0x2a4] ss:$8 sps:$4 sm:$0xff]  }
  0x78   : > { %1398 = vmatprep.subr.bf16.mxu0 %v5643_v38  ;;  %v513_v38 = vld [vmem:[%s6498_s28 + $0x278] sm:$0xff] }
  0x79   : > { %v583_v42 = vpack.c.bf16 %v513_v38, %v506_v37  ;;  %v5722_v37 = vld [vmem:[%s8155_s4 + $0x74] ss:$8 sps:$4 sm:$0xff]  }
  0x7a   : > { %v480_v38 = vld [vmem:[%s6498_s28 + $0x170] sm:$0xff] }
  0x7b   : > { %1399 = vmatpush1.bf16.msra.mxu0 %v5641_v40  ;;  %v521_v40 = vld [vmem:[%s6498_s28 + $0x2b8] sm:$0xff] }
  0x7c   : > { %1400 = vmatprep.subr.bf16.mxu0 %v5646_v43  ;;  %v5680_v43 = vld [vmem:[%s8153_s2 + $0x2a0] ss:$8 sps:$4 sm:$0xff]   ;;  %v591_v44 = vpack.c.bf16 %v528_v41, %v521_v40 }
  0x7d   : > { %v495_v40 = vld [vmem:[%s6498_s28 + $0x1e8] sm:$0xff]  ;;  %v502_v41 = vld [vmem:[%s6498_s28 + $0x220] sm:$0xff] }
  0x7e   : > { %1362 = vmatmul.mubr.bf16.gmra.mrb[28].mxu0 %v595_v47  ;;  %v520_v47 = vld [vmem:[%s6498_s28 + $0x2b0] sm:$0xff] }
  0x7f   : > { %1401 = vmatpush1.bf16.msra.mxu0 %v5644_v46  ;;  %1404 = vmatprep.mubr.bf16.mxu0 %v549_v49  ;;  %v5683_v46 = vld [vmem:[%s8153_s2 + $0x2b0] ss:$8 sps:$4 sm:$0xff]   ;;  %v5688_v49 = vld [vmem:[%s8153_s2 + $0x2c4] ss:$8 sps:$4 sm:$0xff]  }
  0x80   : > { %1402 = vmatprep.subr.bf16.mxu0 %v5649_v48  ;;  %v527_v48 = vld [vmem:[%s6498_s28 + $0x2e8] sm:$0xff] }
  0x81   : > { %v590_v52 = vpack.c.bf16 %v527_v48, %v520_v47  ;;  %v5728_v47 = vld [vmem:[%s8155_s4 + $0x94] ss:$8 sps:$4 sm:$0xff]   ;;  %v494_v48 = vld [vmem:[%s6498_s28 + $0x1e0] sm:$0xff] }
  0x83   : > { %1403 = vmatpush1.bf16.msra.mxu0 %v5647_v50  ;;  %v535_v50 = vld [vmem:[%s6498_s28 + $0x328] sm:$0xff] }
  0x84   : > { %1485 = vmatprep.subr.bf16.mxu0 %v5652_v53  ;;  %v5686_v53 = vld [vmem:[%s8153_s2 + $0x2c0] ss:$8 sps:$4 sm:$0xff]   ;;  %v598_v54 = vpack.c.bf16 %v542_v51, %v535_v50  ;;  %v509_v50 = vld [vmem:[%s6498_s28 + $0x258] sm:$0xff]  ;;  %v516_v51 = vld [vmem:[%s6498_s28 + $0x290] sm:$0xff] }
  0x86   : > { %1405 = vmatmul.mubr.bf16.vlgmr.msra.gmra.mrb[0].mxu0 %v548_v57  ;;  %v534_v57 = vld [vmem:[%s6498_s28 + $0x320] sm:$0xff] }
  0x87   : > { %1486 = vmatpush1.bf16.msra.mxu0 %v5650_v56  ;;  %1414 = vmatprep.mubr.bf16.mxu0 %v556_v59  ;;  %v5689_v56 = vld [vmem:[%s8153_s2 + $0x2d0] ss:$8 sps:$4 sm:$0xff]   ;;  %v5694_v59 = vld [vmem:[%s8153_s2 + $0x2e4] ss:$8 sps:$4 sm:$0xff]  }
  0x88   : > { %1487 = vmatprep.subr.bf16.mxu0 %v5655_v58  ;;  %v541_v58 = vld [vmem:[%s6498_s28 + $0x358] sm:$0xff] }
  0x89   : > { %v597_v62 = vpack.c.bf16 %v541_v58, %v534_v57  ;;  %v5734_v57 = vld [vmem:[%s8155_s4 + $0xb4] ss:$8 sps:$4 sm:$0xff]  }
  0x8a   : > { %v508_v58 = vld [vmem:[%s6498_s28 + $0x250] sm:$0xff] }
  0x8b   : > { %1488 = vmatpush1.bf16.msra.mxu0 %v5653_v60  ;;  %v439_v60 = vld [vmem:[%s6498_s28 + $0x28] sm:$0xff] }
  0x8c   : > { %1489 = vmatprep.subr.bf16.mxu0 %v5658_v63  ;;  %v5692_v63 = vld [vmem:[%s8153_s2 + $0x2e0] ss:$8 sps:$4 sm:$0xff]   ;;  %v551_v0 = vpack.c.bf16 %v446_v61, %v439_v60 }
  0x8d   : > { %v523_v60 = vld [vmem:[%s6498_s28 + $0x2c8] sm:$0xff]  ;;  %v530_v61 = vld [vmem:[%s6498_s28 + $0x300] sm:$0xff] }
  0x8e   : > { %1415 = vmatmul.mubr.bf16.gmra.mrb[4].mxu0 %v555_v3  ;;  %v5703_v3 = vld [vmem:[%s8155_s4] ss:$8 sps:$4 sm:$0xff]  }
  0x8f   : > { %1490 = vmatpush1.bf16.msra.mxu0 %v5656_v2  ;;  %1424 = vmatprep.mubr.bf16.mxu0 %v563_v5  ;;  %v5701_v2 = vld [vmem:[%s8155_s4 + $0x4] ss:$8 sps:$4 sm:$0xff]   ;;  %v5695_v5 = vld [vmem:[%s8153_s2 + $0x2f0] ss:$8 sps:$4 sm:$0xff]  }
  0x90   : > { %1491 = vmatprep.subr.bf16.mxu0 %v5661_v4  ;;  %v5704_v4 = vld [vmem:[%s8155_s4 + $0x14] ss:$8 sps:$4 sm:$0xff]   ;;  %1963 = vmatprep.subr.bf16.mxu1 %v5701_v2  ;;  %v5739_v2 = vld [vmem:[%s8155_s4 + $0xc0] ss:$8 sps:$4 sm:$0xff]  }
  0x91   : > { %1964 = vmatpush1.bf16.msra.mxu1 %v5703_v3  ;;  %v5740_v3 = vld [vmem:[%s8155_s4 + $0xd4] ss:$8 sps:$4 sm:$0xff]  }
  0x92   : > { %1965 = vmatprep.subr.bf16.mxu1 %v5704_v4  ;;  %v522_v4 = vld [vmem:[%s6498_s28 + $0x2c0] sm:$0xff] }
  0x93   : > { %1492 = vmatpush1.bf16.msra.mxu0 %v5659_v6  ;;  %v438_v6 = vld [vmem:[%s6498_s28 + $0x20] sm:$0xff] }
  0x94   : > { %1493 = vmatprep.subr.bf16.mxu0 %v5664_v9  ;;  %v453_v9 = vld [vmem:[%s6498_s28 + $0x98] sm:$0xff] }
  0x95   : > { %1966 = vmatpush1.bf16.msra.mxu1 %v5706_v11  ;;  %v543_v11 = vld [vmem:[%s6498_s28 + $0x368] sm:$0xff] }
  0x96   : > { %1425 = vmatmul.mubr.bf16.gmra.mrb[8].mxu0 %v562_v13  ;;  %v5707_v13 = vld [vmem:[%s8155_s4 + $0x24] ss:$8 sps:$4 sm:$0xff]  }
  0x97   : > { %1494 = vmatpush1.bf16.msra.mxu0 %v5662_v12  ;;  %1434 = vmatprep.mubr.bf16.mxu0 %v570_v15  ;;  %v550_v12 = vpack.c.bf16 %v445_v7, %v438_v6  ;;  %v558_v15 = vpack.c.bf16 %v460_v10, %v453_v9  ;;  %v537_v6 = vld [vmem:[%s6498_s28 + $0x338] sm:$0xff]  ;;  %v544_v7 = vld [vmem:[%s6498_s28 + $0x370] sm:$0xff] }
  0x98   : > { %1495 = vmatprep.subr.bf16.mxu0 %v5667_v14  ;;  %v5698_v14 = vld [vmem:[%s8153_s2 + $0x300] ss:$8 sps:$4 sm:$0xff]   ;;  %1967 = vmatprep.subr.bf16.mxu1 %v5707_v13  ;;  %v600_v9 = vpack.c.bf16 %v544_v7, %v537_v6  ;;  %v536_v10 = vld [vmem:[%s6498_s28 + $0x330] sm:$0xff]  ;;  %v6390_v13 = vmov 0  }
  0x9b   : > { %1496 = vmatpush1.bf16.msra.mxu0 %v5665_v16  ;;  %v5709_v16 = vld [vmem:[%s8155_s4 + $0x20] ss:$8 sps:$4 sm:$0xff]  }
  0x9c   : > { %1497 = vmatprep.subr.bf16.mxu0 %v5670_v19  ;;  %v459_v19 = vld [vmem:[%s6498_s28 + $0xc8] sm:$0xff]  ;;  %1968 = vmatpush1.bf16.msra.mxu1 %v5709_v16 }
  0x9d   : > { %1969 = vmatprep.subr.bf16.mxu1 %v5710_v17  ;;  %v454_v17 = vld [vmem:[%s6498_s28 + $0xa0] sm:$0xff] }
  0x9e   : > { %1435 = vmatmul.mubr.bf16.gmra.mrb[12].mxu0 %v569_v23  ;;  %v557_v23 = vpack.c.bf16 %v459_v19, %v452_v18  ;;  %v461_v18 = vld [vmem:[%s6498_s28 + $0xd8] sm:$0xff] }
  0x9f   : > { %1498 = vmatpush1.bf16.msra.mxu0 %v5668_v22  ;;  %1444 = vmatprep.mubr.bf16.mxu0 %v577_v25  ;;  %v5712_v22 = vld [vmem:[%s8155_s4 + $0x30] ss:$8 sps:$4 sm:$0xff]   ;;  %v565_v25 = vpack.c.bf16 %v474_v21, %v467_v20  ;;  %v559_v19 = vpack.c.bf16 %v461_v18, %v454_v17  ;;  %v475_v21 = vld [vmem:[%s6498_s28 + $0x148] sm:$0xff] }
  0xa0   : > { %1499 = vmatprep.subr.bf16.mxu0 %v5673_v24  ;;  %v5713_v24 = vld [vmem:[%s8155_s4 + $0x44] ss:$8 sps:$4 sm:$0xff]   ;;  %1970 = vmatpush1.bf16.msra.mxu1 %v5712_v22  ;;  %v468_v20 = vld [vmem:[%s6498_s28 + $0x110] sm:$0xff] }
  0xa1   : > { %1971 = vmatprep.subr.bf16.mxu1 %v5713_v24  ;;  %v566_v22 = vpack.c.bf16 %v475_v21, %v468_v20  ;;  %v489_v24 = vld [vmem:[%s6498_s28 + $0x1b8] sm:$0xff]  ;;  %v5755_v21 = vld [vmem:[%s8157_s6 + $0x20] ss:$8 sps:$4 sm:$0xff]  }
  0xa3   : > { %1500 = vmatpush1.bf16.msra.mxu0 %v5671_v26  ;;  %v5715_v26 = vld [vmem:[%s8155_s4 + $0x40] ss:$8 sps:$4 sm:$0xff]  }
  0xa4   : > { %1501 = vmatprep.subr.bf16.mxu0 %v5676_v29  ;;  %v473_v29 = vld [vmem:[%s6498_s28 + $0x138] sm:$0xff]  ;;  %1972 = vmatpush1.bf16.msra.mxu1 %v5715_v26  ;;  %v496_v26 = vld [vmem:[%s6498_s28 + $0x1f0] sm:$0xff] }
  0xa5   : > { %1973 = vmatprep.subr.bf16.mxu1 %v5716_v27  ;;  %v503_v27 = vld [vmem:[%s6498_s28 + $0x228] sm:$0xff] }
  0xa6   : > { %1445 = vmatmul.mubr.bf16.gmra.mrb[16].mxu0 %v576_v32  ;;  %v5718_v32 = vld [vmem:[%s8155_s4 + $0x50] ss:$8 sps:$4 sm:$0xff]  }
  0xa7   : > { %1502 = vmatpush1.bf16.msra.mxu0 %v5674_v33  ;;  %1454 = vmatprep.mubr.bf16.mxu0 %v584_v34  ;;  %v564_v33 = vpack.c.bf16 %v473_v29, %v466_v28  ;;  %v5719_v34 = vld [vmem:[%s8155_s4 + $0x64] ss:$8 sps:$4 sm:$0xff]   ;;  %v580_v28 = vpack.c.bf16 %v503_v27, %v496_v26 }
  0xa8   : > { %1503 = vmatprep.subr.bf16.mxu0 %v5679_v35  ;;  %v572_v35 = vpack.c.bf16 %v488_v31, %v481_v30  ;;  %1974 = vmatpush1.bf16.msra.mxu1 %v5718_v32  ;;  %v510_v29 = vld [vmem:[%s6498_s28 + $0x260] sm:$0xff]  ;;  %v517_v30 = vld [vmem:[%s6498_s28 + $0x298] sm:$0xff]  ;;  %v524_v32 = vld [vmem:[%s6498_s28 + $0x2d0] sm:$0xff] }
  0xa9   : > { %1975 = vmatprep.subr.bf16.mxu1 %v5719_v34  ;;  %v587_v31 = vpack.c.bf16 %v517_v30, %v510_v29  ;;  %v5758_v30 = vld [vmem:[%s8157_s6 + $0x30] ss:$8 sps:$4 sm:$0xff]  }
  0xab   : > { %1504 = vmatpush1.bf16.msra.mxu0 %v5677_v36  ;;  %v5721_v36 = vld [vmem:[%s8155_s4 + $0x60] ss:$8 sps:$4 sm:$0xff]  }
  0xac   : > { %1505 = vmatprep.subr.bf16.mxu0 %v5682_v39  ;;  %v487_v39 = vld [vmem:[%s6498_s28 + $0x1a8] sm:$0xff]  ;;  %1976 = vmatpush1.bf16.msra.mxu1 %v5721_v36  ;;  %v545_v36 = vld [vmem:[%s6498_s28 + $0x378] sm:$0xff] }
  0xad   : > { %1977 = vmatprep.subr.bf16.mxu1 %v5722_v37 }
  0xae   : > { %1455 = vmatmul.mubr.bf16.gmra.mrb[20].mxu0 %v583_v42  ;;  %v5724_v42 = vld [vmem:[%s8155_s4 + $0x70] ss:$8 sps:$4 sm:$0xff]  }
  0xaf   : > { %1506 = vmatpush1.bf16.msra.mxu0 %v5680_v43  ;;  %1464 = vmatprep.mubr.bf16.mxu0 %v591_v44  ;;  %v571_v43 = vpack.c.bf16 %v487_v39, %v480_v38  ;;  %v5725_v44 = vld [vmem:[%s8155_s4 + $0x84] ss:$8 sps:$4 sm:$0xff]   ;;  %v5742_v38 = vld [vmem:[%s8155_s4 + $0xd0] ss:$8 sps:$4 sm:$0xff]  }
  0xb0   : > { %1507 = vmatprep.subr.bf16.mxu0 %v5685_v45  ;;  %v579_v45 = vpack.c.bf16 %v502_v41, %v495_v40  ;;  %1978 = vmatpush1.bf16.msra.mxu1 %v5724_v42  ;;  %v5743_v39 = vld [vmem:[%s8155_s4 + $0xe4] ss:$8 sps:$4 sm:$0xff]   ;;  %v5745_v40 = vld [vmem:[%s8155_s4 + $0xe0] ss:$8 sps:$4 sm:$0xff]   ;;  %v5746_v41 = vld [vmem:[%s8155_s4 + $0xf4] ss:$8 sps:$4 sm:$0xff]  }
  0xb1   : > { %1979 = vmatprep.subr.bf16.mxu1 %v5725_v44  ;;  %v5748_v42 = vld [vmem:[%s8155_s4 + $0xf0] ss:$8 sps:$4 sm:$0xff]   ;;  %v734_v44 = vlaneseq }
  0xb3   : > { %1508 = vmatpush1.bf16.msra.mxu0 %v5683_v46  ;;  %v5727_v46 = vld [vmem:[%s8155_s4 + $0x80] ss:$8 sps:$4 sm:$0xff]  }
  0xb4   : > { %1509 = vmatprep.subr.bf16.mxu0 %v5688_v49  ;;  %v501_v49 = vld [vmem:[%s6498_s28 + $0x218] sm:$0xff]  ;;  %1980 = vmatpush1.bf16.msra.mxu1 %v5727_v46 }
  0xb5   : > { %1981 = vmatprep.subr.bf16.mxu1 %v5728_v47  ;;  %v732_v47 = vld [vmem:[%s8154_s3] sm:$0x3] }
  0xb6   : > { %1465 = vmatmul.mubr.bf16.gmra.mrb[24].mxu0 %v590_v52  ;;  %v5730_v52 = vld [vmem:[%s8155_s4 + $0x90] ss:$8 sps:$4 sm:$0xff]  }
  0xb7   : > { %1510 = vmatpush1.bf16.msra.mxu0 %v5686_v53  ;;  %1474 = vmatprep.mubr.bf16.mxu0 %v598_v54  ;;  %v578_v53 = vpack.c.bf16 %v501_v49, %v494_v48  ;;  %v5731_v54 = vld [vmem:[%s8155_s4 + $0xa4] ss:$8 sps:$4 sm:$0xff]  }
  0xb8   : > { %1511 = vmatprep.subr.bf16.mxu0 %v5691_v55  ;;  %v586_v55 = vpack.c.bf16 %v516_v51, %v509_v50  ;;  %1982 = vmatpush1.bf16.msra.mxu1 %v5730_v52 }
  0xb9   : > { %1983 = vmatprep.subr.bf16.mxu1 %v5731_v54 }
  0xbb   : > { %1512 = vmatpush1.bf16.msra.mxu0 %v5689_v56  ;;  %v5733_v56 = vld [vmem:[%s8155_s4 + $0xa0] ss:$8 sps:$4 sm:$0xff]  }
  0xbc   : > { %1513 = vmatprep.subr.bf16.mxu0 %v5694_v59  ;;  %v515_v59 = vld [vmem:[%s6498_s28 + $0x288] sm:$0xff]  ;;  %1984 = vmatpush1.bf16.msra.mxu1 %v5733_v56 }
  0xbd   : > { %1985 = vmatprep.subr.bf16.mxu1 %v5734_v57 }
  0xbe   : > { %1475 = vmatmul.mubr.bf16.gmra.mrb[28].mxu0 %v597_v62  ;;  %v5736_v62 = vld [vmem:[%s8155_s4 + $0xb0] ss:$8 sps:$4 sm:$0xff]  }
  0xbf   : > { %1514 = vmatpush1.bf16.msra.mxu0 %v5692_v63  ;;  %1517 = vmatprep.mubr.bf16.mxu0 %v551_v0  ;;  %v585_v63 = vpack.c.bf16 %v515_v59, %v508_v58  ;;  %v5737_v0 = vld [vmem:[%s8155_s4 + $0xc4] ss:$8 sps:$4 sm:$0xff]  }
  0xc0   : > { %1515 = vmatprep.subr.bf16.mxu0 %v5697_v1  ;;  %v593_v1 = vpack.c.bf16 %v530_v61, %v523_v60  ;;  %1986 = vmatpush1.bf16.msra.mxu1 %v5736_v62 }
  0xc1   : > { %1987 = vmatprep.subr.bf16.mxu1 %v5737_v0 }
  0xc3   : > { %1516 = vmatpush1.bf16.msra.mxu0 %v5695_v5  ;;  %v529_v5 = vld [vmem:[%s6498_s28 + $0x2f8] sm:$0xff] }
  0xc4   : > { %1598 = vmatprep.subr.bf16.mxu0 %v5700_v8  ;;  %1988 = vmatpush1.bf16.msra.mxu1 %v5739_v2  ;;  %v592_v8 = vpack.c.bf16 %v529_v5, %v522_v4  ;;  %v5749_v2 = vld [vmem:[%s8157_s6] ss:$8 sps:$4 sm:$0xff]   ;;  %v5754_v5 = vld [vmem:[%s8157_s6 + $0x14] ss:$8 sps:$4 sm:$0xff]  }
  0xc5   : > { %1989 = vmatprep.subr.bf16.mxu1 %v5740_v3 }
  0xc6   : > { %1518 = vmatmul.mubr.bf16.vlgmr.msra.gmra.mrb[0].mxu0 %v550_v12  ;;  %v599_v12 = vpack.c.bf16 %v543_v11, %v536_v10  ;;  %v5752_v11 = vld [vmem:[%s8157_s6 + $0x10] ss:$8 sps:$4 sm:$0xff]  }
  0xc7   : > { %1599 = vmatpush1.bf16.msra.mxu0 %v5698_v14  ;;  %1527 = vmatprep.mubr.bf16.mxu0 %v558_v15  ;;  %v440_v14 = vld [vmem:[%s6498_s28 + $0x30] sm:$0xff]  ;;  %v447_v15 = vld [vmem:[%s6498_s28 + $0x68] sm:$0xff] }
  0xc8   : > { %v552_v16 = vpack.c.bf16 %v447_v15, %v440_v14  ;;  %1990 = vmatpush1.bf16.msra.mxu1 %v5742_v38  ;;  %v5757_v15 = vld [vmem:[%s8157_s6 + $0x24] ss:$8 sps:$4 sm:$0xff]  }
  0xc9   : > { %1991 = vmatprep.subr.bf16.mxu1 %v5743_v39  ;;  %v5761_v39 = vld [vmem:[%s8157_s6 + $0x40] ss:$8 sps:$4 sm:$0xff]  }
  0xcc   : > { %1992 = vmatpush1.bf16.msra.mxu1 %v5745_v40 }
  0xcd   : > { %1993 = vmatprep.subr.bf16.mxu1 %v5746_v41 }
  0xce   : > { %1528 = vmatmul.mubr.bf16.gmra.mrb[4].mxu0 %v557_v23  ;;  %v482_v23 = vld [vmem:[%s6498_s28 + $0x180] sm:$0xff] }
  0xcf   : > { %1537 = vmatprep.mubr.bf16.mxu0 %v565_v25  ;;  %v573_v25 = vpack.c.bf16 %v489_v24, %v482_v23  ;;  %v5760_v24 = vld [vmem:[%s8157_s6 + $0x34] ss:$8 sps:$4 sm:$0xff]  }
  0xd0   : > { %1994 = vmatpush1.bf16.msra.mxu1 %v5748_v42  ;;  %v5766_v42 = vld [vmem:[%s8157_s6 + $0x54] ss:$8 sps:$4 sm:$0xff]  }
  0xd6   : > { %1538 = vmatmul.mubr.bf16.gmra.mrb[8].mxu0 %v564_v33  ;;  %v531_v33 = vld [vmem:[%s6498_s28 + $0x308] sm:$0xff] }
  0xd7   : > { %1547 = vmatprep.mubr.bf16.mxu0 %v572_v35  ;;  %v594_v34 = vpack.c.bf16 %v531_v33, %v524_v32  ;;  %v538_v35 = vld [vmem:[%s6498_s28 + $0x340] sm:$0xff] }
  0xd8   : > { %v601_v37 = vpack.c.bf16 %v545_v36, %v538_v35  ;;  %v5763_v33 = vld [vmem:[%s8157_s6 + $0x44] ss:$8 sps:$4 sm:$0xff]  }
  0xde   : > { %1548 = vmatmul.mubr.bf16.gmra.mrb[12].mxu0 %v571_v43  ;;  %v5751_v43 = vld [vmem:[%s8157_s6 + $0x4] ss:$8 sps:$4 sm:$0xff]  }
  0xdf   : > { %1557 = vmatprep.mubr.bf16.mxu0 %v579_v45  ;;  %2336 = vmatprep.subr.bf16.mxu1 %v5751_v43  ;;  %v6988_v45 = vshrl.u32 %v734_v44, 7 }
  0xe1   : > { %v6991_v46 = vsub.s32 0, %v6988_v45  ;;  %v6997_v48 = vsub.s32 1, %v6988_v45 }
  0xe3   : > { %v7000_v49 = vrot.slane %v732_v47, %v6991_v46  ;;  %v7003_v50 = vrot.slane %v732_v47, %v6997_v48 }
  0xe6   : > { %1558 = vmatmul.mubr.bf16.gmra.mrb[16].mxu0 %v578_v53 }
  0xe7   : > { %1567 = vmatprep.mubr.bf16.mxu0 %v586_v55 }
  0xee   : > { %1568 = vmatmul.mubr.bf16.gmra.mrb[20].mxu0 %v585_v63 }
  0xef   : > { %1577 = vmatprep.mubr.bf16.mxu0 %v593_v1 }
  0xf6   : > { %1578 = vmatmul.mubr.bf16.gmra.mrb[24].mxu0 %v592_v8 }
  0xf7   : > { %1587 = vmatprep.mubr.bf16.mxu0 %v600_v9 }
  0xfe   : > { %1588 = vmatmul.mubr.bf16.gmra.mrb[28].mxu0 %v599_v12 }
  0xff   : > { %1630 = vmatprep.mubr.bf16.mxu0 %v6390_v13 }
 0x106   : > { %4981 = vmatmul.mubr.msk.bf16.vlgmr.msra.gmra.mrb[0].mxu0 %vm1234_vm0, %v552_v16 }
 0x107   : > { %1640 = vmatprep.mubr.bf16.mxu0 %v6390_v13 }
 0x10e   : > { %4982 = vmatmul.mubr.msk.bf16.gmra.mrb[4].mxu0 %vm1234_vm0, %v559_v19 }
 0x10f   : > { %1650 = vmatprep.mubr.bf16.mxu0 %v6390_v13 }
 0x116   : > { %4983 = vmatmul.mubr.msk.bf16.gmra.mrb[8].mxu0 %vm1234_vm0, %v566_v22 }
 0x117   : > { %1660 = vmatprep.mubr.bf16.mxu0 %v6390_v13 }
 0x11e   : > { %4984 = vmatmul.mubr.msk.bf16.gmra.mrb[12].mxu0 %vm1234_vm0, %v573_v25 }
 0x11f   : > { %1670 = vmatprep.mubr.bf16.mxu0 %v6390_v13 }
 0x126   : > { %4985 = vmatmul.mubr.msk.bf16.gmra.mrb[16].mxu0 %vm1234_vm0, %v580_v28 }
 0x127   : > { %1680 = vmatprep.mubr.bf16.mxu0 %v6390_v13 }
 0x12e   : > { %4986 = vmatmul.mubr.msk.bf16.gmra.mrb[20].mxu0 %vm1234_vm0, %v587_v31 }
 0x12f   : > { %1690 = vmatprep.mubr.bf16.mxu0 %v6390_v13 }
 0x136   : > { %4987 = vmatmul.mubr.msk.bf16.gmra.mrb[24].mxu0 %vm1234_vm0, %v594_v34 }
 0x137   : > { %1700 = vmatprep.mubr.bf16.mxu0 %v6390_v13 }
 0x13e   : > { %4988 = vmatmul.mubr.msk.bf16.gmra.mrb[28].mxu0 %vm1234_vm0, %v601_v37 }
 0x1d9   : > { %v1632_v51 = vpop.f32.mrb[0].mxu0 }
 0x1da   : > { %v5415_v52 = vadd.f32 %v1632_v51, %v7000_v49  ;;  %v1634_v53 = vpop.f32.mrb[1].mxu0 }
 0x1db   : > { %v5416_v54 = vadd.f32 %v1634_v53, %v7003_v50  ;;  %v1636_v55 = vpop.f32.mrb[2].mxu0  ;;  %v5764_v53 = vld [vmem:[%s8157_s6 + $0x50] ss:$8 sps:$4 sm:$0xff]  }
 0x1dc   : > { %v5417_v56 = vadd.f32 %v1636_v55, %v7000_v49  ;;  %v1638_v57 = vpop.f32.mrb[3].mxu0  ;;  %v1711_v59 = vmax.f32 %v5415_v52, 0.0 }
 0x1dd   : > { %v5418_v58 = vadd.f32 %v1638_v57, %v7003_v50  ;;  %v1712_v61 = vmax.f32 %v5416_v54, 0.0 }
 0x1de   : > { %v1713_v60 = vmax.f32 %v5417_v56, 0.0  ;;  %v5769_v56 = vld [vmem:[%s8157_s6 + $0x64] ss:$8 sps:$4 sm:$0xff]  }
 0x1df   : > { %v1714_v62 = vmax.f32 %v5418_v58, 0.0 }
 0x1e0   : > { %v1743_v63 = vpack.c.bf16 %v1713_v60, %v1711_v59 }
 0x1e1   : > { %v1642_v0 = vpop.f32.mrb[4].mxu0  ;;  %v1744_v1 = vpack.c.bf16 %v1714_v62, %v1712_v61  ;;  %v5767_v62 = vld [vmem:[%s8157_s6 + $0x60] ss:$8 sps:$4 sm:$0xff]  }
 0x1e2   : > { %v5419_v3 = vadd.f32 %v1642_v0, %v7000_v49  ;;  %v1644_v4 = vpop.f32.mrb[5].mxu0 }
 0x1e3   : > { %v5420_v6 = vadd.f32 %v1644_v4, %v7003_v50  ;;  %v1646_v7 = vpop.f32.mrb[6].mxu0  ;;  %1995 = vmatprep.mubr.bf16.mxu1 %v1744_v1 }
 0x1e4   : > { %v5421_v8 = vadd.f32 %v1646_v7, %v7000_v49  ;;  %v1648_v9 = vpop.f32.mrb[7].mxu0  ;;  %1996 = vmatmul.mubr.bf16.vlgmr.msra.gmra.mrb[0].mxu1 %v1743_v63  ;;  %v1715_v12 = vmax.f32 %v5419_v3, 0.0 }
 0x1e5   : > { %v5422_v10 = vadd.f32 %v1648_v9, %v7003_v50  ;;  %2337 = vmatpush1.bf16.msra.mxu1 %v5749_v2  ;;  %v1716_v16 = vmax.f32 %v5420_v6, 0.0 }
 0x1e6   : > { %v1717_v14 = vmax.f32 %v5421_v8, 0.0  ;;  %2338 = vmatprep.subr.bf16.mxu1 %v5754_v5 }
 0x1e7   : > { %v1718_v17 = vmax.f32 %v5422_v10, 0.0 }
 0x1e8   : > { %v1745_v18 = vpack.c.bf16 %v1717_v14, %v1715_v12 }
 0x1e9   : > { %v1746_v19 = vpack.c.bf16 %v1718_v17, %v1716_v16  ;;  %v1652_v20 = vpop.f32.mrb[8].mxu0  ;;  %2339 = vmatpush1.bf16.msra.mxu1 %v5752_v11 }
 0x1ea   : > { %v5423_v22 = vadd.f32 %v1652_v20, %v7000_v49  ;;  %v1654_v23 = vpop.f32.mrb[9].mxu0  ;;  %2340 = vmatprep.subr.bf16.mxu1 %v5757_v15 }
 0x1eb   : > { %v5424_v25 = vadd.f32 %v1654_v23, %v7003_v50  ;;  %v1656_v26 = vpop.f32.mrb[10].mxu0  ;;  %2005 = vmatprep.mubr.bf16.mxu1 %v1746_v19 }
 0x1ec   : > { %v5425_v27 = vadd.f32 %v1656_v26, %v7000_v49  ;;  %v1658_v28 = vpop.f32.mrb[11].mxu0  ;;  %2006 = vmatmul.mubr.bf16.gmra.mrb[4].mxu1 %v1745_v18  ;;  %v1719_v31 = vmax.f32 %v5423_v22, 0.0 }
 0x1ed   : > { %v5426_v29 = vadd.f32 %v1658_v28, %v7003_v50  ;;  %2341 = vmatpush1.bf16.msra.mxu1 %v5755_v21  ;;  %v1720_v34 = vmax.f32 %v5424_v25, 0.0 }
 0x1ee   : > { %v1721_v32 = vmax.f32 %v5425_v27, 0.0  ;;  %2342 = vmatprep.subr.bf16.mxu1 %v5760_v24 }
 0x1ef   : > { %v1722_v35 = vmax.f32 %v5426_v29, 0.0 }
 0x1f0   : > { %v1747_v36 = vpack.c.bf16 %v1721_v32, %v1719_v31 }
 0x1f1   : > { %v1748_v37 = vpack.c.bf16 %v1722_v35, %v1720_v34  ;;  %v1662_v38 = vpop.f32.mrb[12].mxu0  ;;  %2343 = vmatpush1.bf16.msra.mxu1 %v5758_v30 }
 0x1f2   : > { %v5427_v40 = vadd.f32 %v1662_v38, %v7000_v49  ;;  %v1664_v41 = vpop.f32.mrb[13].mxu0  ;;  %2344 = vmatprep.subr.bf16.mxu1 %v5763_v33 }
 0x1f3   : > { %v5428_v43 = vadd.f32 %v1664_v41, %v7003_v50  ;;  %v1666_v44 = vpop.f32.mrb[14].mxu0  ;;  %2015 = vmatprep.mubr.bf16.mxu1 %v1748_v37 }
 0x1f4   : > { %v5429_v47 = vadd.f32 %v1666_v44, %v7000_v49  ;;  %v1668_v51 = vpop.f32.mrb[15].mxu0  ;;  %2016 = vmatmul.mubr.bf16.gmra.mrb[8].mxu1 %v1747_v36  ;;  %v1723_v54 = vmax.f32 %v5427_v40, 0.0 }
 0x1f5   : > { %v5430_v52 = vadd.f32 %v1668_v51, %v7003_v50  ;;  %2345 = vmatpush1.bf16.msra.mxu1 %v5761_v39  ;;  %v1724_v57 = vmax.f32 %v5428_v43, 0.0 }
 0x1f6   : > { %v1725_v55 = vmax.f32 %v5429_v47, 0.0  ;;  %2346 = vmatprep.subr.bf16.mxu1 %v5766_v42 }
 0x1f7   : > { %v1726_v58 = vmax.f32 %v5430_v52, 0.0 }
 0x1f8   : > { %v1749_v59 = vpack.c.bf16 %v1725_v55, %v1723_v54 }
 0x1f9   : > { %v1750_v60 = vpack.c.bf16 %v1726_v58, %v1724_v57  ;;  %v1672_v61 = vpop.f32.mrb[16].mxu0  ;;  %2347 = vmatpush1.bf16.msra.mxu1 %v5764_v53 }
 0x1fa   : > { %v5431_v63 = vadd.f32 %v1672_v61, %v7000_v49  ;;  %v1674_v0 = vpop.f32.mrb[17].mxu0  ;;  %2348 = vmatprep.subr.bf16.mxu1 %v5769_v56  ;;  %v5776_v61 = vld [vmem:[%s8159_s8 + $0x10] ss:$28 sps:$4 sm:$0xff]  }
 0x1fb   : > { %v5432_v1 = vadd.f32 %v1674_v0, %v7003_v50  ;;  %v1676_v2 = vpop.f32.mrb[18].mxu0  ;;  %2025 = vmatprep.mubr.bf16.mxu1 %v1750_v60  ;;  %v5772_v60 = vld [vmem:[%s8157_s6 + $0x74] ss:$8 sps:$4 sm:$0xff]   ;;  %v5782_v0 = vld [vmem:[%s8159_s8 + $0x48] ss:$28 sps:$4 sm:$0xff]  }
 0x1fc   : > { %v5433_v3 = vadd.f32 %v1676_v2, %v7000_v49  ;;  %v1678_v4 = vpop.f32.mrb[19].mxu0  ;;  %2026 = vmatmul.mubr.bf16.gmra.mrb[12].mxu1 %v1749_v59  ;;  %v1727_v6 = vmax.f32 %v5431_v63, 0.0  ;;  %v5784_v63 = vld [vmem:[%s8159_s8 + $0x4c] ss:$28 sps:$4 sm:$0xff]   ;;  %v5788_v2 = vld [vmem:[%s8159_s8 + $0x80] ss:$28 sps:$4 sm:$0xff]  }
 0x1fd   : > { %v5434_v5 = vadd.f32 %v1678_v4, %v7003_v50  ;;  %2349 = vmatpush1.bf16.msra.mxu1 %v5767_v62  ;;  %v1728_v8 = vmax.f32 %v5432_v1, 0.0  ;;  %v5778_v62 = vld [vmem:[%s8159_s8 + $0x14] ss:$28 sps:$4 sm:$0xff]   ;;  %v5790_v1 = vld [vmem:[%s8159_s8 + $0x84] ss:$28 sps:$4 sm:$0xff]  }
 0x1fe   : > { %v1729_v7 = vmax.f32 %v5433_v3, 0.0  ;;  %2350 = vmatprep.subr.bf16.mxu1 %v5772_v60  ;;  %3464 = vmatprep.subr.bf16.mxu0 %v5778_v62  ;;  %v5796_v3 = vld [vmem:[%s8159_s8 + $0xbc] ss:$28 sps:$4 sm:$0xff]  }
 0x1ff   : > { %v1730_v9 = vmax.f32 %v5434_v5, 0.0  ;;  %3465 = vmatpush1.bf16.msra.mxu0 %v5776_v61  ;;  %v5794_v4 = vld [vmem:[%s8159_s8 + $0xb8] ss:$28 sps:$4 sm:$0xff]  }
 0x200   : > { %v1751_v10 = vpack.c.bf16 %v1729_v7, %v1727_v6  ;;  %3466 = vmatprep.subr.bf16.mxu0 %v5784_v63  ;;  %v5802_v5 = vld [vmem:[%s8159_s8 + $0xf4] ss:$28 sps:$4 sm:$0xff]   ;;  %v5808_v7 = vld [vmem:[%s8159_s8 + $0x12c] ss:$28 sps:$4 sm:$0xff]  }
 0x201   : > { %v1752_v11 = vpack.c.bf16 %v1730_v9, %v1728_v8  ;;  %v1682_v12 = vpop.f32.mrb[20].mxu0  ;;  %v5800_v6 = vld [vmem:[%s8159_s8 + $0xf0] ss:$28 sps:$4 sm:$0xff]   ;;  %v5806_v8 = vld [vmem:[%s8159_s8 + $0x128] ss:$28 sps:$4 sm:$0xff]  }
 0x202   : > { %v5435_v14 = vadd.f32 %v1682_v12, %v7000_v49  ;;  %v1684_v15 = vpop.f32.mrb[21].mxu0  ;;  %v5814_v9 = vld [vmem:[%s8159_s8 + $0x164] ss:$28 sps:$4 sm:$0xff]   ;;  %v5818_v12 = vld [vmem:[%s8159_s8 + $0x198] ss:$28 sps:$4 sm:$0xff]  }
 0x203   : > { %v5436_v16 = vadd.f32 %v1684_v15, %v7003_v50  ;;  %v1686_v17 = vpop.f32.mrb[22].mxu0  ;;  %2035 = vmatprep.mubr.bf16.mxu1 %v1752_v11  ;;  %3467 = vmatpush1.bf16.msra.mxu0 %v5782_v0  ;;  %v5820_v11 = vld [vmem:[%s8159_s8 + $0x19c] ss:$28 sps:$4 sm:$0xff]   ;;  %v5824_v15 = vld [vmem:[%s8159_s8 + $0x1d0] ss:$28 sps:$4 sm:$0xff]  }
 0x204   : > { %v5437_v18 = vadd.f32 %v1686_v17, %v7000_v49  ;;  %v1688_v19 = vpop.f32.mrb[23].mxu0  ;;  %2036 = vmatmul.mubr.bf16.gmra.mrb[16].mxu1 %v1751_v10  ;;  %v1731_v21 = vmax.f32 %v5435_v14, 0.0  ;;  %3468 = vmatprep.subr.bf16.mxu0 %v5790_v1  ;;  %v5812_v10 = vld [vmem:[%s8159_s8 + $0x160] ss:$28 sps:$4 sm:$0xff]   ;;  %v5826_v14 = vld [vmem:[%s8159_s8 + $0x1d4] ss:$28 sps:$4 sm:$0xff]  }
 0x205   : > { %v5438_v20 = vadd.f32 %v1688_v19, %v7003_v50  ;;  %v1732_v23 = vmax.f32 %v5436_v16, 0.0  ;;  %v5832_v16 = vld [vmem:[%s8159_s8 + $0x20c] ss:$28 sps:$4 sm:$0xff]   ;;  %v5836_v19 = vld [vmem:[%s8159_s8 + $0x240] ss:$28 sps:$4 sm:$0xff]   ;;  %v5345_v1 = vld [vmem:[%s7177_s20 + $0x10] sm:$0xff]  }
 0x206   : > { %v1733_v22 = vmax.f32 %v5437_v18, 0.0  ;;  %v5830_v17 = vld [vmem:[%s8159_s8 + $0x208] ss:$28 sps:$4 sm:$0xff]  }
 0x207   : > { %v1734_v24 = vmax.f32 %v5438_v20, 0.0  ;;  %3469 = vmatpush1.bf16.msra.mxu0 %v5788_v2  ;;  %v5838_v18 = vld [vmem:[%s8159_s8 + $0x244] ss:$28 sps:$4 sm:$0xff]   ;;  %v5844_v20 = vld [vmem:[%s8159_s8 + $0x27c] ss:$28 sps:$4 sm:$0xff]  }
 0x208   : > { %v1753_v25 = vpack.c.bf16 %v1733_v22, %v1731_v21  ;;  %3470 = vmatprep.subr.bf16.mxu0 %v5796_v3  ;;  %v5842_v21 = vld [vmem:[%s8159_s8 + $0x278] ss:$28 sps:$4 sm:$0xff]  }
 0x209   : > { %v1754_v26 = vpack.c.bf16 %v1734_v24, %v1732_v23  ;;  %v1692_v27 = vpop.f32.mrb[24].mxu0  ;;  %v5850_v22 = vld [vmem:[%s8159_s8 + $0x2b4] ss:$28 sps:$4 sm:$0xff]   ;;  %v5856_v24 = vld [vmem:[%s8159_s8 + $0x2ec] ss:$28 sps:$4 sm:$0xff]  }
 0x20a   : > { %v5439_v28 = vadd.f32 %v1692_v27, %v7000_v49  ;;  %v1694_v29 = vpop.f32.mrb[25].mxu0  ;;  %v5848_v23 = vld [vmem:[%s8159_s8 + $0x2b0] ss:$28 sps:$4 sm:$0xff]   ;;  %v5779_v2 = vld [vmem:[%s8159_s8 + $0x38] ss:$28 sps:$4 sm:$0xff]  }
 0x20b   : > { %v5440_v30 = vadd.f32 %v1694_v29, %v7003_v50  ;;  %v1696_v31 = vpop.f32.mrb[26].mxu0  ;;  %2045 = vmatprep.mubr.bf16.mxu1 %v1754_v26  ;;  %3471 = vmatpush1.bf16.msra.mxu0 %v5794_v4  ;;  %v1791_v26 = vld [vmem:[%s8156_s5] sm:$0x3] }
 0x20c   : > { %v5441_v32 = vadd.f32 %v1696_v31, %v7000_v49  ;;  %v1698_v33 = vpop.f32.mrb[27].mxu0  ;;  %2046 = vmatmul.mubr.bf16.gmra.mrb[20].mxu1 %v1753_v25  ;;  %v1735_v35 = vmax.f32 %v5439_v28, 0.0  ;;  %3472 = vmatprep.subr.bf16.mxu0 %v5802_v5  ;;  %v5854_v25 = vld [vmem:[%s8159_s8 + $0x2e8] ss:$28 sps:$4 sm:$0xff]   ;;  %v7180_v27 = vrot.slane %v1791_v26, %v6991_v46  ;;  %v7184_v29 = vrot.slane %v1791_v26, %v6997_v48 }
 0x20d   : > { %v5442_v34 = vadd.f32 %v1698_v33, %v7003_v50  ;;  %v1736_v37 = vmax.f32 %v5440_v30, 0.0  ;;  %v5313_v28 = vld [vmem:[%s7177_s20] sm:$0xff]  }
 0x20e   : > { %v1737_v36 = vmax.f32 %v5441_v32, 0.0  ;;  %v5314_v31 = vunpack.c.l.bf16 %v5313_v28 }
 0x20f   : > { %v1738_v38 = vmax.f32 %v5442_v34, 0.0  ;;  %3473 = vmatpush1.bf16.msra.mxu0 %v5800_v6  ;;  %v5787_v6 = vld [vmem:[%s8159_s8 + $0x74] ss:$28 sps:$4 sm:$0xff]  }
 0x210   : > { %v1755_v39 = vpack.c.bf16 %v1737_v36, %v1735_v35  ;;  %3474 = vmatprep.subr.bf16.mxu0 %v5808_v7  ;;  %v5315_v36 = vunpack.c.h.bf16 %v5313_v28 }
 0x211   : > { %v1756_v40 = vpack.c.bf16 %v1738_v38, %v1736_v37  ;;  %v1702_v41 = vpop.f32.mrb[28].mxu0 }
 0x212   : > { %v5443_v42 = vadd.f32 %v1702_v41, %v7000_v49  ;;  %v1704_v43 = vpop.f32.mrb[29].mxu0 }
 0x213   : > { %v5444_v44 = vadd.f32 %v1704_v43, %v7003_v50  ;;  %v1706_v47 = vpop.f32.mrb[30].mxu0  ;;  %2055 = vmatprep.mubr.bf16.mxu1 %v1756_v40  ;;  %3475 = vmatpush1.bf16.msra.mxu0 %v5806_v8 }
 0x214   : > { %v5445_v51 = vadd.f32 %v1706_v47, %v7000_v49  ;;  %v1708_v52 = vpop.f32.mrb[31].mxu0  ;;  %2056 = vmatmul.mubr.bf16.gmra.mrb[24].mxu1 %v1755_v39  ;;  %v1739_v54 = vmax.f32 %v5443_v42, 0.0  ;;  %v5770_v49 = vld [vmem:[%s8157_s6 + $0x70] ss:$8 sps:$4 sm:$0xff]   ;;  %3476 = vmatprep.subr.bf16.mxu0 %v5814_v9  ;;  %v5344_v42 = vld [vmem:[%s7177_s20 + $0x8] sm:$0xff]   ;;  %v5322_v9 = vunpack.c.l.bf16 %v5345_v1 }
 0x215   : > { %v5446_v53 = vadd.f32 %v1708_v52, %v7003_v50  ;;  %v1740_v56 = vmax.f32 %v5444_v44, 0.0  ;;  %2351 = vmatpush1.bf16.msra.mxu1 %v5770_v49  ;;  %v5775_v50 = vld [vmem:[%s8159_s8 + $0x4] ss:$28 sps:$4 sm:$0xff]   ;;  %v5319_v60 = vunpack.c.h.bf16 %v5344_v42  ;;  %v5781_v49 = vld [vmem:[%s8159_s8 + $0x3c] ss:$28 sps:$4 sm:$0xff]  }
 0x216   : > { %v1741_v55 = vmax.f32 %v5445_v51, 0.0  ;;  %3238 = vmatprep.subr.bf16.mxu1 %v5775_v50 }
 0x217   : > { %v1742_v57 = vmax.f32 %v5446_v53, 0.0  ;;  %3477 = vmatpush1.bf16.msra.mxu0 %v5812_v10  ;;  %v5318_v53 = vunpack.c.l.bf16 %v5344_v42  ;;  %v5805_v42 = vld [vmem:[%s8159_s8 + $0x11c] ss:$28 sps:$4 sm:$0xff]  }
 0x218   : > { %v1757_v58 = vpack.c.bf16 %v1741_v55, %v1739_v54  ;;  %3478 = vmatprep.subr.bf16.mxu0 %v5820_v11 }
 0x219   : > { %v1758_v59 = vpack.c.bf16 %v1742_v57, %v1740_v56  ;;  %v5773_v56 = vld [vmem:[%s8159_s8] ss:$28 sps:$4 sm:$0xff]  }
 0x21b   : > { %2065 = vmatprep.mubr.bf16.mxu1 %v1758_v59  ;;  %3479 = vmatpush1.bf16.msra.mxu0 %v5818_v12  ;;  %v5785_v12 = vld [vmem:[%s8159_s8 + $0x70] ss:$28 sps:$4 sm:$0xff]  }
 0x21c   : > { %2066 = vmatmul.mubr.bf16.gmra.mrb[28].mxu1 %v1757_v58  ;;  %3480 = vmatprep.subr.bf16.mxu0 %v5826_v14 }
 0x21d   : > { %2368 = vmatprep.mubr.bf16.mxu1 %v6390_v13 }
 0x21f   : > { %3481 = vmatpush1.bf16.msra.mxu0 %v5824_v15 }
 0x220   : > { %3482 = vmatprep.subr.bf16.mxu0 %v5832_v16  ;;  %v5323_v16 = vunpack.c.h.bf16 %v5345_v1 }
 0x223   : > { %3483 = vmatpush1.bf16.msra.mxu0 %v5830_v17 }
 0x224   : > { %3484 = vmatprep.subr.bf16.mxu0 %v5838_v18  ;;  %v5793_v18 = vld [vmem:[%s8159_s8 + $0xac] ss:$28 sps:$4 sm:$0xff]  }
 0x227   : > { %3485 = vmatpush1.bf16.msra.mxu0 %v5836_v19 }
 0x228   : > { %3486 = vmatprep.subr.bf16.mxu0 %v5844_v20 }
 0x22b   : > { %3487 = vmatpush1.bf16.msra.mxu0 %v5842_v21 }
 0x22c   : > { %3488 = vmatprep.subr.bf16.mxu0 %v5850_v22 }
 0x22f   : > { %3489 = vmatpush1.bf16.msra.mxu0 %v5848_v23 }
 0x230   : > { %3490 = vmatprep.subr.bf16.mxu0 %v5856_v24  ;;  %v5346_v24 = vld [vmem:[%s7177_s20 + $0x18] sm:$0xff]  }
 0x233   : > { %3491 = vmatpush1.bf16.msra.mxu0 %v5854_v25  ;;  %v5791_v25 = vld [vmem:[%s8159_s8 + $0xa8] ss:$28 sps:$4 sm:$0xff]  }
 0x2b7   : > { %v1997_v30 = vpop.f32.mrb[0].mxu1 }
 0x2b8   : > { %v1998_v32 = vadd.f32 %v1997_v30, %v7180_v27  ;;  %v1999_v33 = vpop.f32.mrb[1].mxu1 }
 0x2b9   : > { %v2000_v34 = vadd.f32 %v1999_v33, %v7184_v29  ;;  %v2001_v35 = vpop.f32.mrb[2].mxu1 }
 0x2ba   : > { %v2002_v37 = vadd.f32 %v2001_v35, %v7180_v27  ;;  %v2003_v38 = vpop.f32.mrb[3].mxu1 }
 0x2bb   : > { %v5232_v39 = vpack.c.bf16 %v2000_v34, %v1998_v32  ;;  %v2188_v40 = vmul.f32 %v5314_v31, %v2000_v34  ;;  %v2004_v41 = vadd.f32 %v2003_v38, %v7184_v29  ;;  %v5799_v31 = vld [vmem:[%s8159_s8 + $0xe4] ss:$28 sps:$4 sm:$0xff]   ;;  %v5326_v34 = vunpack.c.l.bf16 %v5346_v24 }
 0x2bd   : > { %2172 = vst [vmem:[%s7192_s23] sm:$0xff] %v5232_v39  ;;  %v2204_v43 = vadd.f32 %v2188_v40, %v1998_v32  ;;  %v5233_v44 = vpack.c.bf16 %v2004_v41, %v2002_v37  ;;  %v2189_v47 = vmul.f32 %v5315_v36, %v2004_v41  ;;  %v5327_v40 = vunpack.c.h.bf16 %v5346_v24 }
 0x2bf   : > { %2173 = vst [vmem:[%s7192_s23 + $0x8] sm:$0xff] %v5233_v44  ;;  %v2205_v51 = vadd.f32 %v2189_v47, %v2002_v37  ;;  %v2007_v52 = vpop.f32.mrb[4].mxu1  ;;  %v5797_v37 = vld [vmem:[%s8159_s8 + $0xe0] ss:$28 sps:$4 sm:$0xff]  }
 0x2c0   : > { %v2008_v54 = vadd.f32 %v2007_v52, %v7180_v27  ;;  %v2009_v55 = vpop.f32.mrb[5].mxu1 }
 0x2c1   : > { %v2220_v57 = vpack.c.bf16 %v2205_v51, %v2204_v43  ;;  %v2010_v58 = vadd.f32 %v2009_v55, %v7184_v29  ;;  %v2011_v59 = vpop.f32.mrb[6].mxu1 }
 0x2c2   : > { %v2012_v50 = vadd.f32 %v2011_v59, %v7180_v27  ;;  %v2013_v61 = vpop.f32.mrb[7].mxu1 }
 0x2c3   : > { %v5234_v62 = vpack.c.bf16 %v2010_v58, %v2008_v54  ;;  %v2190_v63 = vmul.f32 %v5318_v53, %v2010_v58  ;;  %v2014_v0 = vadd.f32 %v2013_v61, %v7184_v29  ;;  %2369 = vmatmul.mubr.bf16.vlgmr.msra.gmra.mrb[32].mxu1 %v2220_v57  ;;  %v5347_v53 = vld [vmem:[%s7177_s20 + $0x20] sm:$0xff]   ;;  %v5811_v58 = vld [vmem:[%s8159_s8 + $0x154] ss:$28 sps:$4 sm:$0xff]  }
 0x2c4   : > { %2378 = vmatprep.mubr.bf16.mxu1 %v6390_v13  ;;  %3239 = vmatpush1.bf16.msra.mxu1 %v5773_v56  ;;  %v5331_v1 = vunpack.c.h.bf16 %v5347_v53 }
 0x2c5   : > { %2174 = vst [vmem:[%s7192_s23 + $0x10] sm:$0xff] %v5234_v62  ;;  %v2206_v3 = vadd.f32 %v2190_v63, %v2008_v54  ;;  %v5235_v4 = vpack.c.bf16 %v2014_v0, %v2012_v50  ;;  %v2191_v5 = vmul.f32 %v5319_v60, %v2014_v0  ;;  %3240 = vmatprep.subr.bf16.mxu1 %v5781_v49  ;;  %v5803_v54 = vld [vmem:[%s8159_s8 + $0x118] ss:$28 sps:$4 sm:$0xff]   ;;  %v5330_v49 = vunpack.c.l.bf16 %v5347_v53  ;;  %v5809_v62 = vld [vmem:[%s8159_s8 + $0x150] ss:$28 sps:$4 sm:$0xff]  }
 0x2c7   : > { %2175 = vst [vmem:[%s7192_s23 + $0x18] sm:$0xff] %v5235_v4  ;;  %v2207_v7 = vadd.f32 %v2191_v5, %v2012_v50  ;;  %v2017_v8 = vpop.f32.mrb[8].mxu1 }
 0x2c8   : > { %v2018_v10 = vadd.f32 %v2017_v8, %v7180_v27  ;;  %v2019_v11 = vpop.f32.mrb[9].mxu1  ;;  %3241 = vmatpush1.bf16.msra.mxu1 %v5779_v2 }
 0x2c9   : > { %v2020_v14 = vadd.f32 %v2019_v11, %v7184_v29  ;;  %v2021_v15 = vpop.f32.mrb[10].mxu1  ;;  %v2221_v17 = vpack.c.bf16 %v2207_v7, %v2206_v3  ;;  %3242 = vmatprep.subr.bf16.mxu1 %v5787_v6  ;;  %v5817_v3 = vld [vmem:[%s8159_s8 + $0x18c] ss:$28 sps:$4 sm:$0xff]  }
 0x2ca   : > { %v2022_v19 = vadd.f32 %v2021_v15, %v7180_v27  ;;  %v2023_v20 = vpop.f32.mrb[11].mxu1  ;;  %v5823_v15 = vld [vmem:[%s8159_s8 + $0x1c4] ss:$28 sps:$4 sm:$0xff]  }
 0x2cb   : > { %v5236_v21 = vpack.c.bf16 %v2020_v14, %v2018_v10  ;;  %v2192_v22 = vmul.f32 %v5322_v9, %v2020_v14  ;;  %v2024_v23 = vadd.f32 %v2023_v20, %v7184_v29  ;;  %2379 = vmatmul.mubr.bf16.gmra.mrb[36].mxu1 %v2221_v17  ;;  %v5348_v9 = vld [vmem:[%s7177_s20 + $0x28] sm:$0xff]  }
 0x2cc   : > { %2388 = vmatprep.mubr.bf16.mxu1 %v6390_v13  ;;  %3243 = vmatpush1.bf16.msra.mxu1 %v5785_v12  ;;  %v5335_v24 = vunpack.c.h.bf16 %v5348_v9 }
 0x2cd   : > { %2176 = vst [vmem:[%s7192_s23 + $0x20] sm:$0xff] %v5236_v21  ;;  %v2208_v26 = vadd.f32 %v2192_v22, %v2018_v10  ;;  %v5237_v28 = vpack.c.bf16 %v2024_v23, %v2022_v19  ;;  %v2193_v30 = vmul.f32 %v5323_v16, %v2024_v23  ;;  %3244 = vmatprep.subr.bf16.mxu1 %v5793_v18  ;;  %v5815_v10 = vld [vmem:[%s8159_s8 + $0x188] ss:$28 sps:$4 sm:$0xff]   ;;  %v5334_v18 = vunpack.c.l.bf16 %v5348_v9  ;;  %v5821_v21 = vld [vmem:[%s8159_s8 + $0x1c0] ss:$28 sps:$4 sm:$0xff]  }
 0x2cf   : > { %2177 = vst [vmem:[%s7192_s23 + $0x28] sm:$0xff] %v5237_v28  ;;  %v2209_v32 = vadd.f32 %v2193_v30, %v2022_v19  ;;  %v2027_v33 = vpop.f32.mrb[12].mxu1 }
 0x2d0   : > { %v2028_v35 = vadd.f32 %v2027_v33, %v7180_v27  ;;  %v2029_v36 = vpop.f32.mrb[13].mxu1  ;;  %3245 = vmatpush1.bf16.msra.mxu1 %v5791_v25 }
 0x2d1   : > { %v2030_v38 = vadd.f32 %v2029_v36, %v7184_v29  ;;  %v2031_v39 = vpop.f32.mrb[14].mxu1  ;;  %v2222_v41 = vpack.c.bf16 %v2209_v32, %v2208_v26  ;;  %3246 = vmatprep.subr.bf16.mxu1 %v5799_v31  ;;  %v5829_v26 = vld [vmem:[%s8159_s8 + $0x1fc] ss:$28 sps:$4 sm:$0xff]  }
 0x2d2   : > { %v2032_v43 = vadd.f32 %v2031_v39, %v7180_v27  ;;  %v2033_v44 = vpop.f32.mrb[15].mxu1  ;;  %v5835_v39 = vld [vmem:[%s8159_s8 + $0x234] ss:$28 sps:$4 sm:$0xff]  }
 0x2d3   : > { %v5238_v47 = vpack.c.bf16 %v2030_v38, %v2028_v35  ;;  %v2194_v51 = vmul.f32 %v5326_v34, %v2030_v38  ;;  %v2034_v52 = vadd.f32 %v2033_v44, %v7184_v29  ;;  %2389 = vmatmul.mubr.bf16.gmra.mrb[40].mxu1 %v2222_v41  ;;  %v5349_v34 = vld [vmem:[%s7177_s20 + $0x30] sm:$0xff]  }
 0x2d4   : > { %2398 = vmatprep.mubr.bf16.mxu1 %v6390_v13  ;;  %3247 = vmatpush1.bf16.msra.mxu1 %v5797_v37  ;;  %v5339_v53 = vunpack.c.h.bf16 %v5349_v34 }
 0x2d5   : > { %2178 = vst [vmem:[%s7192_s23 + $0x30] sm:$0xff] %v5238_v47  ;;  %v2210_v55 = vadd.f32 %v2194_v51, %v2028_v35  ;;  %v5239_v56 = vpack.c.bf16 %v2034_v52, %v2032_v43  ;;  %v2195_v57 = vmul.f32 %v5327_v40, %v2034_v52  ;;  %3248 = vmatprep.subr.bf16.mxu1 %v5805_v42  ;;  %v5827_v35 = vld [vmem:[%s8159_s8 + $0x1f8] ss:$28 sps:$4 sm:$0xff]   ;;  %v5338_v42 = vunpack.c.l.bf16 %v5349_v34  ;;  %v5833_v47 = vld [vmem:[%s8159_s8 + $0x230] ss:$28 sps:$4 sm:$0xff]  }
 0x2d7   : > { %2179 = vst [vmem:[%s7192_s23 + $0x38] sm:$0xff] %v5239_v56  ;;  %v2211_v59 = vadd.f32 %v2195_v57, %v2032_v43  ;;  %v2037_v60 = vpop.f32.mrb[16].mxu1 }
 0x2d8   : > { %v2038_v50 = vadd.f32 %v2037_v60, %v7180_v27  ;;  %v2039_v61 = vpop.f32.mrb[17].mxu1  ;;  %3249 = vmatpush1.bf16.msra.mxu1 %v5803_v54 }
 0x2d9   : > { %v2040_v63 = vadd.f32 %v2039_v61, %v7184_v29  ;;  %v2041_v0 = vpop.f32.mrb[18].mxu1  ;;  %v2223_v2 = vpack.c.bf16 %v2211_v59, %v2210_v55  ;;  %3250 = vmatprep.subr.bf16.mxu1 %v5811_v58  ;;  %v5841_v55 = vld [vmem:[%s8159_s8 + $0x26c] ss:$28 sps:$4 sm:$0xff]  }
 0x2da   : > { %v2042_v4 = vadd.f32 %v2041_v0, %v7180_v27  ;;  %v2043_v5 = vpop.f32.mrb[19].mxu1  ;;  %v5847_v0 = vld [vmem:[%s8159_s8 + $0x2a4] ss:$28 sps:$4 sm:$0xff]  }
 0x2db   : > { %v5240_v6 = vpack.c.bf16 %v2040_v63, %v2038_v50  ;;  %v2196_v7 = vmul.f32 %v5330_v49, %v2040_v63  ;;  %v2044_v8 = vadd.f32 %v2043_v5, %v7184_v29  ;;  %2399 = vmatmul.mubr.bf16.gmra.mrb[44].mxu1 %v2223_v2  ;;  %v5350_v49 = vld [vmem:[%s7177_s20 + $0x38] sm:$0xff]  }
 0x2dc   : > { %2408 = vmatprep.mubr.bf16.mxu1 %v6390_v13  ;;  %3251 = vmatpush1.bf16.msra.mxu1 %v5809_v62  ;;  %v5343_v9 = vunpack.c.h.bf16 %v5350_v49 }
 0x2dd   : > { %2180 = vst [vmem:[%s7192_s23 + $0x40] sm:$0xff] %v5240_v6  ;;  %v2212_v11 = vadd.f32 %v2196_v7, %v2038_v50  ;;  %v5241_v12 = vpack.c.bf16 %v2044_v8, %v2042_v4  ;;  %v2197_v14 = vmul.f32 %v5331_v1, %v2044_v8  ;;  %3252 = vmatprep.subr.bf16.mxu1 %v5817_v3  ;;  %v5839_v50 = vld [vmem:[%s8159_s8 + $0x268] ss:$28 sps:$4 sm:$0xff]   ;;  %v5342_v3 = vunpack.c.l.bf16 %v5350_v49  ;;  %v5845_v6 = vld [vmem:[%s8159_s8 + $0x2a0] ss:$28 sps:$4 sm:$0xff]  }
 0x2df   : > { %2181 = vst [vmem:[%s7192_s23 + $0x48] sm:$0xff] %v5241_v12  ;;  %v2213_v16 = vadd.f32 %v2197_v14, %v2042_v4  ;;  %v2047_v17 = vpop.f32.mrb[20].mxu1 }
 0x2e0   : > { %v2048_v19 = vadd.f32 %v2047_v17, %v7180_v27  ;;  %v2049_v20 = vpop.f32.mrb[21].mxu1  ;;  %3253 = vmatpush1.bf16.msra.mxu1 %v5815_v10 }
 0x2e1   : > { %v2050_v22 = vadd.f32 %v2049_v20, %v7184_v29  ;;  %v2051_v23 = vpop.f32.mrb[22].mxu1  ;;  %v2224_v25 = vpack.c.bf16 %v2213_v16, %v2212_v11  ;;  %3254 = vmatprep.subr.bf16.mxu1 %v5823_v15  ;;  %v5853_v11 = vld [vmem:[%s8159_s8 + $0x2dc] ss:$28 sps:$4 sm:$0xff]  }
 0x2e2   : > { %v2052_v28 = vadd.f32 %v2051_v23, %v7180_v27  ;;  %v2053_v30 = vpop.f32.mrb[23].mxu1  ;;  %v5857_v23 = vld [vmem:[%s8159_s8 + $0x310] ss:$28 sps:$4 sm:$0xff]  }
 0x2e3   : > { %v5242_v31 = vpack.c.bf16 %v2050_v22, %v2048_v19  ;;  %v2198_v32 = vmul.f32 %v5334_v18, %v2050_v22  ;;  %v2054_v33 = vadd.f32 %v2053_v30, %v7184_v29  ;;  %2409 = vmatmul.mubr.bf16.gmra.mrb[48].mxu1 %v2224_v25  ;;  %v5851_v18 = vld [vmem:[%s8159_s8 + $0x2d8] ss:$28 sps:$4 sm:$0xff]   ;;  %v5865_v25 = vld [vmem:[%s8159_s8 + $0x34c] ss:$28 sps:$4 sm:$0xff]  }
 0x2e4   : > { %2418 = vmatprep.mubr.bf16.mxu1 %v6390_v13  ;;  %3255 = vmatpush1.bf16.msra.mxu1 %v5821_v21  ;;  %v5866_v30 = vld [vmem:[%s8159_s8 + $0x358] ss:$28 sps:$4 sm:$0xff]  }
 0x2e5   : > { %2182 = vst [vmem:[%s7192_s23 + $0x50] sm:$0xff] %v5242_v31  ;;  %v2214_v36 = vadd.f32 %v2198_v32, %v2048_v19  ;;  %v5243_v37 = vpack.c.bf16 %v2054_v33, %v2052_v28  ;;  %v2199_v38 = vmul.f32 %v5335_v24, %v2054_v33  ;;  %3256 = vmatprep.subr.bf16.mxu1 %v5829_v26  ;;  %v5860_v24 = vld [vmem:[%s8159_s8 + $0x320] ss:$28 sps:$4 sm:$0xff]   ;;  %v5871_v31 = vld [vmem:[%s8159_s8 + $0xc] ss:$28 sps:$4 sm:$0xff]  }
 0x2e6   : > { %v5868_v26 = vld [vmem:[%s8159_s8 + $0x35c] ss:$28 sps:$4 sm:$0xff]   ;;  %v2244_v32 = vld [vmem:[%s8158_s7] sm:$0x3] }
 0x2e7   : > { %2183 = vst [vmem:[%s7192_s23 + $0x58] sm:$0xff] %v5243_v37  ;;  %v2215_v40 = vadd.f32 %v2199_v38, %v2052_v28  ;;  %v2057_v41 = vpop.f32.mrb[24].mxu1  ;;  %v5863_v28 = vld [vmem:[%s8159_s8 + $0x348] ss:$28 sps:$4 sm:$0xff]   ;;  %v7366_v33 = vrot.slane %v2244_v32, %v6991_v46  ;;  %v7369_v34 = vrot.slane %v2244_v32, %v6997_v48 }
 0x2e8   : > { %v2058_v43 = vadd.f32 %v2057_v41, %v7180_v27  ;;  %v2059_v44 = vpop.f32.mrb[25].mxu1  ;;  %3257 = vmatpush1.bf16.msra.mxu1 %v5827_v35 }
 0x2e9   : > { %v2060_v51 = vadd.f32 %v2059_v44, %v7184_v29  ;;  %v2061_v52 = vpop.f32.mrb[26].mxu1  ;;  %v2225_v54 = vpack.c.bf16 %v2215_v40, %v2214_v36  ;;  %3258 = vmatprep.subr.bf16.mxu1 %v5835_v39 }
 0x2ea   : > { %v2062_v56 = vadd.f32 %v2061_v52, %v7180_v27  ;;  %v2063_v57 = vpop.f32.mrb[27].mxu1 }
 0x2eb   : > { %v5244_v58 = vpack.c.bf16 %v2060_v51, %v2058_v43  ;;  %v2200_v59 = vmul.f32 %v5338_v42, %v2060_v51  ;;  %v2064_v60 = vadd.f32 %v2063_v57, %v7184_v29  ;;  %2419 = vmatmul.mubr.bf16.gmra.mrb[52].mxu1 %v2225_v54 }
 0x2ec   : > { %2428 = vmatprep.mubr.bf16.mxu1 %v6390_v13  ;;  %3259 = vmatpush1.bf16.msra.mxu1 %v5833_v47 }
 0x2ed   : > { %2184 = vst [vmem:[%s7192_s23 + $0x60] sm:$0xff] %v5244_v58  ;;  %v2216_v61 = vadd.f32 %v2200_v59, %v2058_v43  ;;  %v5245_v62 = vpack.c.bf16 %v2064_v60, %v2062_v56  ;;  %v2201_v63 = vmul.f32 %v5339_v53, %v2064_v60  ;;  %3260 = vmatprep.subr.bf16.mxu1 %v5841_v55  ;;  %v5869_v55 = vld [vmem:[%s8159_s8 + $0x8] ss:$28 sps:$4 sm:$0xff]  }
 0x2ee   : > { %v5874_v58 = vld [vmem:[%s8159_s8 + $0x44] ss:$28 sps:$4 sm:$0xff]  }
 0x2ef   : > { %2185 = vst [vmem:[%s7192_s23 + $0x68] sm:$0xff] %v5245_v62  ;;  %v2217_v1 = vadd.f32 %v2201_v63, %v2062_v56  ;;  %v2067_v2 = vpop.f32.mrb[28].mxu1  ;;  %v5872_v62 = vld [vmem:[%s8159_s8 + $0x40] ss:$28 sps:$4 sm:$0xff]  }
 0x2f0   : > { %v2068_v4 = vadd.f32 %v2067_v2, %v7180_v27  ;;  %v2069_v5 = vpop.f32.mrb[29].mxu1  ;;  %3261 = vmatpush1.bf16.msra.mxu1 %v5839_v50 }
 0x2f1   : > { %v2070_v7 = vadd.f32 %v2069_v5, %v7184_v29  ;;  %v2071_v8 = vpop.f32.mrb[30].mxu1  ;;  %v2226_v10 = vpack.c.bf16 %v2217_v1, %v2216_v61  ;;  %3262 = vmatprep.subr.bf16.mxu1 %v5847_v0  ;;  %v5877_v1 = vld [vmem:[%s8159_s8 + $0x7c] ss:$28 sps:$4 sm:$0xff]  }
 0x2f2   : > { %v2072_v12 = vadd.f32 %v2071_v8, %v7180_v27  ;;  %v2073_v14 = vpop.f32.mrb[31].mxu1 }
 0x2f3   : > { %v5246_v15 = vpack.c.bf16 %v2070_v7, %v2068_v4  ;;  %v2202_v16 = vmul.f32 %v5342_v3, %v2070_v7  ;;  %v2074_v17 = vadd.f32 %v2073_v14, %v7184_v29  ;;  %2429 = vmatmul.mubr.bf16.gmra.mrb[56].mxu1 %v2226_v10  ;;  %v5859_v29 = vld [vmem:[%s8159_s8 + $0x314] ss:$28 sps:$4 sm:$0xff]  }
 0x2f4   : > { %2438 = vmatprep.mubr.bf16.mxu1 %v6390_v13  ;;  %3263 = vmatpush1.bf16.msra.mxu1 %v5845_v6  ;;  %v5862_v13 = vld [vmem:[%s8159_s8 + $0x324] ss:$28 sps:$4 sm:$0xff]   ;;  %v5875_v7 = vld [vmem:[%s8159_s8 + $0x78] ss:$28 sps:$4 sm:$0xff]  }
 0x2f5   : > { %2186 = vst [vmem:[%s7192_s23 + $0x70] sm:$0xff] %v5246_v15  ;;  %v2218_v19 = vadd.f32 %v2202_v16, %v2068_v4  ;;  %v5247_v20 = vpack.c.bf16 %v2074_v17, %v2072_v12  ;;  %v2203_v21 = vmul.f32 %v5343_v9, %v2074_v17  ;;  %3264 = vmatprep.subr.bf16.mxu1 %v5853_v11  ;;  %v5880_v10 = vld [vmem:[%s8159_s8 + $0xb4] ss:$28 sps:$4 sm:$0xff]  }
 0x2f6   : > { %3492 = vmatprep.subr.bf16.mxu0 %v5862_v13  ;;  %v5878_v17 = vld [vmem:[%s8159_s8 + $0xb0] ss:$28 sps:$4 sm:$0xff]  }
 0x2f7   : > { %2187 = vst [vmem:[%s7192_s23 + $0x78] sm:$0xff] %v5247_v20  ;;  %v2219_v27 = vadd.f32 %v2203_v21, %v2072_v12  ;;  %3493 = vmatpush1.bf16.msra.mxu0 %v5860_v24  ;;  %v5883_v20 = vld [vmem:[%s8159_s8 + $0xec] ss:$28 sps:$4 sm:$0xff]  }
 0x2f8   : > { %3265 = vmatpush1.bf16.msra.mxu1 %v5851_v18  ;;  %3494 = vmatprep.subr.bf16.mxu0 %v5868_v26  ;;  %v5886_v26 = vld [vmem:[%s8159_s8 + $0x124] ss:$28 sps:$4 sm:$0xff]  }
 0x2f9   : > { %v2227_v22 = vpack.c.bf16 %v2219_v27, %v2218_v19  ;;  %3266 = vmatprep.subr.bf16.mxu1 %v5859_v29 }
 0x2fb   : > { %2439 = vmatmul.mubr.bf16.gmra.mrb[60].mxu1 %v2227_v22  ;;  %3495 = vmatpush1.bf16.msra.mxu0 %v5866_v30 }
 0x2fc   : > { %3267 = vmatpush1.bf16.msra.mxu1 %v5857_v23  ;;  %v5881_v23 = vld [vmem:[%s8159_s8 + $0xe8] ss:$28 sps:$4 sm:$0xff]  }
 0x2fd   : > { %3268 = vmatprep.subr.bf16.mxu1 %v5865_v25 }
 0x300   : > { %3269 = vmatpush1.bf16.msra.mxu1 %v5863_v28 }
 0x301   : > { %3351 = vmatprep.subr.bf16.mxu1 %v5871_v31 }
 0x396   : > { %v2370_v35 = vpop.f32.mrb[32].mxu1 }
 0x397   : > { %v2371_v36 = vadd.f32 %v2370_v35, %v7366_v33  ;;  %v2372_v37 = vpop.f32.mrb[33].mxu1 }
 0x398   : > { %v2373_v38 = vadd.f32 %v2372_v37, %v7369_v34  ;;  %v2374_v39 = vpop.f32.mrb[34].mxu1 }
 0x399   : > { %v2375_v40 = vadd.f32 %v2374_v39, %v7366_v33  ;;  %v2376_v41 = vpop.f32.mrb[35].mxu1  ;;  %v2449_v43 = vmax.f32 %v2371_v36, 0.0  ;;  %v5884_v36 = vld [vmem:[%s8159_s8 + $0x120] ss:$28 sps:$4 sm:$0xff]  }
 0x39a   : > { %v2377_v42 = vadd.f32 %v2376_v41, %v7369_v34  ;;  %v2450_v47 = vmax.f32 %v2373_v38, 0.0  ;;  %v5889_v39 = vld [vmem:[%s8159_s8 + $0x15c] ss:$28 sps:$4 sm:$0xff]  }
 0x39b   : > { %v2451_v44 = vmax.f32 %v2375_v40, 0.0 }
 0x39c   : > { %v2452_v51 = vmax.f32 %v2377_v42, 0.0 }
 0x39d   : > { %v7375_v52 = vpack.c.bf16 %v2451_v44, %v2449_v43 }
 0x39e   : > { %v7377_v53 = vpack.c.bf16 %v2452_v51, %v2450_v47  ;;  %v2380_v54 = vpop.f32.mrb[36].mxu1  ;;  %v5887_v47 = vld [vmem:[%s8159_s8 + $0x158] ss:$28 sps:$4 sm:$0xff]  }
 0x39f   : > { %v2381_v56 = vadd.f32 %v2380_v54, %v7366_v33  ;;  %v2382_v57 = vpop.f32.mrb[37].mxu1 }
 0x3a0   : > { %v2383_v59 = vadd.f32 %v2382_v57, %v7369_v34  ;;  %v2384_v60 = vpop.f32.mrb[38].mxu1  ;;  %3270 = vmatprep.mubr.bf16.mxu1 %v7377_v53  ;;  %3496 = vmatprep.mubr.bf16.mxu0 %v7377_v53 }
 0x3a1   : > { %v2385_v49 = vadd.f32 %v2384_v60, %v7366_v33  ;;  %v2386_v50 = vpop.f32.mrb[39].mxu1  ;;  %3271 = vmatmul.mubr.bf16.vlgmr.msra.gmra.mrb[64].mxu1 %v7375_v52  ;;  %3497 = vmatmul.mubr.bf16.vlgmr.msra.gmra.mrb[32].mxu0 %v7375_v52  ;;  %v2453_v63 = vmax.f32 %v2381_v56, 0.0 }
 0x3a2   : > { %v2387_v61 = vadd.f32 %v2386_v50, %v7369_v34  ;;  %3352 = vmatpush1.bf16.msra.mxu1 %v5869_v55  ;;  %v2454_v2 = vmax.f32 %v2383_v59, 0.0  ;;  %v5892_v55 = vld [vmem:[%s8159_s8 + $0x194] ss:$28 sps:$4 sm:$0xff]  }
 0x3a3   : > { %v2455_v0 = vmax.f32 %v2385_v49, 0.0  ;;  %3353 = vmatprep.subr.bf16.mxu1 %v5874_v58  ;;  %v5890_v49 = vld [vmem:[%s8159_s8 + $0x190] ss:$28 sps:$4 sm:$0xff]  }
 0x3a4   : > { %v2456_v3 = vmax.f32 %v2387_v61, 0.0 }
 0x3a5   : > { %v7399_v4 = vpack.c.bf16 %v2455_v0, %v2453_v63 }
 0x3a6   : > { %v7401_v5 = vpack.c.bf16 %v2456_v3, %v2454_v2  ;;  %v2390_v6 = vpop.f32.mrb[40].mxu1  ;;  %3354 = vmatpush1.bf16.msra.mxu1 %v5872_v62  ;;  %v5895_v62 = vld [vmem:[%s8159_s8 + $0x1cc] ss:$28 sps:$4 sm:$0xff]  }
 0x3a7   : > { %v2391_v8 = vadd.f32 %v2390_v6, %v7366_v33  ;;  %v2392_v9 = vpop.f32.mrb[41].mxu1  ;;  %3355 = vmatprep.subr.bf16.mxu1 %v5877_v1  ;;  %v5893_v6 = vld [vmem:[%s8159_s8 + $0x1c8] ss:$28 sps:$4 sm:$0xff]  }
 0x3a8   : > { %v2393_v11 = vadd.f32 %v2392_v9, %v7369_v34  ;;  %v2394_v12 = vpop.f32.mrb[42].mxu1  ;;  %3280 = vmatprep.mubr.bf16.mxu1 %v7401_v5  ;;  %3506 = vmatprep.mubr.bf16.mxu0 %v7401_v5  ;;  %v5898_v9 = vld [vmem:[%s8159_s8 + $0x204] ss:$28 sps:$4 sm:$0xff]  }
 0x3a9   : > { %v2395_v14 = vadd.f32 %v2394_v12, %v7366_v33  ;;  %v2396_v15 = vpop.f32.mrb[43].mxu1  ;;  %3281 = vmatmul.mubr.bf16.gmra.mrb[68].mxu1 %v7399_v4  ;;  %3507 = vmatmul.mubr.bf16.gmra.mrb[36].mxu0 %v7399_v4  ;;  %v2457_v18 = vmax.f32 %v2391_v8, 0.0 }
 0x3aa   : > { %v2397_v16 = vadd.f32 %v2396_v15, %v7369_v34  ;;  %3356 = vmatpush1.bf16.msra.mxu1 %v5875_v7  ;;  %v2458_v21 = vmax.f32 %v2393_v11, 0.0 }
 0x3ab   : > { %v2459_v19 = vmax.f32 %v2395_v14, 0.0  ;;  %3357 = vmatprep.subr.bf16.mxu1 %v5880_v10 }
 0x3ac   : > { %v2460_v27 = vmax.f32 %v2397_v16, 0.0  ;;  %v5896_v16 = vld [vmem:[%s8159_s8 + $0x200] ss:$28 sps:$4 sm:$0xff]  }
 0x3ad   : > { %v7423_v22 = vpack.c.bf16 %v2459_v19, %v2457_v18  ;;  %v5901_v19 = vld [vmem:[%s8159_s8 + $0x23c] ss:$28 sps:$4 sm:$0xff]  }
 0x3ae   : > { %v7425_v29 = vpack.c.bf16 %v2460_v27, %v2458_v21  ;;  %v2400_v13 = vpop.f32.mrb[44].mxu1  ;;  %3358 = vmatpush1.bf16.msra.mxu1 %v5878_v17 }
 0x3af   : > { %v2401_v24 = vadd.f32 %v2400_v13, %v7366_v33  ;;  %v2402_v25 = vpop.f32.mrb[45].mxu1  ;;  %3359 = vmatprep.subr.bf16.mxu1 %v5883_v20 }
 0x3b0   : > { %v2403_v28 = vadd.f32 %v2402_v25, %v7369_v34  ;;  %v2404_v30 = vpop.f32.mrb[46].mxu1  ;;  %3290 = vmatprep.mubr.bf16.mxu1 %v7425_v29  ;;  %3516 = vmatprep.mubr.bf16.mxu0 %v7425_v29 }
 0x3b1   : > { %v2405_v31 = vadd.f32 %v2404_v30, %v7366_v33  ;;  %v2406_v32 = vpop.f32.mrb[47].mxu1  ;;  %3291 = vmatmul.mubr.bf16.gmra.mrb[72].mxu1 %v7423_v22  ;;  %3517 = vmatmul.mubr.bf16.gmra.mrb[40].mxu0 %v7423_v22  ;;  %v2461_v37 = vmax.f32 %v2401_v24, 0.0  ;;  %v5899_v24 = vld [vmem:[%s8159_s8 + $0x238] ss:$28 sps:$4 sm:$0xff]  }
 0x3b2   : > { %v2407_v35 = vadd.f32 %v2406_v32, %v7369_v34  ;;  %3360 = vmatpush1.bf16.msra.mxu1 %v5881_v23  ;;  %v2462_v40 = vmax.f32 %v2403_v28, 0.0  ;;  %v5904_v28 = vld [vmem:[%s8159_s8 + $0x274] ss:$28 sps:$4 sm:$0xff]  }
 0x3b3   : > { %v2463_v38 = vmax.f32 %v2405_v31, 0.0  ;;  %3361 = vmatprep.subr.bf16.mxu1 %v5886_v26 }
 0x3b4   : > { %v2464_v41 = vmax.f32 %v2407_v35, 0.0 }
 0x3b5   : > { %v7447_v42 = vpack.c.bf16 %v2463_v38, %v2461_v37  ;;  %v5902_v37 = vld [vmem:[%s8159_s8 + $0x270] ss:$28 sps:$4 sm:$0xff]  }
 0x3b6   : > { %v7449_v43 = vpack.c.bf16 %v2464_v41, %v2462_v40  ;;  %v2410_v44 = vpop.f32.mrb[48].mxu1  ;;  %3362 = vmatpush1.bf16.msra.mxu1 %v5884_v36  ;;  %v5907_v40 = vld [vmem:[%s8159_s8 + $0x2ac] ss:$28 sps:$4 sm:$0xff]  }
 0x3b7   : > { %v2411_v51 = vadd.f32 %v2410_v44, %v7366_v33  ;;  %v2412_v54 = vpop.f32.mrb[49].mxu1  ;;  %3363 = vmatprep.subr.bf16.mxu1 %v5889_v39 }
 0x3b8   : > { %v2413_v56 = vadd.f32 %v2412_v54, %v7369_v34  ;;  %v2414_v57 = vpop.f32.mrb[50].mxu1  ;;  %3300 = vmatprep.mubr.bf16.mxu1 %v7449_v43  ;;  %3526 = vmatprep.mubr.bf16.mxu0 %v7449_v43 }
 0x3b9   : > { %v2415_v58 = vadd.f32 %v2414_v57, %v7366_v33  ;;  %v2416_v59 = vpop.f32.mrb[51].mxu1  ;;  %3301 = vmatmul.mubr.bf16.gmra.mrb[76].mxu1 %v7447_v42  ;;  %3527 = vmatmul.mubr.bf16.gmra.mrb[44].mxu0 %v7447_v42  ;;  %v2465_v50 = vmax.f32 %v2411_v51, 0.0 }
 0x3ba   : > { %v2417_v60 = vadd.f32 %v2416_v59, %v7369_v34  ;;  %3364 = vmatpush1.bf16.msra.mxu1 %v5887_v47  ;;  %v2466_v63 = vmax.f32 %v2413_v56, 0.0 }
 0x3bb   : > { %v2467_v61 = vmax.f32 %v2415_v58, 0.0  ;;  %3365 = vmatprep.subr.bf16.mxu1 %v5892_v55  ;;  %v5905_v55 = vld [vmem:[%s8159_s8 + $0x2a8] ss:$28 sps:$4 sm:$0xff]  }
 0x3bc   : > { %v2468_v0 = vmax.f32 %v2417_v60, 0.0  ;;  %v5910_v58 = vld [vmem:[%s8159_s8 + $0x2e4] ss:$28 sps:$4 sm:$0xff]  }
 0x3bd   : > { %v7471_v1 = vpack.c.bf16 %v2467_v61, %v2465_v50 }
 0x3be   : > { %v7473_v2 = vpack.c.bf16 %v2468_v0, %v2466_v63  ;;  %v2420_v3 = vpop.f32.mrb[52].mxu1  ;;  %3366 = vmatpush1.bf16.msra.mxu1 %v5890_v49 }
 0x3bf   : > { %v2421_v7 = vadd.f32 %v2420_v3, %v7366_v33  ;;  %v2422_v8 = vpop.f32.mrb[53].mxu1  ;;  %3367 = vmatprep.subr.bf16.mxu1 %v5895_v62  ;;  %v5908_v62 = vld [vmem:[%s8159_s8 + $0x2e0] ss:$28 sps:$4 sm:$0xff]  }
 0x3c0   : > { %v2423_v10 = vadd.f32 %v2422_v8, %v7369_v34  ;;  %v2424_v11 = vpop.f32.mrb[54].mxu1  ;;  %3310 = vmatprep.mubr.bf16.mxu1 %v7473_v2  ;;  %3536 = vmatprep.mubr.bf16.mxu0 %v7473_v2  ;;  %v5913_v3 = vld [vmem:[%s8159_s8 + $0x31c] ss:$28 sps:$4 sm:$0xff]  }
 0x3c1   : > { %v2425_v12 = vadd.f32 %v2424_v11, %v7366_v33  ;;  %v2426_v14 = vpop.f32.mrb[55].mxu1  ;;  %3311 = vmatmul.mubr.bf16.gmra.mrb[80].mxu1 %v7471_v1  ;;  %3537 = vmatmul.mubr.bf16.gmra.mrb[48].mxu0 %v7471_v1  ;;  %v2469_v17 = vmax.f32 %v2421_v7, 0.0  ;;  %v5917_v11 = vld [vmem:[%s8159_s8 + $0x1d8] ss:$28 sps:$4 sm:$0xff]  }
 0x3c2   : > { %v2427_v15 = vadd.f32 %v2426_v14, %v7369_v34  ;;  %3368 = vmatpush1.bf16.msra.mxu1 %v5893_v6  ;;  %v2470_v20 = vmax.f32 %v2423_v10, 0.0  ;;  %v5914_v10 = vld [vmem:[%s8159_s8 + $0x350] ss:$28 sps:$4 sm:$0xff]  }
 0x3c3   : > { %v2471_v18 = vmax.f32 %v2425_v12, 0.0  ;;  %3369 = vmatprep.subr.bf16.mxu1 %v5898_v9  ;;  %v5916_v9 = vld [vmem:[%s8159_s8 + $0x354] ss:$28 sps:$4 sm:$0xff]  }
 0x3c4   : > { %v2472_v21 = vmax.f32 %v2427_v15, 0.0  ;;  %v5918_v12 = vld [vmem:[%s8159_s8 + $0x18] ss:$28 sps:$4 sm:$0xff]   ;;  %v5919_v14 = vld [vmem:[%s8159_s8 + $0x210] ss:$28 sps:$4 sm:$0xff]  }
 0x3c5   : > { %v7495_v27 = vpack.c.bf16 %v2471_v18, %v2469_v17  ;;  %v5920_v15 = vld [vmem:[%s8159_s8 + $0x50] ss:$28 sps:$4 sm:$0xff]   ;;  %v5922_v17 = vld [vmem:[%s8159_s8 + $0x88] ss:$28 sps:$4 sm:$0xff]   ;;  %v5923_v18 = vld [vmem:[%s8159_s8 + $0x280] ss:$28 sps:$4 sm:$0xff]  }
 0x3c6   : > { %v7497_v13 = vpack.c.bf16 %v2472_v21, %v2470_v20  ;;  %v2430_v23 = vpop.f32.mrb[56].mxu1  ;;  %3370 = vmatpush1.bf16.msra.mxu1 %v5896_v16  ;;  %v5921_v16 = vld [vmem:[%s8159_s8 + $0x248] ss:$28 sps:$4 sm:$0xff]   ;;  %v5925_v20 = vld [vmem:[%s8159_s8 + $0x2b8] ss:$28 sps:$4 sm:$0xff]  }
 0x3c7   : > { %v2431_v25 = vadd.f32 %v2430_v23, %v7366_v33  ;;  %v2432_v26 = vpop.f32.mrb[57].mxu1  ;;  %3371 = vmatprep.subr.bf16.mxu1 %v5901_v19  ;;  %v5924_v19 = vld [vmem:[%s8159_s8 + $0xc0] ss:$28 sps:$4 sm:$0xff]   ;;  %v5926_v21 = vld [vmem:[%s8159_s8 + $0xf8] ss:$28 sps:$4 sm:$0xff]  }
 0x3c8   : > { %v2433_v30 = vadd.f32 %v2432_v26, %v7369_v34  ;;  %v2434_v31 = vpop.f32.mrb[58].mxu1  ;;  %3320 = vmatprep.mubr.bf16.mxu1 %v7497_v13  ;;  %3546 = vmatprep.mubr.bf16.mxu0 %v7497_v13  ;;  %v5927_v23 = vld [vmem:[%s8159_s8 + $0x2f0] ss:$28 sps:$4 sm:$0xff]   ;;  %v5930_v26 = vld [vmem:[%s8159_s8 + $0x168] ss:$28 sps:$4 sm:$0xff]  }
 0x3c9   : > { %v2435_v32 = vadd.f32 %v2434_v31, %v7366_v33  ;;  %v2436_v35 = vpop.f32.mrb[59].mxu1  ;;  %3321 = vmatmul.mubr.bf16.gmra.mrb[84].mxu1 %v7495_v27  ;;  %3547 = vmatmul.mubr.bf16.gmra.mrb[52].mxu0 %v7495_v27  ;;  %v2473_v38 = vmax.f32 %v2431_v25, 0.0  ;;  %v5929_v25 = vld [vmem:[%s8159_s8 + $0x328] ss:$28 sps:$4 sm:$0xff]  }
 0x3ca   : > { %v2437_v36 = vadd.f32 %v2436_v35, %v7369_v34  ;;  %3372 = vmatpush1.bf16.msra.mxu1 %v5899_v24  ;;  %v2474_v41 = vmax.f32 %v2433_v30, 0.0  ;;  %v5928_v24 = vld [vmem:[%s8159_s8 + $0x130] ss:$28 sps:$4 sm:$0xff]   ;;  %v5932_v30 = vld [vmem:[%s8159_s8 + $0x1a0] ss:$28 sps:$4 sm:$0xff]  }
 0x3cb   : > { %v2475_v39 = vmax.f32 %v2435_v32, 0.0  ;;  %3373 = vmatprep.subr.bf16.mxu1 %v5904_v28  ;;  %v5931_v28 = vld [vmem:[%s8159_s8 + $0x360] ss:$28 sps:$4 sm:$0xff]  }
 0x3cc   : > { %v2476_v44 = vmax.f32 %v2437_v36, 0.0 }
 0x3cd   : > { %v7519_v47 = vpack.c.bf16 %v2475_v39, %v2473_v38 }
 0x3ce   : > { %v7521_v51 = vpack.c.bf16 %v2476_v44, %v2474_v41  ;;  %v2440_v54 = vpop.f32.mrb[60].mxu1  ;;  %3374 = vmatpush1.bf16.msra.mxu1 %v5902_v37 }
 0x3cf   : > { %v2441_v56 = vadd.f32 %v2440_v54, %v7366_v33  ;;  %v2442_v57 = vpop.f32.mrb[61].mxu1  ;;  %3375 = vmatprep.subr.bf16.mxu1 %v5907_v40 }
 0x3d0   : > { %v2443_v59 = vadd.f32 %v2442_v57, %v7369_v34  ;;  %v2444_v60 = vpop.f32.mrb[62].mxu1  ;;  %3330 = vmatprep.mubr.bf16.mxu1 %v7521_v51  ;;  %3556 = vmatprep.mubr.bf16.mxu0 %v7521_v51 }
 0x3d1   : > { %v2445_v49 = vadd.f32 %v2444_v60, %v7366_v33  ;;  %v2446_v50 = vpop.f32.mrb[63].mxu1  ;;  %3331 = vmatmul.mubr.bf16.gmra.mrb[88].mxu1 %v7519_v47  ;;  %3557 = vmatmul.mubr.bf16.gmra.mrb[56].mxu0 %v7519_v47  ;;  %v2477_v63 = vmax.f32 %v2441_v56, 0.0 }
 0x3d2   : > { %v2447_v61 = vadd.f32 %v2446_v50, %v7369_v34  ;;  %3376 = vmatpush1.bf16.msra.mxu1 %v5905_v55  ;;  %v2478_v33 = vmax.f32 %v2443_v59, 0.0  ;;  %v5911_v34 = vld [vmem:[%s8159_s8 + $0x318] ss:$28 sps:$4 sm:$0xff]  }
 0x3d3   : > { %v2479_v0 = vmax.f32 %v2445_v49, 0.0  ;;  %3377 = vmatprep.subr.bf16.mxu1 %v5910_v58 }
 0x3d4   : > { %v2480_v6 = vmax.f32 %v2447_v61, 0.0 }
 0x3d5   : > { %v7543_v7 = vpack.c.bf16 %v2479_v0, %v2477_v63 }
 0x3d6   : > { %v7545_v8 = vpack.c.bf16 %v2480_v6, %v2478_v33  ;;  %3378 = vmatpush1.bf16.msra.mxu1 %v5908_v62 }
 0x3d7   : > { %3379 = vmatprep.subr.bf16.mxu1 %v5913_v3 }
 0x3d8   : > { %3340 = vmatprep.mubr.bf16.mxu1 %v7545_v8  ;;  %3566 = vmatprep.mubr.bf16.mxu0 %v7545_v8 }
 0x3d9   : > { %3341 = vmatmul.mubr.bf16.gmra.mrb[92].mxu1 %v7543_v7  ;;  %3567 = vmatmul.mubr.bf16.gmra.mrb[60].mxu0 %v7543_v7 }
 0x3da   : > { %3380 = vmatpush1.bf16.msra.mxu1 %v5911_v34  ;;  %3383 = vmatprep.mubr.bf16.mxu1 %v7377_v53 }
 0x3db   : > { %3381 = vmatprep.subr.bf16.mxu1 %v5916_v9 }
 0x3de   : > { %3382 = vmatpush1.bf16.msra.mxu1 %v5914_v10 }
 0x3df   : > { %5351 = vmatprep.subr.bf16.mxu1 %v5917_v11 }
 0x3e1   : > { %3384 = vmatmul.mubr.bf16.vlgmr.msra.gmra.mrb[96].mxu1 %v7375_v52 }
 0x3e2   : > { %3393 = vmatprep.mubr.bf16.mxu1 %v7401_v5  ;;  %5352 = vmatpush3.bf16.msra.mxu1 %v5918_v12 }
 0x3e3   : > { %5353 = vmatprep.subr.bf16.mxu1 %v5919_v14 }
 0x3e6   : > { %5354 = vmatpush3.bf16.msra.mxu1 %v5920_v15 }
 0x3e7   : > { %5355 = vmatprep.subr.bf16.mxu1 %v5921_v16 }
 0x3e9   : > { %3394 = vmatmul.mubr.bf16.gmra.mrb[100].mxu1 %v7399_v4 }
 0x3ea   : > { %3403 = vmatprep.mubr.bf16.mxu1 %v7425_v29  ;;  %5356 = vmatpush3.bf16.msra.mxu1 %v5922_v17 }
 0x3eb   : > { %5357 = vmatprep.subr.bf16.mxu1 %v5923_v18 }
 0x3ee   : > { %5358 = vmatpush3.bf16.msra.mxu1 %v5924_v19 }
 0x3ef   : > { %5359 = vmatprep.subr.bf16.mxu1 %v5925_v20 }
 0x3f1   : > { %3404 = vmatmul.mubr.bf16.gmra.mrb[104].mxu1 %v7423_v22 }
 0x3f2   : > { %3413 = vmatprep.mubr.bf16.mxu1 %v7449_v43  ;;  %5360 = vmatpush3.bf16.msra.mxu1 %v5926_v21 }
 0x3f3   : > { %5361 = vmatprep.subr.bf16.mxu1 %v5927_v23 }
 0x3f6   : > { %5362 = vmatpush3.bf16.msra.mxu1 %v5928_v24 }
 0x3f7   : > { %5363 = vmatprep.subr.bf16.mxu1 %v5929_v25 }
 0x3f9   : > { %3414 = vmatmul.mubr.bf16.gmra.mrb[108].mxu1 %v7447_v42 }
 0x3fa   : > { %3423 = vmatprep.mubr.bf16.mxu1 %v7473_v2  ;;  %5364 = vmatpush3.bf16.msra.mxu1 %v5930_v26 }
 0x3fb   : > { %5365 = vmatprep.subr.bf16.mxu1 %v5931_v28 }
 0x3fe   : > { %5366 = vmatpush3.bf16.msra.mxu1 %v5932_v30 }
 0x401   : > { %3424 = vmatmul.mubr.bf16.gmra.mrb[112].mxu1 %v7471_v1 }
 0x402   : > { %3433 = vmatprep.mubr.bf16.mxu1 %v7497_v13 }
 0x409   : > { %3434 = vmatmul.mubr.bf16.gmra.mrb[116].mxu1 %v7495_v27 }
 0x40a   : > { %3443 = vmatprep.mubr.bf16.mxu1 %v7521_v51 }
 0x411   : > { %3444 = vmatmul.mubr.bf16.gmra.mrb[120].mxu1 %v7519_v47 }
 0x412   : > { %3453 = vmatprep.mubr.bf16.mxu1 %v7545_v8 }
 0x419   : > { %3454 = vmatmul.mubr.bf16.gmra.mrb[124].mxu1 %v7543_v7 }
 0x41a   : > { %3609 = vmatprep.mubr.bf16.mxu1 %v7377_v53  ;;  %v2625_v53 = vld [vmem:[%s8160_s9] sm:$0x7f] }
 0x421   : > { %3610 = vmatmul.mubr.bf16.vlgmr.msra.gmra.mrb[128].mxu1 %v7375_v52  ;;  %v2645_v52 = vsub.s32 4, %v6988_v45 }
 0x422   : > { %3617 = vmatprep.mubr.bf16.mxu1 %v7401_v5  ;;  %v7646_v5 = vrot.slane %v2625_v53, %v6991_v46 }
 0x429   : > { %3618 = vmatmul.mubr.bf16.gmra.mrb[132].mxu1 %v7399_v4  ;;  %v2649_v4 = vsub.s32 5, %v6988_v45 }
 0x42a   : > { %3625 = vmatprep.mubr.bf16.mxu1 %v7425_v29  ;;  %v7651_v29 = vrot.slane %v2625_v53, %v6997_v48 }
 0x431   : > { %3626 = vmatmul.mubr.bf16.gmra.mrb[136].mxu1 %v7423_v22  ;;  %v7648_v22 = vrot.slane %v2625_v53, %v2645_v52 }
 0x432   : > { %3633 = vmatprep.mubr.bf16.mxu1 %v7449_v43 }
 0x439   : > { %3634 = vmatmul.mubr.bf16.gmra.mrb[140].mxu1 %v7447_v42  ;;  %v7653_v42 = vrot.slane %v2625_v53, %v2649_v4 }
 0x43a   : > { %3641 = vmatprep.mubr.bf16.mxu1 %v7473_v2 }
 0x441   : > { %3642 = vmatmul.mubr.bf16.gmra.mrb[144].mxu1 %v7471_v1 }
 0x442   : > { %3649 = vmatprep.mubr.bf16.mxu1 %v7497_v13 }
 0x449   : > { %3650 = vmatmul.mubr.bf16.gmra.mrb[148].mxu1 %v7495_v27 }
 0x44a   : > { %3657 = vmatprep.mubr.bf16.mxu1 %v7521_v51 }
 0x451   : > { %3658 = vmatmul.mubr.bf16.gmra.mrb[152].mxu1 %v7519_v47 }
 0x452   : > { %3665 = vmatprep.mubr.bf16.mxu1 %v7545_v8 }
 0x459   : > { %3666 = vmatmul.mubr.bf16.gmra.mrb[156].mxu1 %v7543_v7 }
 0x474   : > { %v3272_v43 = vpop.f32.mrb[64].mxu1  ;;  %v3498_v1 = vpop.f32.mrb[32].mxu0 }
 0x475   : > { %v3273_v2 = vadd.f32 %v3272_v43, %v7646_v5  ;;  %v3499_v27 = vadd.f32 %v3498_v1, %v7648_v22  ;;  %v3274_v13 = vpop.f32.mrb[65].mxu1  ;;  %v3500_v31 = vpop.f32.mrb[33].mxu0 }
 0x476   : > { %v3275_v32 = vadd.f32 %v3274_v13, %v7651_v29  ;;  %v3501_v46 = vadd.f32 %v3500_v31, %v7653_v42  ;;  %v3276_v35 = vpop.f32.mrb[66].mxu1  ;;  %v3502_v36 = vpop.f32.mrb[34].mxu0 }
 0x477   : > { %v3674_v37 = vsub.f32 0.0, %v3273_v2  ;;  %v3678_v38 = vsub.f32 0.0, %v3499_v27  ;;  %v3277_v48 = vadd.f32 %v3276_v35, %v7646_v5  ;;  %v3503_v39 = vadd.f32 %v3502_v36, %v7648_v22  ;;  %v3278_v40 = vpop.f32.mrb[67].mxu1  ;;  %v3504_v41 = vpop.f32.mrb[35].mxu0 }
 0x478   : > { %v3675_v44 = vsub.f32 0.0, %v3275_v32  ;;  %v3679_v47 = vsub.f32 0.0, %v3501_v46  ;;  %v3279_v51 = vadd.f32 %v3278_v40, %v7651_v29  ;;  %v3505_v54 = vadd.f32 %v3504_v41, %v7653_v42 }
 0x479   : > { %v3786_v55 = vmul.f32 1.442695, %v3674_v37  ;;  %v3794_v56 = vmul.f32 1.442695, %v3678_v38  ;;  %v3681_v57 = vsub.f32 0.0, %v3277_v48  ;;  %v3685_v58 = vsub.f32 0.0, %v3503_v39 }
 0x47a   : > { %v3788_v59 = vmul.f32 1.442695, %v3675_v44  ;;  %v3796_v60 = vmul.f32 1.442695, %v3679_v47  ;;  %v3682_v49 = vsub.f32 0.0, %v3279_v51  ;;  %v3686_v50 = vsub.f32 0.0, %v3505_v54 }
 0x47b   : > { %5933 = vpow2.f32 %v3786_v55  ;;  %v3800_v61 = vmul.f32 1.442695, %v3681_v57  ;;  %v3808_v62 = vmul.f32 1.442695, %v3685_v58 }
 0x47c   : > { %5935 = vpow2.f32 %v3794_v56  ;;  %v3282_v63 = vpop.f32.mrb[68].mxu1  ;;  %v3508_v0 = vpop.f32.mrb[36].mxu0  ;;  %v3802_v3 = vmul.f32 1.442695, %v3682_v49  ;;  %v3810_v34 = vmul.f32 1.442695, %v3686_v50 }
 0x47d   : > { %5937 = vpow2.f32 %v3788_v59  ;;  %v3283_v33 = vadd.f32 %v3282_v63, %v7646_v5  ;;  %v3509_v6 = vadd.f32 %v3508_v0, %v7648_v22  ;;  %v3284_v7 = vpop.f32.mrb[69].mxu1  ;;  %v3510_v8 = vpop.f32.mrb[37].mxu0 }
 0x47e   : > { %5939 = vpow2.f32 %v3796_v60  ;;  %v3285_v9 = vadd.f32 %v3284_v7, %v7651_v29  ;;  %v3511_v10 = vadd.f32 %v3510_v8, %v7653_v42  ;;  %v3286_v11 = vpop.f32.mrb[70].mxu1  ;;  %v3512_v12 = vpop.f32.mrb[38].mxu0 }
 0x47f   : > { %5941 = vpow2.f32 %v3800_v61  ;;  %v3688_v14 = vsub.f32 0.0, %v3283_v33  ;;  %v3692_v15 = vsub.f32 0.0, %v3509_v6  ;;  %v3287_v16 = vadd.f32 %v3286_v11, %v7646_v5  ;;  %v3288_v17 = vpop.f32.mrb[71].mxu1  ;;  %v3514_v18 = vpop.f32.mrb[39].mxu0 }
 0x480   : > { %5943 = vpow2.f32 %v3808_v62  ;;  %v3689_v19 = vsub.f32 0.0, %v3285_v9  ;;  %v3693_v20 = vsub.f32 0.0, %v3511_v10  ;;  %v3513_v4 = vadd.f32 %v3512_v12, %v7648_v22 }
 0x481   : > { %5945 = vpow2.f32 %v3802_v3  ;;  %v3814_v21 = vmul.f32 1.442695, %v3688_v14  ;;  %v3822_v23 = vmul.f32 1.442695, %v3692_v15  ;;  %v3695_v24 = vsub.f32 0.0, %v3287_v16 }
 0x482   : > { %5947 = vpow2.f32 %v3810_v34  ;;  %v3816_v25 = vmul.f32 1.442695, %v3689_v19  ;;  %v3824_v26 = vmul.f32 1.442695, %v3693_v20  ;;  %v3289_v13 = vadd.f32 %v3288_v17, %v7651_v29 }
 0x483   : > { %5949 = vpow2.f32 %v3814_v21  ;;  %v3828_v28 = vmul.f32 1.442695, %v3695_v24  ;;  %v3699_v41 = vsub.f32 0.0, %v3513_v4  ;;  %v3515_v44 = vadd.f32 %v3514_v18, %v7653_v42 }
 0x484   : > { %5951 = vpow2.f32 %v3822_v23  ;;  %v3292_v30 = vpop.f32.mrb[72].mxu1  ;;  %v3518_v52 = vpop.f32.mrb[40].mxu0  ;;  %v3696_v54 = vsub.f32 0.0, %v3289_v13 }
 0x485   : > { %v5934_v53 = vpop.eup %5933  ;;  %5953 = vpow2.f32 %v3816_v25  ;;  %v3294_v43 = vpop.f32.mrb[73].mxu1  ;;  %v3293_v57 = vadd.f32 %v3292_v30, %v7646_v5  ;;  %v3519_v60 = vadd.f32 %v3518_v52, %v7648_v22  ;;  %v3836_v63 = vmul.f32 1.442695, %v3699_v41 }
 0x486   : > { %v3520_v1 = vpop.f32.mrb[41].mxu0  ;;  %v5936_v2 = vpop.eup %5935  ;;  %v4010_v27 = vadd.f32 1.0, %v5934_v53  ;;  %5955 = vpow2.f32 %v3824_v26  ;;  %v3700_v0 = vsub.f32 0.0, %v3515_v44  ;;  %v3830_v8 = vmul.f32 1.442695, %v3696_v54 }
 0x487   : > { %v3296_v31 = vpop.f32.mrb[74].mxu1  ;;  %v3522_v32 = vpop.f32.mrb[42].mxu0  ;;  %v4014_v35 = vadd.f32 1.0, %v5936_v2  ;;  %5957 = vpow2.f32 %v3828_v28  ;;  %v3295_v34 = vadd.f32 %v3294_v43, %v7651_v29  ;;  %v3702_v14 = vsub.f32 0.0, %v3293_v57 }
 0x488   : > { %v5938_v46 = vpop.eup %5937  ;;  %v3298_v36 = vpop.f32.mrb[75].mxu1  ;;  %5959 = vrcp.f32 %v4010_v27  ;;  %v3521_v15 = vadd.f32 %v3520_v1, %v7653_v42  ;;  %v3706_v20 = vsub.f32 0.0, %v3519_v60  ;;  %v3297_v21 = vadd.f32 %v3296_v31, %v7646_v5 }
 0x489   : > { %v5940_v37 = vpop.eup %5939  ;;  %v4011_v38 = vadd.f32 1.0, %v5938_v46  ;;  %v3524_v48 = vpop.f32.mrb[43].mxu0  ;;  %5961 = vrcp.f32 %v4014_v35  ;;  %v3838_v25 = vmul.f32 1.442695, %v3700_v0  ;;  %v3523_v26 = vadd.f32 %v3522_v32, %v7648_v22 }
 0x48a   : > { %v5942_v39 = vpop.eup %5941  ;;  %v4015_v40 = vadd.f32 1.0, %v5940_v37  ;;  %v3703_v52 = vsub.f32 0.0, %v3295_v34  ;;  %v3299_v53 = vadd.f32 %v3298_v36, %v7651_v29  ;;  %v3842_v43 = vmul.f32 1.442695, %v3702_v14 }
 0x48b   : > { %v5944_v47 = vpop.eup %5943  ;;  %5963 = vrcp.f32 %v4011_v38  ;;  %v4017_v51 = vadd.f32 1.0, %v5942_v39  ;;  %v3707_v1 = vsub.f32 0.0, %v3521_v15  ;;  %v3525_v2 = vadd.f32 %v3524_v48, %v7653_v42 }
 0x48c   : > { %v5946_v55 = vpop.eup %5945  ;;  %5965 = vrcp.f32 %v4015_v40  ;;  %v4021_v56 = vadd.f32 1.0, %v5944_v47  ;;  %v3302_v49 = vpop.f32.mrb[76].mxu1  ;;  %v3850_v13 = vmul.f32 1.442695, %v3706_v20  ;;  %v3709_v31 = vsub.f32 0.0, %v3297_v21 }
 0x48d   : > { %v5948_v58 = vpop.eup %5947  ;;  %5967 = vrcp.f32 %v4017_v51  ;;  %v4018_v59 = vadd.f32 1.0, %v5946_v55  ;;  %v3528_v50 = vpop.f32.mrb[44].mxu0  ;;  %v3303_v32 = vadd.f32 %v3302_v49, %v7646_v5  ;;  %v3713_v38 = vsub.f32 0.0, %v3523_v26 }
 0x48e   : > { %v5950_v61 = vpop.eup %5949  ;;  %5969 = vrcp.f32 %v4021_v56  ;;  %v4022_v62 = vadd.f32 1.0, %v5948_v58  ;;  %v7673_v3 = vpop.f32.mrb[77].mxu1  ;;  %v3529_v48 = vadd.f32 %v3528_v50, %v7648_v22  ;;  %v3844_v47 = vmul.f32 1.442695, %v3703_v52 }
 0x48f   : > { %v7675_v33 = vpop.f32.mrb[45].mxu0  ;;  %v5952_v6 = vpop.eup %5951  ;;  %5971 = vrcp.f32 %v4018_v59  ;;  %v4024_v7 = vadd.f32 1.0, %v5950_v61  ;;  %v3710_v51 = vsub.f32 0.0, %v3299_v53  ;;  %v3852_v57 = vmul.f32 1.442695, %v3707_v1 }
 0x490   : > { %v7678_v9 = vpop.f32.mrb[78].mxu1  ;;  %v7680_v10 = vpop.f32.mrb[46].mxu0  ;;  %5973 = vrcp.f32 %v4022_v62  ;;  %v4028_v12 = vadd.f32 1.0, %v5952_v6  ;;  %v3714_v58 = vsub.f32 0.0, %v3525_v2  ;;  %v3856_v49 = vmul.f32 1.442695, %v3709_v31 }
 0x491   : > { %v5954_v11 = vpop.eup %5953  ;;  %v7683_v16 = vpop.f32.mrb[79].mxu1  ;;  %5975 = vrcp.f32 %v4024_v7  ;;  %v3716_v50 = vsub.f32 0.0, %v3303_v32  ;;  %v3864_v0 = vmul.f32 1.442695, %v3713_v38  ;;  %v3720_v6 = vsub.f32 0.0, %v3529_v48 }
 0x492   : > { %v7685_v17 = vpop.f32.mrb[47].mxu0  ;;  %v5956_v18 = vpop.eup %5955  ;;  %v4025_v19 = vadd.f32 1.0, %v5954_v11  ;;  %5977 = vrcp.f32 %v4028_v12  ;;  %v3858_v34 = vmul.f32 1.442695, %v3710_v51  ;;  %v3866_v12 = vmul.f32 1.442695, %v3714_v58 }
 0x493   : > { %v5958_v23 = vpop.eup %5957  ;;  %v4029_v24 = vadd.f32 1.0, %v5956_v18  ;;  %v3870_v15 = vmul.f32 1.442695, %v3716_v50 }
 0x494   : > { %v5960_v28 = vpop.eup %5959  ;;  %5979 = vrcp.f32 %v4025_v19  ;;  %v4031_v30 = vadd.f32 1.0, %v5958_v23  ;;  %v7698_v46 = vpop.f32.mrb[80].mxu1  ;;  %v3878_v23 = vmul.f32 1.442695, %v3720_v6 }
 0x495   : > { %v5962_v4 = vpop.eup %5961  ;;  %5981 = vrcp.f32 %v4029_v24  ;;  %v7700_v35 = vpop.f32.mrb[48].mxu0 }
 0x496   : > { %v5964_v27 = vpop.eup %5963  ;;  %5983 = vrcp.f32 %v4031_v30  ;;  %v7703_v39 = vpop.f32.mrb[81].mxu1 }
 0x497   : > { %v5966_v36 = vpop.eup %5965  ;;  %v5248_v37 = vpack.c.bf16 %v5964_v27, %v5960_v28  ;;  %5985 = vpow2.f32 %v3836_v63  ;;  %v7705_v40 = vpop.f32.mrb[49].mxu0 }
 0x498   : > { %v5968_v41 = vpop.eup %5967  ;;  %v5250_v44 = vpack.c.bf16 %v5966_v36, %v5962_v4  ;;  %5987 = vpow2.f32 %v3830_v8  ;;  %v7707_v54 = vpop.f32.mrb[82].mxu1  ;;  %v3305_v4 = vadd.f32 %v7673_v3, %v7651_v29  ;;  %v3307_v3 = vadd.f32 %v7678_v9, %v7646_v5 }
 0x499   : > { %v7709_v55 = vpop.f32.mrb[50].mxu0  ;;  %v5970_v56 = vpop.eup %5969  ;;  %4698 = vst [vmem:[%s7695_s14] sm:$0xff] %v5248_v37  ;;  %5989 = vpow2.f32 %v3838_v25  ;;  %v3309_v9 = vadd.f32 %v7683_v16, %v7651_v29 }
 0x49a   : > { %v7712_v59 = vpop.f32.mrb[83].mxu1  ;;  %v5972_v60 = vpop.eup %5971  ;;  %4700 = vst [vmem:[%s7695_s14 + $0x10] sm:$0xff] %v5250_v44  ;;  %5991 = vpow2.f32 %v3842_v43 }
 0x49b   : > { %v7715_v61 = vpop.f32.mrb[51].mxu0  ;;  %v5974_v62 = vpop.eup %5973  ;;  %v5252_v63 = vpack.c.bf16 %v5972_v60, %v5968_v41  ;;  %5993 = vpow2.f32 %v3850_v13  ;;  %v3531_v13 = vadd.f32 %v7675_v33, %v7653_v42  ;;  %v3717_v41 = vsub.f32 0.0, %v3305_v4 }
 0x49c   : > { %v5976_v7 = vpop.eup %5975  ;;  %v5254_v8 = vpack.c.bf16 %v5974_v62, %v5970_v56  ;;  %5995 = vpow2.f32 %v3844_v47  ;;  %v7719_v18 = vpop.f32.mrb[84].mxu1  ;;  %v3533_v60 = vadd.f32 %v7680_v10, %v7648_v22  ;;  %v3535_v10 = vadd.f32 %v7685_v17, %v7653_v42 }
 0x49d   : > { %v5978_v11 = vpop.eup %5977  ;;  %4703 = vst [vmem:[%s7695_s14 + $0x1c] sm:$0xff] %v5252_v63  ;;  %5997 = vpow2.f32 %v3852_v57  ;;  %v7721_v19 = vpop.f32.mrb[52].mxu0  ;;  %v3721_v51 = vsub.f32 0.0, %v3531_v13  ;;  %v3724_v4 = vsub.f32 0.0, %v3309_v9  ;;  %v3539_v13 = vadd.f32 %v7700_v35, %v7648_v22 }
 0x49e   : > { %v5980_v14 = vpop.eup %5979  ;;  %4705 = vst [vmem:[%s7695_s14 + $0x2c] sm:$0xff] %v5254_v8  ;;  %5999 = vpow2.f32 %v3856_v49  ;;  %v7723_v24 = vpop.f32.mrb[85].mxu1 }
 0x49f   : > { %v5982_v20 = vpop.eup %5981  ;;  %v5256_v21 = vpack.c.bf16 %v5980_v14, %v5976_v7  ;;  %6001 = vpow2.f32 %v3864_v0  ;;  %v7725_v25 = vpop.f32.mrb[53].mxu0  ;;  %v3723_v0 = vsub.f32 0.0, %v3307_v3 }
 0x4a0   : > { %v7727_v26 = vpop.eup %5983  ;;  %v5258_v28 = vpack.c.bf16 %v5982_v20, %v5978_v11  ;;  %6003 = vpow2.f32 %v3858_v34  ;;  %v7729_v30 = vpop.f32.mrb[86].mxu1  ;;  %v3872_v11 = vmul.f32 1.442695, %v3717_v41  ;;  %v3880_v20 = vmul.f32 1.442695, %v3721_v51 }
 0x4a1   : > { %v7731_v52 = vpop.f32.mrb[54].mxu0  ;;  %v5986_v53 = vpop.eup %5985  ;;  %4707 = vst [vmem:[%s7695_s14 + $0x38] sm:$0xff] %v5256_v21  ;;  %6005 = vpow2.f32 %v3866_v12  ;;  %v3313_v21 = vadd.f32 %v7698_v46, %v7646_v5  ;;  %v3884_v17 = vmul.f32 1.442695, %v3723_v0  ;;  %v3886_v51 = vmul.f32 1.442695, %v3724_v4 }
 0x4a2   : > { %v7736_v43 = vpop.f32.mrb[87].mxu1  ;;  %v7738_v1 = vpop.f32.mrb[55].mxu0  ;;  %4709 = vst [vmem:[%s7695_s14 + $0x48] sm:$0xff] %v5258_v28  ;;  %v4035_v27 = vadd.f32 1.0, %v5986_v53  ;;  %6007 = vpow2.f32 %v3870_v15  ;;  %v3727_v53 = vsub.f32 0.0, %v3533_v60 }
 0x4a3   : > { %v5988_v2 = vpop.eup %5987  ;;  %6009 = vpow2.f32 %v3878_v23 }
 0x4a4   : > { %v5990_v31 = vpop.eup %5989  ;;  %v4032_v32 = vadd.f32 1.0, %v5988_v2  ;;  %6011 = vrcp.f32 %v4035_v27  ;;  %v7745_v56 = vpop.f32.mrb[88].mxu1  ;;  %v3892_v35 = vmul.f32 1.442695, %v3727_v53 }
 0x4a5   : > { %v5992_v36 = vpop.eup %5991  ;;  %v4036_v37 = vadd.f32 1.0, %v5990_v31  ;;  %v7747_v33 = vpop.f32.mrb[56].mxu0 }
 0x4a6   : > { %v5994_v38 = vpop.eup %5993  ;;  %6013 = vrcp.f32 %v4032_v32  ;;  %v4038_v48 = vadd.f32 1.0, %v5992_v36  ;;  %v7753_v49 = vpop.f32.mrb[89].mxu1  ;;  %v3728_v36 = vsub.f32 0.0, %v3535_v10  ;;  %v3319_v10 = vadd.f32 %v7712_v59, %v7651_v29 }
 0x4a7   : > { %v5996_v44 = vpop.eup %5995  ;;  %6015 = vrcp.f32 %v4036_v37  ;;  %v4042_v47 = vadd.f32 1.0, %v5994_v38  ;;  %v7755_v50 = vpop.f32.mrb[57].mxu0  ;;  %v3315_v37 = vadd.f32 %v7703_v39, %v7651_v29  ;;  %v3730_v38 = vsub.f32 0.0, %v3313_v21 }
 0x4a8   : > { %v5998_v57 = vpop.eup %5997  ;;  %6017 = vrcp.f32 %v4038_v48  ;;  %v4039_v58 = vadd.f32 1.0, %v5996_v44  ;;  %v7757_v6 = vpop.f32.mrb[90].mxu1  ;;  %v3541_v48 = vadd.f32 %v7705_v40, %v7653_v42  ;;  %v3734_v40 = vsub.f32 0.0, %v3539_v13 }
 0x4a9   : > { %v6000_v62 = vpop.eup %5999  ;;  %6019 = vrcp.f32 %v4042_v47  ;;  %v4043_v63 = vadd.f32 1.0, %v5998_v57  ;;  %v7759_v7 = vpop.f32.mrb[58].mxu0  ;;  %v3317_v57 = vadd.f32 %v7707_v54, %v7646_v5 }
 0x4aa   : > { %v6002_v8 = vpop.eup %6001  ;;  %6021 = vrcp.f32 %v4039_v58  ;;  %v4045_v34 = vadd.f32 1.0, %v6000_v62  ;;  %v7763_v16 = vpop.f32.mrb[91].mxu1  ;;  %v3543_v62 = vadd.f32 %v7709_v55, %v7648_v22  ;;  %v3894_v55 = vmul.f32 1.442695, %v3728_v36 }
 0x4ab   : > { %v7765_v12 = vpop.f32.mrb[59].mxu0  ;;  %v6004_v14 = vpop.eup %6003  ;;  %6023 = vrcp.f32 %v4043_v63  ;;  %v4049_v15 = vadd.f32 1.0, %v6002_v8  ;;  %v3735_v21 = vsub.f32 0.0, %v3541_v48  ;;  %v3737_v53 = vsub.f32 0.0, %v3317_v57 }
 0x4ac   : > { %v6006_v23 = vpop.eup %6005  ;;  %6025 = vrcp.f32 %v4045_v34  ;;  %v4046_v28 = vadd.f32 1.0, %v6004_v14  ;;  %v7775_v41 = vpop.f32.mrb[92].mxu1  ;;  %v3731_v34 = vsub.f32 0.0, %v3315_v37  ;;  %v3906_v59 = vmul.f32 1.442695, %v3734_v40 }
 0x4ad   : > { %v6008_v2 = vpop.eup %6007  ;;  %6027 = vrcp.f32 %v4049_v15  ;;  %v4050_v27 = vadd.f32 1.0, %v6006_v23  ;;  %v7777_v44 = vpop.f32.mrb[60].mxu0  ;;  %v3908_v36 = vmul.f32 1.442695, %v3735_v21  ;;  %v3549_v21 = vadd.f32 %v7721_v19, %v7648_v22 }
 0x4ae   : > { %v6010_v31 = vpop.eup %6009  ;;  %6029 = vrcp.f32 %v4046_v28  ;;  %v4052_v32 = vadd.f32 1.0, %v6008_v2  ;;  %v7781_v58 = vpop.f32.mrb[93].mxu1  ;;  %v3898_v28 = vmul.f32 1.442695, %v3730_v38  ;;  %v3741_v2 = vsub.f32 0.0, %v3543_v62 }
 0x4af   : > { %v6012_v46 = vpop.eup %6011  ;;  %6031 = vrcp.f32 %v4050_v27  ;;  %v4056_v3 = vadd.f32 1.0, %v6010_v31  ;;  %v7783_v39 = vpop.f32.mrb[61].mxu0  ;;  %v3900_v31 = vmul.f32 1.442695, %v3731_v34 }
 0x4b0   : > { %v6014_v47 = vpop.eup %6013  ;;  %6033 = vrcp.f32 %v4052_v32  ;;  %v7788_v63 = vpop.f32.mrb[94].mxu1  ;;  %v3738_v32 = vsub.f32 0.0, %v3319_v10  ;;  %v3323_v10 = vadd.f32 %v7719_v18, %v7646_v5 }
 0x4b1   : > { %v6016_v60 = vpop.eup %6015  ;;  %v5260_v9 = vpack.c.bf16 %v6014_v47, %v7727_v26  ;;  %6035 = vrcp.f32 %v4056_v3  ;;  %v7790_v0 = vpop.f32.mrb[62].mxu0  ;;  %v3920_v47 = vmul.f32 1.442695, %v3741_v2 }
 0x4b2   : > { %v6018_v8 = vpop.eup %6017  ;;  %v5262_v54 = vpack.c.bf16 %v6016_v60, %v6012_v46  ;;  %6037 = vpow2.f32 %v3872_v11  ;;  %v7794_v14 = vpop.f32.mrb[95].mxu1  ;;  %v3912_v46 = vmul.f32 1.442695, %v3737_v53  ;;  %v3914_v60 = vmul.f32 1.442695, %v3738_v32 }
 0x4b3   : > { %v7796_v26 = vpop.f32.mrb[63].mxu0  ;;  %v6020_v15 = vpop.eup %6019  ;;  %4711 = vst [vmem:[%s7695_s14 + $0x54] sm:$0xff] %v5260_v9  ;;  %6039 = vpow2.f32 %v3880_v20  ;;  %v3325_v53 = vadd.f32 %v7723_v24, %v7651_v29 }
 0x4b4   : > { %v6022_v23 = vpop.eup %6021  ;;  %4713 = vst [vmem:[%s7695_s14 + $0x64] sm:$0xff] %v5262_v54  ;;  %6041 = vpow2.f32 %v3884_v17  ;;  %v7801_v37 = vpop.f32.mrb[96].mxu1 }
 0x4b5   : > { %v6024_v11 = vpop.eup %6023  ;;  %v5264_v4 = vpack.c.bf16 %v6022_v23, %v6018_v8  ;;  %6043 = vpow2.f32 %v3892_v35  ;;  %v7804_v3 = vpop.f32.mrb[97].mxu1  ;;  %v3545_v8 = vadd.f32 %v7715_v61, %v7653_v42 }
 0x4b6   : > { %v6026_v27 = vpop.eup %6025  ;;  %v5266_v13 = vpack.c.bf16 %v6024_v11, %v6020_v15  ;;  %6045 = vpow2.f32 %v3886_v51  ;;  %v7806_v35 = vpop.f32.mrb[98].mxu1 }
 0x4b7   : > { %v6028_v20 = vpop.eup %6027  ;;  %4715 = vst [vmem:[%s7695_s14 + $0x70] sm:$0xff] %v5264_v4  ;;  %6047 = vpow2.f32 %v3894_v55  ;;  %v7810_v9 = vpop.f32.mrb[99].mxu1 }
 0x4b8   : > { %v6030_v17 = vpop.eup %6029  ;;  %4717 = vst [vmem:[%s7695_s14 + $0x80] sm:$0xff] %v5266_v13  ;;  %6049 = vpow2.f32 %v3898_v28  ;;  %v3744_v13 = vsub.f32 0.0, %v3323_v10 }
 0x4b9   : > { %v6032_v38 = vpop.eup %6031  ;;  %v5268_v48 = vpack.c.bf16 %v6030_v17, %v6026_v27  ;;  %6051 = vpow2.f32 %v3906_v59  ;;  %v3742_v59 = vsub.f32 0.0, %v3545_v8 }
 0x4ba   : > { %v7808_v51 = vpop.eup %6033  ;;  %v5270_v57 = vpack.c.bf16 %v6032_v38, %v6028_v20  ;;  %6053 = vpow2.f32 %v3900_v31  ;;  %v3748_v20 = vsub.f32 0.0, %v3549_v21  ;;  %v3926_v8 = vmul.f32 1.442695, %v3744_v13 }
 0x4bb   : > { %v7812_v40 = vpop.eup %6035  ;;  %4719 = vst [vmem:[%s7695_s14 + $0x8c] sm:$0xff] %v5268_v48  ;;  %6055 = vpow2.f32 %v3908_v36 }
 0x4bc   : > { %v6038_v62 = vpop.eup %6037  ;;  %4721 = vst [vmem:[%s7695_s14 + $0x9c] sm:$0xff] %v5270_v57  ;;  %6057 = vpow2.f32 %v3912_v46  ;;  %v7824_v11 = vpop.f32.mrb[100].mxu1  ;;  %v3745_v46 = vsub.f32 0.0, %v3325_v53  ;;  %v3551_v57 = vadd.f32 %v7725_v25, %v7653_v42  ;;  %v3329_v25 = vadd.f32 %v7736_v43, %v7651_v29 }
 0x4bd   : > { %v6040_v54 = vpop.eup %6039  ;;  %v4053_v34 = vadd.f32 1.0, %v6038_v62  ;;  %6059 = vpow2.f32 %v3920_v47  ;;  %v7826_v2 = vpop.f32.mrb[101].mxu1  ;;  %v3922_v47 = vmul.f32 1.442695, %v3742_v59  ;;  %v3555_v59 = vadd.f32 %v7738_v1, %v7653_v42 }
 0x4be   : > { %v6042_v15 = vpop.eup %6041  ;;  %v4057_v55 = vadd.f32 1.0, %v6040_v54  ;;  %6061 = vpow2.f32 %v3914_v60  ;;  %v7828_v31 = vpop.f32.mrb[102].mxu1  ;;  %v3327_v54 = vadd.f32 %v7729_v30, %v7646_v5  ;;  %v3749_v30 = vsub.f32 0.0, %v3551_v57 }
 0x4bf   : > { %v6044_v23 = vpop.eup %6043  ;;  %6063 = vrcp.f32 %v4053_v34  ;;  %v4059_v28 = vadd.f32 1.0, %v6042_v15  ;;  %v7830_v36 = vpop.f32.mrb[103].mxu1  ;;  %v3934_v15 = vmul.f32 1.442695, %v3748_v20  ;;  %v3559_v1 = vadd.f32 %v7747_v33, %v7648_v22 }
 0x4c0   : > { %v6046_v61 = vpop.eup %6045  ;;  %6065 = vrcp.f32 %v4057_v55  ;;  %v4063_v4 = vadd.f32 1.0, %v6044_v23  ;;  %v3553_v55 = vadd.f32 %v7731_v52, %v7648_v22  ;;  %v3751_v13 = vsub.f32 0.0, %v3327_v54 }
 0x4c1   : > { %v6048_v18 = vpop.eup %6047  ;;  %6067 = vrcp.f32 %v4059_v28  ;;  %v4060_v27 = vadd.f32 1.0, %v6046_v61  ;;  %v3928_v28 = vmul.f32 1.442695, %v3745_v46 }
 0x4c2   : > { %v6050_v19 = vpop.eup %6049  ;;  %6069 = vrcp.f32 %v4063_v4  ;;  %v4064_v32 = vadd.f32 1.0, %v6048_v18  ;;  %v3940_v33 = vmul.f32 1.442695, %v3751_v13 }
 0x4c3   : > { %v6052_v24 = vpop.eup %6051  ;;  %6071 = vrcp.f32 %v4060_v27  ;;  %v4066_v17 = vadd.f32 1.0, %v6050_v19  ;;  %v3333_v19 = vadd.f32 %v7745_v56, %v7646_v5  ;;  %v3335_v56 = vadd.f32 %v7753_v49, %v7651_v29 }
 0x4c4   : > { %v6054_v38 = vpop.eup %6053  ;;  %6073 = vrcp.f32 %v4064_v32  ;;  %v4070_v48 = vadd.f32 1.0, %v6052_v24  ;;  %v7840_v53 = vpop.f32.mrb[104].mxu1  ;;  %v3755_v24 = vsub.f32 0.0, %v3553_v55  ;;  %v3762_v49 = vsub.f32 0.0, %v3559_v1 }
 0x4c5   : > { %v6056_v60 = vpop.eup %6055  ;;  %6075 = vrcp.f32 %v4066_v17  ;;  %v4067_v62 = vadd.f32 1.0, %v6054_v38  ;;  %v7844_v18 = vpop.f32.mrb[105].mxu1 }
 0x4c6   : > { %v6058_v34 = vpop.eup %6057  ;;  %6077 = vrcp.f32 %v4070_v48  ;;  %v4071_v10 = vadd.f32 1.0, %v6056_v60  ;;  %v7848_v43 = vpop.f32.mrb[106].mxu1  ;;  %v3752_v48 = vsub.f32 0.0, %v3329_v25  ;;  %v3756_v60 = vsub.f32 0.0, %v3555_v59 }
 0x4c7   : > { %v6060_v21 = vpop.eup %6059  ;;  %6079 = vrcp.f32 %v4067_v62  ;;  %v4073_v23 = vadd.f32 1.0, %v6058_v34  ;;  %v7853_v17 = vpop.f32.mrb[107].mxu1  ;;  %v3561_v62 = vadd.f32 %v7755_v50, %v7653_v42  ;;  %v3758_v34 = vsub.f32 0.0, %v3333_v19 }
 0x4c8   : > { %v6062_v61 = vpop.eup %6061  ;;  %6081 = vrcp.f32 %v4071_v10  ;;  %v4077_v4 = vadd.f32 1.0, %v6060_v21  ;;  %v3948_v55 = vmul.f32 1.442695, %v3755_v24  ;;  %v3759_v25 = vsub.f32 0.0, %v3335_v56 }
 0x4c9   : > { %v6064_v27 = vpop.eup %6063  ;;  %6083 = vrcp.f32 %v4073_v23  ;;  %v4074_v52 = vadd.f32 1.0, %v6062_v61  ;;  %v3962_v13 = vmul.f32 1.442695, %v3762_v49  ;;  %v2637_v49 = vsub.s32 2, %v6988_v45 }
 0x4ca   : > { %v6066_v32 = vpop.eup %6065  ;;  %v5272_v20 = vpack.c.bf16 %v6064_v27, %v7808_v51  ;;  %6085 = vrcp.f32 %v4077_v4  ;;  %v3936_v51 = vmul.f32 1.442695, %v3749_v30  ;;  %v3950_v4 = vmul.f32 1.442695, %v3756_v60 }
 0x4cb   : > { %v6068_v46 = vpop.eup %6067  ;;  %v5274_v38 = vpack.c.bf16 %v6066_v32, %v7812_v40  ;;  %6087 = vrcp.f32 %v4074_v52  ;;  %v3956_v24 = vmul.f32 1.442695, %v3759_v25 }
 0x4cc   : > { %v6070_v57 = vpop.eup %6069  ;;  %4723 = vst [vmem:[%s7695_s14 + $0xa8] sm:$0xff] %v5272_v20  ;;  %6089 = vpow2.f32 %v3922_v47  ;;  %v3942_v47 = vmul.f32 1.442695, %v3752_v48  ;;  %v7862_v61 = vpop.f32.mrb[108].mxu1 }
 0x4cd   : > { %v6072_v54 = vpop.eup %6071  ;;  %4725 = vst [vmem:[%s7695_s14 + $0xb8] sm:$0xff] %v5274_v38  ;;  %6091 = vpow2.f32 %v3926_v8  ;;  %v3763_v8 = vsub.f32 0.0, %v3561_v62  ;;  %v7865_v30 = vpop.f32.mrb[109].mxu1  ;;  %v3563_v62 = vadd.f32 %v7759_v7, %v7648_v22  ;;  %v3339_v7 = vadd.f32 %v7763_v16, %v7651_v29 }
 0x4ce   : > { %v6074_v40 = vpop.eup %6073  ;;  %v5276_v10 = vpack.c.bf16 %v6072_v54, %v6068_v46  ;;  %6093 = vpow2.f32 %v3934_v15  ;;  %v3954_v15 = vmul.f32 1.442695, %v3758_v34  ;;  %v7868_v27 = vpop.f32.mrb[110].mxu1  ;;  %v3343_v16 = vadd.f32 %v7775_v41, %v7646_v5 }
 0x4cf   : > { %v6076_v21 = vpop.eup %6075  ;;  %v5278_v23 = vpack.c.bf16 %v6074_v40, %v6070_v57  ;;  %6095 = vpow2.f32 %v3928_v28  ;;  %v7870_v19 = vpop.f32.mrb[111].mxu1  ;;  %v3964_v46 = vmul.f32 1.442695, %v3763_v8  ;;  %v3337_v57 = vadd.f32 %v7757_v6, %v7646_v5 }
 0x4d0   : > { %v6078_v50 = vpop.eup %6077  ;;  %4727 = vst [vmem:[%s7695_s14 + $0xc4] sm:$0xff] %v5276_v10  ;;  %6097 = vpow2.f32 %v3936_v51  ;;  %v3769_v8 = vsub.f32 0.0, %v3563_v62  ;;  %v3569_v41 = vadd.f32 %v7777_v44, %v7648_v22 }
 0x4d1   : > { %v6080_v59 = vpop.eup %6079  ;;  %4729 = vst [vmem:[%s7695_s14 + $0xd4] sm:$0xff] %v5278_v23  ;;  %6099 = vpow2.f32 %v3940_v33 }
 0x4d2   : > { %v6082_v28 = vpop.eup %6081  ;;  %v5280_v52 = vpack.c.bf16 %v6080_v59, %v6076_v21  ;;  %6101 = vpow2.f32 %v3948_v55 }
 0x4d3   : > { %v6084_v32 = vpop.eup %6083  ;;  %v5282_v20 = vpack.c.bf16 %v6082_v28, %v6078_v50  ;;  %6103 = vpow2.f32 %v3942_v47  ;;  %v3765_v47 = vsub.f32 0.0, %v3337_v57  ;;  %v3565_v28 = vadd.f32 %v7765_v12, %v7653_v42 }
 0x4d4   : > { %v7872_v1 = vpop.eup %6085  ;;  %4731 = vst [vmem:[%s7695_s14 + $0xe0] sm:$0xff] %v5280_v52  ;;  %6105 = vpow2.f32 %v3950_v4  ;;  %v7880_v54 = vpop.f32.mrb[112].mxu1  ;;  %v2641_v52 = vsub.s32 3, %v6988_v45 }
 0x4d5   : > { %v6088_v38 = vpop.eup %6087  ;;  %4733 = vst [vmem:[%s7695_s14 + $0xf0] sm:$0xff] %v5282_v20  ;;  %6107 = vpow2.f32 %v3954_v15  ;;  %v7883_v40 = vpop.f32.mrb[113].mxu1  ;;  %v7900_v20 = vld [vmem:[%s8160_s9] sm:$0x7f]  ;;  %v3968_v12 = vmul.f32 1.442695, %v3765_v47  ;;  %v3571_v47 = vadd.f32 %v7783_v39, %v7653_v42 }
 0x4d6   : > { %v6090_v48 = vpop.eup %6089  ;;  %v5284_v56 = vpack.c.bf16 %v6088_v38, %v6084_v32  ;;  %6109 = vpow2.f32 %v3962_v13  ;;  %v7886_v6 = vpop.f32.mrb[114].mxu1 }
 0x4d7   : > { %v6092_v51 = vpop.eup %6091  ;;  %v4078_v60 = vadd.f32 1.0, %v6090_v48  ;;  %6111 = vpow2.f32 %v3956_v24  ;;  %v7890_v25 = vpop.f32.mrb[115].mxu1  ;;  %v7903_v24 = vrot.slane %v7900_v20, %v2637_v49  ;;  %v3766_v48 = vsub.f32 0.0, %v3339_v7 }
 0x4d8   : > { %v6094_v33 = vpop.eup %6093  ;;  %4735 = vst [vmem:[%s7695_s14 + $0xfc] sm:$0xff] %v5284_v56  ;;  %v4080_v34 = vadd.f32 1.0, %v6092_v51  ;;  %6113 = vpow2.f32 %v3964_v46  ;;  %v3976_v51 = vmul.f32 1.442695, %v3769_v8  ;;  %v3347_v8 = vadd.f32 %v7788_v63, %v7646_v5 }
 0x4d9   : > { %v6096_v10 = vpop.eup %6095  ;;  %6115 = vrcp.f32 %v4078_v60  ;;  %v4084_v55 = vadd.f32 1.0, %v6094_v33  ;;  %v3777_v63 = vsub.f32 0.0, %v3571_v47 }
 0x4da   : > { %v6098_v21 = vpop.eup %6097  ;;  %6117 = vrcp.f32 %v4080_v34  ;;  %v4081_v23 = vadd.f32 1.0, %v6096_v10  ;;  %v3770_v34 = vsub.f32 0.0, %v3565_v28  ;;  %v3345_v10 = vadd.f32 %v7781_v58, %v7651_v29 }
 0x4db   : > { %v6100_v50 = vpop.eup %6099  ;;  %6119 = vrcp.f32 %v4084_v55  ;;  %v4085_v4 = vadd.f32 1.0, %v6098_v21  ;;  %v3776_v28 = vsub.f32 0.0, %v3569_v41 }
 0x4dc   : > { %v6102_v59 = vpop.eup %6101  ;;  %6121 = vrcp.f32 %v4081_v23  ;;  %v4087_v15 = vadd.f32 1.0, %v6100_v50  ;;  %v7907_v60 = vpop.f32.mrb[116].mxu1  ;;  %v3772_v23 = vsub.f32 0.0, %v3343_v16  ;;  %v3773_v16 = vsub.f32 0.0, %v3345_v10 }
 0x4dd   : > { %v6104_v13 = vpop.eup %6103  ;;  %6123 = vrcp.f32 %v4085_v4  ;;  %v4091_v32 = vadd.f32 1.0, %v6102_v59  ;;  %v7911_v55 = vpop.f32.mrb[117].mxu1  ;;  %v3970_v4 = vmul.f32 1.442695, %v3766_v48  ;;  %v3978_v5 = vmul.f32 1.442695, %v3770_v34 }
 0x4de   : > { %v6106_v46 = vpop.eup %6105  ;;  %6125 = vrcp.f32 %v4087_v15  ;;  %v4088_v38 = vadd.f32 1.0, %v6104_v13  ;;  %v7915_v7 = vpop.f32.mrb[118].mxu1  ;;  %v3573_v13 = vadd.f32 %v7790_v0, %v7648_v22  ;;  %v3575_v48 = vadd.f32 %v7796_v26, %v7653_v42 }
 0x4df   : > { %v6108_v56 = vpop.eup %6107  ;;  %6127 = vrcp.f32 %v4091_v32  ;;  %v4092_v57 = vadd.f32 1.0, %v6106_v46  ;;  %v7919_v59 = vpop.f32.mrb[119].mxu1  ;;  %v3349_v46 = vadd.f32 %v7794_v14, %v7651_v29  ;;  %v3779_v22 = vsub.f32 0.0, %v3347_v8 }
 0x4e0   : > { %v6110_v62 = vpop.eup %6109  ;;  %6129 = vrcp.f32 %v4088_v38  ;;  %v4094_v33 = vadd.f32 1.0, %v6108_v56  ;;  %v3386_v0 = vadd.f32 %v7801_v37, %v7903_v24  ;;  %v3990_v29 = vmul.f32 1.442695, %v3776_v28 }
 0x4e1   : > { %v6112_v49 = vpop.eup %6111  ;;  %6131 = vrcp.f32 %v4092_v57  ;;  %v4098_v21 = vadd.f32 1.0, %v6110_v62  ;;  %v3982_v57 = vmul.f32 1.442695, %v3772_v23  ;;  %v3783_v14 = vsub.f32 0.0, %v3573_v13 }
 0x4e2   : > { %v6114_v44 = vpop.eup %6113  ;;  %6133 = vrcp.f32 %v4094_v33  ;;  %v4095_v50 = vadd.f32 1.0, %v6112_v49  ;;  %v3984_v42 = vmul.f32 1.442695, %v3773_v16  ;;  %v3780_v26 = vsub.f32 0.0, %v3349_v46 }
 0x4e3   : > { %v6116_v58 = vpop.eup %6115  ;;  %6135 = vrcp.f32 %v4098_v21  ;;  %v4099_v15 = vadd.f32 1.0, %v6114_v44  ;;  %v3992_v49 = vmul.f32 1.442695, %v3777_v63  ;;  %v3784_v37 = vsub.f32 0.0, %v3575_v48 }
 0x4e4   : > { %v6118_v39 = vpop.eup %6117  ;;  %v5286_v32 = vpack.c.bf16 %v6116_v58, %v7872_v1  ;;  %6137 = vrcp.f32 %v4095_v50  ;;  %v7931_v62 = vpop.f32.mrb[120].mxu1  ;;  %v3996_v23 = vmul.f32 1.442695, %v3779_v22  ;;  %v3676_v47 = vsub.f32 0.0, %v3386_v0 }
 0x4e5   : > { %v6120_v38 = vpop.eup %6119  ;;  %6139 = vrcp.f32 %v4099_v15  ;;  %v4004_v8 = vmul.f32 1.442695, %v3783_v14  ;;  %v7944_v58 = vrot.slane %v7900_v20, %v2641_v52  ;;  %v3998_v13 = vmul.f32 1.442695, %v3780_v26 }
 0x4e6   : > { %v6122_v56 = vpop.eup %6121  ;;  %4737 = vst [vmem:[%s7695_s14 + $0x10c] sm:$0xff] %v5286_v32  ;;  %6141 = vpow2.f32 %v3968_v12  ;;  %v7933_v12 = vpop.f32.mrb[121].mxu1  ;;  %v4006_v32 = vmul.f32 1.442695, %v3784_v37  ;;  %v3790_v46 = vmul.f32 1.442695, %v3676_v47  ;;  %v3396_v37 = vadd.f32 %v7824_v11, %v7903_v24 }
 0x4e7   : > { %v6124_v1 = vpop.eup %6123  ;;  %v5288_v41 = vpack.c.bf16 %v6122_v56, %v6118_v39  ;;  %6143 = vpow2.f32 %v3976_v51  ;;  %v7936_v21 = vpop.f32.mrb[122].mxu1  ;;  %v3388_v52 = vadd.f32 %v7804_v3, %v7944_v58  ;;  %v3398_v47 = vadd.f32 %v7826_v2, %v7944_v58 }
 0x4e8   : > { %v6126_v33 = vpop.eup %6125  ;;  %v5290_v34 = vpack.c.bf16 %v6124_v1, %v6120_v38  ;;  %6145 = vpow2.f32 %v3970_v4  ;;  %v7939_v44 = vpop.f32.mrb[123].mxu1 }
 0x4e9   : > { %v6128_v10 = vpop.eup %6127  ;;  %4739 = vst [vmem:[%s7695_s14 + $0x118] sm:$0xff] %v5288_v41  ;;  %6147 = vpow2.f32 %v3978_v5 }
 0x4ea   : > { %v6130_v51 = vpop.eup %6129  ;;  %4741 = vst [vmem:[%s7695_s14 + $0x128] sm:$0xff] %v5290_v34  ;;  %6149 = vpow2.f32 %v3982_v57  ;;  %v3390_v57 = vadd.f32 %v7806_v35, %v7903_v24  ;;  %v3392_v35 = vadd.f32 %v7810_v9, %v7944_v58 }
 0x4eb   : > { %v6132_v50 = vpop.eup %6131  ;;  %v5292_v4 = vpack.c.bf16 %v6130_v51, %v6126_v33  ;;  %6151 = vpow2.f32 %v3990_v29 }
 0x4ec   : > { %v6134_v15 = vpop.eup %6133  ;;  %v5294_v28 = vpack.c.bf16 %v6132_v50, %v6128_v10  ;;  %6153 = vpow2.f32 %v3984_v42  ;;  %v7950_v63 = vpop.f32.mrb[124].mxu1  ;;  %v3677_v42 = vsub.f32 0.0, %v3388_v52  ;;  %v3691_v52 = vsub.f32 0.0, %v3398_v47 }
 0x4ed   : > { %v6136_v39 = vpop.eup %6135  ;;  %4743 = vst [vmem:[%s7695_s14 + $0x134] sm:$0xff] %v5292_v4  ;;  %6155 = vpow2.f32 %v3992_v49  ;;  %v7954_v22 = vpop.f32.mrb[125].mxu1  ;;  %v3683_v49 = vsub.f32 0.0, %v3390_v57 }
 0x4ee   : > { %v6138_v16 = vpop.eup %6137  ;;  %4745 = vst [vmem:[%s7695_s14 + $0x144] sm:$0xff] %v5294_v28  ;;  %6157 = vpow2.f32 %v3996_v23  ;;  %v7957_v41 = vpop.f32.mrb[126].mxu1  ;;  %v3792_v28 = vmul.f32 1.442695, %v3677_v42 }
 0x4ef   : > { %v6140_v38 = vpop.eup %6139  ;;  %v5296_v5 = vpack.c.bf16 %v6138_v16, %v6134_v15  ;;  %6159 = vpow2.f32 %v4004_v8  ;;  %v7960_v3 = vpop.f32.mrb[127].mxu1  ;;  %v3400_v8 = vadd.f32 %v7828_v31, %v7903_v24  ;;  %v3804_v16 = vmul.f32 1.442695, %v3683_v49 }
 0x4f0   : > { %v6142_v48 = vpop.eup %6141  ;;  %v5298_v56 = vpack.c.bf16 %v6140_v38, %v6136_v39  ;;  %6161 = vpow2.f32 %v3998_v13  ;;  %v3684_v13 = vsub.f32 0.0, %v3392_v35  ;;  %v3408_v49 = vadd.f32 %v7844_v18, %v7944_v58 }
 0x4f1   : > { %v6144_v0 = vpop.eup %6143  ;;  %4747 = vst [vmem:[%s7695_s14 + $0x150] sm:$0xff] %v5296_v5  ;;  %v4101_v1 = vadd.f32 1.0, %v6142_v48  ;;  %6163 = vpow2.f32 %v4006_v32  ;;  %v3416_v18 = vadd.f32 %v7862_v61, %v7903_v24 }
 0x4f2   : > { %v6146_v29 = vpop.eup %6145  ;;  %4749 = vst [vmem:[%s7695_s14 + $0x160] sm:$0xff] %v5298_v56  ;;  %v4105_v14 = vadd.f32 1.0, %v6144_v0  ;;  %6165 = vpow2.f32 %v3790_v46  ;;  %v3690_v46 = vsub.f32 0.0, %v3396_v37  ;;  %v3697_v0 = vsub.f32 0.0, %v3400_v8 }
 0x4f3   : > { %v6148_v33 = vpop.eup %6147  ;;  %6167 = vrcp.f32 %v4101_v1  ;;  %v4102_v34 = vadd.f32 1.0, %v6146_v29  ;;  %v3402_v1 = vadd.f32 %v7830_v36, %v7944_v58 }
 0x4f4   : > { %v6150_v26 = vpop.eup %6149  ;;  %6169 = vrcp.f32 %v4105_v14  ;;  %v4106_v10 = vadd.f32 1.0, %v6148_v33  ;;  %v5367_v39 = vpop.f32.mrb[128].mxu1  ;;  %v3818_v36 = vmul.f32 1.442695, %v3690_v46 }
 0x4f5   : > { %v6152_v51 = vpop.eup %6151  ;;  %6171 = vrcp.f32 %v4102_v34  ;;  %v4108_v23 = vadd.f32 1.0, %v6150_v26  ;;  %v5368_v38 = vpop.f32.mrb[129].mxu1  ;;  %v3406_v34 = vadd.f32 %v7840_v53, %v7903_v24  ;;  %v3698_v53 = vsub.f32 0.0, %v3402_v1 }
 0x4f6   : > { %v6154_v50 = vpop.eup %6153  ;;  %6173 = vrcp.f32 %v4106_v10  ;;  %v4112_v4 = vadd.f32 1.0, %v6152_v51  ;;  %v7970_v48 = vadd.f32 %v5368_v38, %v5367_v39  ;;  %v5370_v56 = vpop.f32.mrb[130].mxu1  ;;  %v3806_v10 = vmul.f32 1.442695, %v3684_v13 }
 0x4f7   : > { %v6156_v9 = vpop.eup %6155  ;;  %6175 = vrcp.f32 %v4108_v23  ;;  %v4109_v15 = vadd.f32 1.0, %v6154_v50  ;;  %v5371_v29 = vpop.f32.mrb[131].mxu1  ;;  %v3410_v23 = vadd.f32 %v7848_v43, %v7903_v24  ;;  %v3820_v50 = vmul.f32 1.442695, %v3691_v52 }
 0x4f8   : > { %v6158_v32 = vpop.eup %6157  ;;  %6177 = vrcp.f32 %v4112_v4  ;;  %v4113_v11 = vadd.f32 1.0, %v6156_v9  ;;  %v7976_v42 = vadd.f32 %v5371_v29, %v5370_v56  ;;  %v3412_v4 = vadd.f32 %v7853_v17, %v7944_v58 }
 0x4f9   : > { %v6160_v5 = vpop.eup %6159  ;;  %6179 = vrcp.f32 %v4109_v15  ;;  %v4115_v2 = vadd.f32 1.0, %v6158_v32  ;;  %v3832_v9 = vmul.f32 1.442695, %v3697_v0  ;;  %v3704_v15 = vsub.f32 0.0, %v3406_v34 }
 0x4fa   : > { %v6162_v31 = vpop.eup %6161  ;;  %6181 = vrcp.f32 %v4113_v11  ;;  %v4119_v57 = vadd.f32 1.0, %v6160_v5  ;;  %v3705_v43 = vsub.f32 0.0, %v3408_v49  ;;  %v3418_v11 = vadd.f32 %v7865_v30, %v7944_v58 }
 0x4fb   : > { %v6164_v14 = vpop.eup %6163  ;;  %6183 = vrcp.f32 %v4115_v2  ;;  %v4116_v33 = vadd.f32 1.0, %v6162_v31  ;;  %v3711_v5 = vsub.f32 0.0, %v3410_v23  ;;  %v3834_v61 = vmul.f32 1.442695, %v3698_v53 }
 0x4fc   : > { %v6166_v35 = vpop.eup %6165  ;;  %6185 = vrcp.f32 %v4119_v57  ;;  %v4120_v26 = vadd.f32 1.0, %v6164_v14  ;;  %v5373_v13 = vpop.f32.mrb[132].mxu1  ;;  %v3712_v31 = vsub.f32 0.0, %v3412_v4  ;;  %v3846_v0 = vmul.f32 1.442695, %v3704_v15 }
 0x4fd   : > { %v6168_v37 = vpop.eup %6167  ;;  %6187 = vrcp.f32 %v4116_v33  ;;  %v4012_v51 = vadd.f32 1.0, %v6166_v35  ;;  %v5374_v46 = vpop.f32.mrb[133].mxu1  ;;  %v3718_v30 = vsub.f32 0.0, %v3416_v18  ;;  %v3848_v14 = vmul.f32 1.442695, %v3705_v43 }
 0x4fe   : > { %v6170_v47 = vpop.eup %6169  ;;  %6189 = vrcp.f32 %v4120_v26  ;;  %v7988_v2 = vadd.f32 %v5374_v46, %v5373_v13  ;;  %v5376_v52 = vpop.f32.mrb[134].mxu1  ;;  %v3719_v33 = vsub.f32 0.0, %v3418_v11  ;;  %v3860_v26 = vmul.f32 1.442695, %v3711_v5 }
 0x4ff   : > { %v6172_v8 = vpop.eup %6171  ;;  %6191 = vrcp.f32 %v4012_v51  ;;  %v5377_v57 = vpop.f32.mrb[135].mxu1  ;;  %v3862_v49 = vmul.f32 1.442695, %v3712_v31  ;;  %v3874_v51 = vmul.f32 1.442695, %v3718_v30  ;;  %v3420_v53 = vadd.f32 %v7868_v27, %v7903_v24 }
 0x500   : > { %v6174_v39 = vpop.eup %6173  ;;  %v5300_v32 = vpack.c.bf16 %v6172_v8, %v6168_v37  ;;  %6193 = vpow2.f32 %v3792_v28  ;;  %v7992_v1 = vadd.f32 %v5377_v57, %v5376_v52  ;;  %v3426_v5 = vadd.f32 %v7880_v54, %v7903_v24 }
 0x501   : > { %v6176_v38 = vpop.eup %6175  ;;  %v5302_v17 = vpack.c.bf16 %v6174_v39, %v6170_v47  ;;  %6195 = vpow2.f32 %v3804_v16  ;;  %v3422_v39 = vadd.f32 %v7870_v19, %v7944_v58  ;;  %v3428_v57 = vadd.f32 %v7883_v40, %v7944_v58 }
 0x502   : > { %v6178_v56 = vpop.eup %6177  ;;  %4751 = vst [vmem:[%s7695_s14 + $0x16c] sm:$0xff] %v5300_v32  ;;  %6197 = vpow2.f32 %v3806_v10  ;;  %v3430_v30 = vadd.f32 %v7886_v6, %v7903_v24 }
 0x503   : > { %v6180_v28 = vpop.eup %6179  ;;  %4753 = vst [vmem:[%s7695_s14 + $0x17c] sm:$0xff] %v5302_v17  ;;  %6199 = vpow2.f32 %v3818_v36  ;;  %v3725_v17 = vsub.f32 0.0, %v3420_v53  ;;  %v3726_v31 = vsub.f32 0.0, %v3422_v39 }
 0x504   : > { %v6182_v16 = vpop.eup %6181  ;;  %v5304_v29 = vpack.c.bf16 %v6180_v28, %v6176_v38  ;;  %6201 = vpow2.f32 %v3820_v50  ;;  %v5379_v36 = vpop.f32.mrb[136].mxu1  ;;  %v3876_v50 = vmul.f32 1.442695, %v3719_v33  ;;  %v3732_v33 = vsub.f32 0.0, %v3426_v5 }
 0x505   : > { %v6184_v34 = vpop.eup %6183  ;;  %v5306_v35 = vpack.c.bf16 %v6182_v16, %v6178_v56  ;;  %6203 = vpow2.f32 %v3832_v9  ;;  %v5380_v4 = vpop.f32.mrb[137].mxu1  ;;  %v3890_v6 = vmul.f32 1.442695, %v3726_v31  ;;  %v3739_v53 = vsub.f32 0.0, %v3430_v30 }
 0x506   : > { %v6186_v10 = vpop.eup %6185  ;;  %4755 = vst [vmem:[%s7695_s14 + $0x188] sm:$0xff] %v5304_v29  ;;  %6205 = vpow2.f32 %v3834_v61  ;;  %v8000_v15 = vadd.f32 %v5380_v4, %v5379_v36  ;;  %v5382_v18 = vpop.f32.mrb[138].mxu1  ;;  %v3733_v36 = vsub.f32 0.0, %v3428_v57  ;;  %v3440_v5 = vadd.f32 %v7915_v7, %v7903_v24 }
 0x507   : > { %v6188_v37 = vpop.eup %6187  ;;  %4757 = vst [vmem:[%s7695_s14 + $0x198] sm:$0xff] %v5306_v35  ;;  %6207 = vpow2.f32 %v3846_v0  ;;  %v5383_v32 = vpop.f32.mrb[139].mxu1 }
 0x508   : > { %v6190_v23 = vpop.eup %6189  ;;  %v5308_v47 = vpack.c.bf16 %v6188_v37, %v6184_v34  ;;  %6209 = vpow2.f32 %v3848_v14  ;;  %v8006_v27 = vadd.f32 %v5383_v32, %v5382_v18  ;;  %v3888_v14 = vmul.f32 1.442695, %v3725_v17 }
 0x509   : > { %v7998_v8 = vpop.eup %6191  ;;  %v5310_v9 = vpack.c.bf16 %v6190_v23, %v6186_v10  ;;  %6211 = vpow2.f32 %v3860_v26  ;;  %v3432_v10 = vadd.f32 %v7890_v25, %v7944_v58  ;;  %v3436_v25 = vadd.f32 %v7907_v60, %v7903_v24 }
 0x50a   : > { %v6194_v13 = vpop.eup %6193  ;;  %4759 = vst [vmem:[%s7695_s14 + $0x1a4] sm:$0xff] %v5308_v47  ;;  %6213 = vpow2.f32 %v3862_v49  ;;  %v3904_v17 = vmul.f32 1.442695, %v3733_v36  ;;  %v3442_v60 = vadd.f32 %v7919_v59, %v7944_v58 }
 0x50b   : > { %v6196_v43 = vpop.eup %6195  ;;  %4761 = vst [vmem:[%s7695_s14 + $0x1b4] sm:$0xff] %v5310_v9  ;;  %v4013_v11 = vadd.f32 1.0, %v6194_v13  ;;  %6215 = vpow2.f32 %v3874_v51  ;;  %v3902_v13 = vmul.f32 1.442695, %v3732_v33 }
 0x50c   : > { %v6198_v46 = vpop.eup %6197  ;;  %v4019_v38 = vadd.f32 1.0, %v6196_v43  ;;  %6217 = vpow2.f32 %v3876_v50  ;;  %v5385_v16 = vpop.f32.mrb[140].mxu1  ;;  %v3740_v43 = vsub.f32 0.0, %v3432_v10  ;;  %v3754_v10 = vsub.f32 0.0, %v3442_v60 }
 0x50d   : > { %v6200_v52 = vpop.eup %6199  ;;  %6219 = vrcp.f32 %v4013_v11  ;;  %v4020_v56 = vadd.f32 1.0, %v6198_v46  ;;  %v5386_v34 = vpop.f32.mrb[141].mxu1  ;;  %v3438_v11 = vadd.f32 %v7911_v55, %v7944_v58  ;;  %v3746_v55 = vsub.f32 0.0, %v3436_v25 }
 0x50e   : > { %v6202_v61 = vpop.eup %6201  ;;  %6221 = vrcp.f32 %v4019_v38  ;;  %v4026_v19 = vadd.f32 1.0, %v6200_v52  ;;  %v8016_v40 = vadd.f32 %v5386_v34, %v5385_v16  ;;  %v5388_v49 = vpop.f32.mrb[142].mxu1  ;;  %v3448_v16 = vadd.f32 %v7933_v12, %v7944_v58 }
 0x50f   : > { %v6204_v28 = vpop.eup %6203  ;;  %6223 = vrcp.f32 %v4020_v56  ;;  %v4027_v0 = vadd.f32 1.0, %v6202_v61  ;;  %v5389_v23 = vpop.f32.mrb[143].mxu1  ;;  %v3916_v61 = vmul.f32 1.442695, %v3739_v53  ;;  %v3747_v7 = vsub.f32 0.0, %v3438_v11 }
 0x510   : > { %v6206_v29 = vpop.eup %6205  ;;  %6225 = vrcp.f32 %v4026_v19  ;;  %v4033_v54 = vadd.f32 1.0, %v6204_v28  ;;  %v8018_v4 = vadd.f32 %v5389_v23, %v5388_v49  ;;  %v3446_v28 = vadd.f32 %v7931_v62, %v7903_v24 }
 0x511   : > { %v6208_v35 = vpop.eup %6207  ;;  %6227 = vrcp.f32 %v4027_v0  ;;  %v4034_v26 = vadd.f32 1.0, %v6206_v29  ;;  %v3450_v34 = vadd.f32 %v7936_v21, %v7903_v24  ;;  %v3932_v23 = vmul.f32 1.442695, %v3747_v7 }
 0x512   : > { %v6210_v37 = vpop.eup %6209  ;;  %6229 = vrcp.f32 %v4033_v54  ;;  %v4040_v51 = vadd.f32 1.0, %v6208_v35  ;;  %v3760_v36 = vsub.f32 0.0, %v3446_v28  ;;  %v3452_v28 = vadd.f32 %v7939_v44, %v7944_v58 }
 0x513   : > { %v6212_v47 = vpop.eup %6211  ;;  %6231 = vrcp.f32 %v4034_v26  ;;  %v4041_v50 = vadd.f32 1.0, %v6210_v37  ;;  %v3918_v26 = vmul.f32 1.442695, %v3740_v43  ;;  %v3767_v53 = vsub.f32 0.0, %v3450_v34 }
 0x514   : > { %v6214_v9 = vpop.eup %6213  ;;  %6233 = vrcp.f32 %v4040_v51  ;;  %v4047_v18 = vadd.f32 1.0, %v6212_v47  ;;  %v5391_v19 = vpop.f32.mrb[144].mxu1  ;;  %v3930_v51 = vmul.f32 1.442695, %v3746_v55  ;;  %v3761_v47 = vsub.f32 0.0, %v3448_v16 }
 0x515   : > { %v6216_v39 = vpop.eup %6215  ;;  %6235 = vrcp.f32 %v4041_v50  ;;  %v4048_v32 = vadd.f32 1.0, %v6214_v9  ;;  %v5392_v0 = vpop.f32.mrb[145].mxu1  ;;  %v3458_v16 = vadd.f32 %v7954_v22, %v7944_v58 }
 0x516   : > { %v6218_v46 = vpop.eup %6217  ;;  %6237 = vrcp.f32 %v4047_v18  ;;  %v4054_v38 = vadd.f32 1.0, %v6216_v39  ;;  %v8033_v29 = vadd.f32 %v5392_v0, %v5391_v19  ;;  %v5394_v59 = vpop.f32.mrb[146].mxu1  ;;  %v3946_v18 = vmul.f32 1.442695, %v3754_v10 }
 0x517   : > { %v6220_v52 = vpop.eup %6219  ;;  %6239 = vrcp.f32 %v4048_v32  ;;  %v4055_v56 = vadd.f32 1.0, %v6218_v46  ;;  %v5395_v62 = vpop.f32.mrb[147].mxu1  ;;  %v3958_v32 = vmul.f32 1.442695, %v3760_v36  ;;  %v3960_v46 = vmul.f32 1.442695, %v3761_v47 }
 0x518   : > { %v6222_v31 = vpop.eup %6221  ;;  %v5249_v57 = vpack.c.bf16 %v6220_v52, %v7998_v8  ;;  %6241 = vrcp.f32 %v4054_v38  ;;  %v3753_v8 = vsub.f32 0.0, %v3440_v5  ;;  %v8038_v49 = vadd.f32 %v5395_v62, %v5394_v59 }
 0x519   : > { %v6224_v30 = vpop.eup %6223  ;;  %6243 = vrcp.f32 %v4055_v56  ;;  %v3972_v56 = vmul.f32 1.442695, %v3767_v53  ;;  %v2653_v19 = vsub.s32 6, %v6988_v45  ;;  %v3456_v0 = vadd.f32 %v7950_v63, %v7903_v24 }
 0x51a   : > { %v6226_v54 = vpop.eup %6225  ;;  %4699 = vst [vmem:[%s7695_s14 + $0x8] sm:$0xff] %v5249_v57  ;;  %v5253_v33 = vpack.c.bf16 %v6224_v30, %v6222_v31  ;;  %6245 = vpow2.f32 %v3888_v14 }
 0x51b   : > { %v6228_v35 = vpop.eup %6227  ;;  %6247 = vpow2.f32 %v3890_v6  ;;  %v3944_v6 = vmul.f32 1.442695, %v3753_v8  ;;  %v3460_v8 = vadd.f32 %v7957_v41, %v7903_v24  ;;  %v8060_v44 = vrot.slane %v7900_v20, %v2653_v19 }
 0x51c   : > { %v6230_v12 = vpop.eup %6229  ;;  %4704 = vst [vmem:[%s7695_s14 + $0x24] sm:$0xff] %v5253_v33  ;;  %v5257_v37 = vpack.c.bf16 %v6228_v35, %v6226_v54  ;;  %6249 = vpow2.f32 %v3902_v13  ;;  %v5397_v25 = vpop.f32.mrb[148].mxu1  ;;  %v3768_v35 = vsub.f32 0.0, %v3452_v28  ;;  %v3462_v20 = vadd.f32 %v7960_v3, %v7944_v58 }
 0x51d   : > { %v6232_v14 = vpop.eup %6231  ;;  %6251 = vpow2.f32 %v3904_v17  ;;  %v5398_v43 = vpop.f32.mrb[149].mxu1  ;;  %v3623_v19 = vadd.f32 %v7992_v1, %v8060_v44 }
 0x51e   : > { %v6234_v21 = vpop.eup %6233  ;;  %4708 = vst [vmem:[%s7695_s14 + $0x40] sm:$0xff] %v5257_v37  ;;  %v5261_v50 = vpack.c.bf16 %v6232_v14, %v6230_v12  ;;  %6253 = vpow2.f32 %v3916_v61  ;;  %v8043_v38 = vadd.f32 %v5398_v43, %v5397_v25  ;;  %v5400_v17 = vpop.f32.mrb[150].mxu1  ;;  %v3775_v37 = vsub.f32 0.0, %v3458_v16 }
 0x51f   : > { %v6236_v9 = vpop.eup %6235  ;;  %6255 = vpow2.f32 %v3918_v26  ;;  %v5401_v61 = vpop.f32.mrb[151].mxu1  ;;  %v3774_v26 = vsub.f32 0.0, %v3456_v0  ;;  %v3615_v43 = vadd.f32 %v7976_v42, %v8060_v44 }
 0x520   : > { %v6238_v39 = vpop.eup %6237  ;;  %4712 = vst [vmem:[%s7695_s14 + $0x5c] sm:$0xff] %v5261_v50  ;;  %v5265_v13 = vpack.c.bf16 %v6236_v9, %v6234_v21  ;;  %6257 = vpow2.f32 %v3930_v51  ;;  %v8047_v31 = vadd.f32 %v5401_v61, %v5400_v17  ;;  %v3781_v21 = vsub.f32 0.0, %v3460_v8 }
 0x521   : > { %v6240_v11 = vpop.eup %6239  ;;  %6259 = vpow2.f32 %v3932_v23  ;;  %v3974_v9 = vmul.f32 1.442695, %v3768_v35 }
 0x522   : > { %v6242_v5 = vpop.eup %6241  ;;  %4716 = vst [vmem:[%s7695_s14 + $0x78] sm:$0xff] %v5265_v13  ;;  %v5269_v52 = vpack.c.bf16 %v6240_v11, %v6238_v39  ;;  %6261 = vpow2.f32 %v3944_v6  ;;  %v3986_v13 = vmul.f32 1.442695, %v3774_v26  ;;  %v3620_v11 = vadd.f32 %v7988_v2, %v8060_v44 }
 0x523   : > { %v6244_v60 = vpop.eup %6243  ;;  %6263 = vpow2.f32 %v3946_v18  ;;  %v3612_v18 = vadd.f32 %v7970_v48, %v8060_v44  ;;  %v3628_v2 = vadd.f32 %v8000_v15, %v8060_v44 }
 0x524   : > { %v6246_v57 = vpop.eup %6245  ;;  %4720 = vst [vmem:[%s7695_s14 + $0x94] sm:$0xff] %v5269_v52  ;;  %v5273_v55 = vpack.c.bf16 %v6244_v60, %v6242_v5  ;;  %6265 = vpow2.f32 %v3958_v32  ;;  %v5403_v63 = vpop.f32.mrb[152].mxu1  ;;  %v3988_v32 = vmul.f32 1.442695, %v3775_v37  ;;  %v4000_v5 = vmul.f32 1.442695, %v3781_v21 }
 0x525   : > { %v6248_v30 = vpop.eup %6247  ;;  %v4061_v7 = vadd.f32 1.0, %v6246_v57  ;;  %6267 = vpow2.f32 %v3960_v46  ;;  %v5404_v22 = vpop.f32.mrb[153].mxu1  ;;  %v3782_v52 = vsub.f32 0.0, %v3462_v20  ;;  %v3680_v60 = vsub.f32 0.0, %v3612_v18 }
 0x526   : > { %v6250_v59 = vpop.eup %6249  ;;  %4724 = vst [vmem:[%s7695_s14 + $0xb0] sm:$0xff] %v5273_v55  ;;  %v4062_v45 = vadd.f32 1.0, %v6248_v30  ;;  %6269 = vpow2.f32 %v3972_v56  ;;  %v8062_v51 = vadd.f32 %v5404_v22, %v5403_v63  ;;  %v5406_v36 = vpop.f32.mrb[154].mxu1  ;;  %v3694_v16 = vsub.f32 0.0, %v3620_v11 }
 0x527   : > { %v6252_v54 = vpop.eup %6251  ;;  %6271 = vrcp.f32 %v4061_v7  ;;  %v4068_v33 = vadd.f32 1.0, %v6250_v59  ;;  %v5407_v41 = vpop.f32.mrb[155].mxu1  ;;  %v3687_v7 = vsub.f32 0.0, %v3615_v43  ;;  %v3631_v59 = vadd.f32 %v8006_v27, %v8060_v44 }
 0x528   : > { %v6254_v34 = vpop.eup %6253  ;;  %6273 = vrcp.f32 %v4062_v45  ;;  %v4069_v62 = vadd.f32 1.0, %v6252_v54  ;;  %v8066_v50 = vadd.f32 %v5407_v41, %v5406_v36  ;;  %v4002_v63 = vmul.f32 1.442695, %v3782_v52 }
 0x529   : > { %v6256_v10 = vpop.eup %6255  ;;  %6275 = vrcp.f32 %v4068_v33  ;;  %v4075_v12 = vadd.f32 1.0, %v6254_v34  ;;  %v3636_v33 = vadd.f32 %v8016_v40, %v8060_v44  ;;  %v3701_v34 = vsub.f32 0.0, %v3623_v19 }
 0x52a   : > { %v6258_v14 = vpop.eup %6257  ;;  %6277 = vrcp.f32 %v4069_v62  ;;  %v4076_v24 = vadd.f32 1.0, %v6256_v10  ;;  %v3639_v62 = vadd.f32 %v8018_v4, %v8060_v44  ;;  %v3798_v26 = vmul.f32 1.442695, %v3680_v60 }
 0x52b   : > { %v6260_v23 = vpop.eup %6259  ;;  %6279 = vrcp.f32 %v4075_v12  ;;  %v4082_v47 = vadd.f32 1.0, %v6258_v14  ;;  %v3708_v22 = vsub.f32 0.0, %v3628_v2  ;;  %v3812_v40 = vmul.f32 1.442695, %v3687_v7 }
 0x52c   : > { %v6262_v6 = vpop.eup %6261  ;;  %6281 = vrcp.f32 %v4076_v24  ;;  %v4083_v53 = vadd.f32 1.0, %v6260_v23  ;;  %v5409_v48 = vpop.f32.mrb[156].mxu1  ;;  %v3715_v12 = vsub.f32 0.0, %v3631_v59  ;;  %v3826_v14 = vmul.f32 1.442695, %v3694_v16 }
 0x52d   : > { %v6264_v25 = vpop.eup %6263  ;;  %6283 = vrcp.f32 %v4082_v47  ;;  %v4089_v39 = vadd.f32 1.0, %v6262_v6  ;;  %v5410_v57 = vpop.f32.mrb[157].mxu1  ;;  %v3722_v24 = vsub.f32 0.0, %v3636_v33  ;;  %v3840_v4 = vmul.f32 1.442695, %v3701_v34 }
 0x52e   : > { %v6266_v58 = vpop.eup %6265  ;;  %6285 = vrcp.f32 %v4083_v53  ;;  %v4090_v3 = vadd.f32 1.0, %v6264_v25  ;;  %v8078_v28 = vadd.f32 %v5410_v57, %v5409_v48  ;;  %v5412_v0 = vpop.f32.mrb[158].mxu1  ;;  %v3729_v41 = vsub.f32 0.0, %v3639_v62 }
 0x52f   : > { %v6268_v46 = vpop.eup %6267  ;;  %6287 = vrcp.f32 %v4089_v39  ;;  %v4096_v17 = vadd.f32 1.0, %v6266_v58  ;;  %v5413_v45 = vpop.f32.mrb[159].mxu1  ;;  %v3854_v21 = vmul.f32 1.442695, %v3708_v22  ;;  %v3868_v53 = vmul.f32 1.442695, %v3715_v12 }
 0x530   : > { %v6270_v56 = vpop.eup %6269  ;;  %6289 = vrcp.f32 %v4090_v3  ;;  %v4097_v61 = vadd.f32 1.0, %v6268_v46  ;;  %v8084_v8 = vadd.f32 %v5413_v45, %v5412_v0  ;;  %v3882_v25 = vmul.f32 1.442695, %v3722_v24 }
 0x531   : > { %v6272_v55 = vpop.eup %6271  ;;  %6291 = vrcp.f32 %v4096_v17  ;;  %v4103_v42 = vadd.f32 1.0, %v6270_v56  ;;  %v3647_v57 = vadd.f32 %v8038_v49, %v8060_v44  ;;  %v3652_v2 = vadd.f32 %v8043_v38, %v8060_v44 }
 0x532   : > { %v6274_v30 = vpop.eup %6273  ;;  %6293 = vrcp.f32 %v4097_v61  ;;  %v3644_v61 = vadd.f32 %v8033_v29, %v8060_v44  ;;  %v3655_v7 = vadd.f32 %v8047_v31, %v8060_v44  ;;  %v3660_v45 = vadd.f32 %v8062_v51, %v8060_v44 }
 0x533   : > { %v6276_v1 = vpop.eup %6275  ;;  %v5277_v54 = vpack.c.bf16 %v6274_v30, %v6272_v55  ;;  %6295 = vrcp.f32 %v4103_v42  ;;  %v3663_v38 = vadd.f32 %v8066_v50, %v8060_v44  ;;  %v3668_v31 = vadd.f32 %v8078_v28, %v8060_v44 }
 0x534   : > { %v6278_v15 = vpop.eup %6277  ;;  %6297 = vpow2.f32 %v3974_v9  ;;  %v3736_v59 = vsub.f32 0.0, %v3644_v61  ;;  %v3671_v51 = vadd.f32 %v8084_v8, %v8060_v44 }
 0x535   : > { %v6280_v35 = vpop.eup %6279  ;;  %4728 = vst [vmem:[%s7695_s14 + $0xcc] sm:$0xff] %v5277_v54  ;;  %v5281_v27 = vpack.c.bf16 %v6278_v15, %v6276_v1  ;;  %6299 = vpow2.f32 %v3986_v13  ;;  %v3896_v13 = vmul.f32 1.442695, %v3729_v41  ;;  %v3743_v54 = vsub.f32 0.0, %v3647_v57 }
 0x536   : > { %v6282_v10 = vpop.eup %6281  ;;  %6301 = vpow2.f32 %v3988_v32  ;;  %v3910_v22 = vmul.f32 1.442695, %v3736_v59  ;;  %v3778_v24 = vsub.f32 0.0, %v3668_v31  ;;  %v3785_v8 = vsub.f32 0.0, %v3671_v51 }
 0x537   : > { %v6284_v37 = vpop.eup %6283  ;;  %4732 = vst [vmem:[%s7695_s14 + $0xe8] sm:$0xff] %v5281_v27  ;;  %v5285_v36 = vpack.c.bf16 %v6282_v10, %v6280_v35  ;;  %6303 = vpow2.f32 %v4000_v5  ;;  %v3757_v35 = vsub.f32 0.0, %v3655_v7  ;;  %v3764_v10 = vsub.f32 0.0, %v3660_v45 }
 0x538   : > { %v6286_v20 = vpop.eup %6285  ;;  %6305 = vpow2.f32 %v4002_v63  ;;  %v3750_v63 = vsub.f32 0.0, %v3652_v2  ;;  %v3924_v12 = vmul.f32 1.442695, %v3743_v54 }
 0x539   : > { %v6288_v23 = vpop.eup %6287  ;;  %4736 = vst [vmem:[%s7695_s14 + $0x104] sm:$0xff] %v5285_v36  ;;  %v5289_v47 = vpack.c.bf16 %v6286_v20, %v6284_v37  ;;  %6307 = vpow2.f32 %v3798_v26  ;;  %v3771_v37 = vsub.f32 0.0, %v3663_v38  ;;  %v3952_v44 = vmul.f32 1.442695, %v3757_v35 }
 0x53a   : > { %v6290_v6 = vpop.eup %6289  ;;  %6309 = vpow2.f32 %v3812_v40 }
 0x53b   : > { %v6292_v9 = vpop.eup %6291  ;;  %4740 = vst [vmem:[%s7695_s14 + $0x120] sm:$0xff] %v5289_v47  ;;  %v5293_v18 = vpack.c.bf16 %v6290_v6, %v6288_v23  ;;  %6311 = vpow2.f32 %v3826_v14  ;;  %v3938_v14 = vmul.f32 1.442695, %v3750_v63  ;;  %v3966_v23 = vmul.f32 1.442695, %v3764_v10 }
 0x53c   : > { %v6294_v39 = vpop.eup %6293  ;;  %6313 = vpow2.f32 %v3840_v4 }
 0x53d   : > { %v8092_v32 = vpop.eup %6295  ;;  %4744 = vst [vmem:[%s7695_s14 + $0x13c] sm:$0xff] %v5293_v18  ;;  %v5297_v58 = vpack.c.bf16 %v6294_v39, %v6292_v9  ;;  %6315 = vpow2.f32 %v3854_v21  ;;  %v3980_v21 = vmul.f32 1.442695, %v3771_v37  ;;  %v3994_v9 = vmul.f32 1.442695, %v3778_v24 }
 0x53e   : > { %v6298_v3 = vpop.eup %6297  ;;  %6317 = vpow2.f32 %v3868_v53  ;;  %v4008_v39 = vmul.f32 1.442695, %v3785_v8 }
 0x53f   : > { %v6300_v43 = vpop.eup %6299  ;;  %4748 = vst [vmem:[%s7695_s14 + $0x158] sm:$0xff] %v5297_v58  ;;  %v4104_v11 = vadd.f32 1.0, %v6298_v3  ;;  %6319 = vpow2.f32 %v3882_v25 }
 0x540   : > { %v6302_v46 = vpop.eup %6301  ;;  %v4110_v17 = vadd.f32 1.0, %v6300_v43  ;;  %6321 = vpow2.f32 %v3896_v13 }
 0x541   : > { %v6304_v5 = vpop.eup %6303  ;;  %6323 = vrcp.f32 %v4104_v11  ;;  %v4111_v52 = vadd.f32 1.0, %v6302_v46 }
 0x542   : > { %v6306_v48 = vpop.eup %6305  ;;  %6325 = vrcp.f32 %v4110_v17  ;;  %v4117_v56 = vadd.f32 1.0, %v6304_v5 }
 0x543   : > { %v6308_v60 = vpop.eup %6307  ;;  %6327 = vrcp.f32 %v4111_v52  ;;  %v4118_v19 = vadd.f32 1.0, %v6306_v48 }
 0x544   : > { %v6310_v55 = vpop.eup %6309  ;;  %6329 = vrcp.f32 %v4117_v56  ;;  %v4016_v42 = vadd.f32 1.0, %v6308_v60 }
 0x545   : > { %v6312_v0 = vpop.eup %6311  ;;  %6331 = vrcp.f32 %v4118_v19  ;;  %v4023_v30 = vadd.f32 1.0, %v6310_v55 }
 0x546   : > { %v6314_v16 = vpop.eup %6313  ;;  %6333 = vrcp.f32 %v4016_v42  ;;  %v4030_v29 = vadd.f32 1.0, %v6312_v0 }
 0x547   : > { %v6316_v49 = vpop.eup %6315  ;;  %6335 = vrcp.f32 %v4023_v30  ;;  %v4037_v1 = vadd.f32 1.0, %v6314_v16 }
 0x548   : > { %v6318_v33 = vpop.eup %6317  ;;  %6337 = vrcp.f32 %v4030_v29  ;;  %v4044_v15 = vadd.f32 1.0, %v6316_v49 }
 0x549   : > { %v6320_v34 = vpop.eup %6319  ;;  %6339 = vrcp.f32 %v4037_v1  ;;  %v4051_v62 = vadd.f32 1.0, %v6318_v33 }
 0x54a   : > { %v6322_v27 = vpop.eup %6321  ;;  %6341 = vrcp.f32 %v4044_v15  ;;  %v4058_v26 = vadd.f32 1.0, %v6320_v34 }
 0x54b   : > { %v6324_v50 = vpop.eup %6323  ;;  %6343 = vrcp.f32 %v4051_v62  ;;  %v4065_v40 = vadd.f32 1.0, %v6322_v27 }
 0x54c   : > { %v6326_v36 = vpop.eup %6325  ;;  %v5301_v28 = vpack.c.bf16 %v6324_v50, %v8092_v32  ;;  %6345 = vrcp.f32 %v4058_v26 }
 0x54d   : > { %v6328_v20 = vpop.eup %6327  ;;  %6347 = vrcp.f32 %v4065_v40 }
 0x54e   : > { %v6330_v4 = vpop.eup %6329  ;;  %4752 = vst [vmem:[%s7695_s14 + $0x174] sm:$0xff] %v5301_v28  ;;  %v5305_v41 = vpack.c.bf16 %v6328_v20, %v6326_v36  ;;  %6349 = vpow2.f32 %v3910_v22 }
 0x54f   : > { %v6332_v47 = vpop.eup %6331  ;;  %6351 = vpow2.f32 %v3924_v12 }
 0x550   : > { %v6334_v6 = vpop.eup %6333  ;;  %4756 = vst [vmem:[%s7695_s14 + $0x190] sm:$0xff] %v5305_v41  ;;  %v5309_v53 = vpack.c.bf16 %v6332_v47, %v6330_v4  ;;  %6353 = vpow2.f32 %v3938_v14 }
 0x551   : > { %v6336_v18 = vpop.eup %6335  ;;  %v5251_v25 = vpack.c.bf16 %v6334_v6, %v6334_v6  ;;  %6355 = vpow2.f32 %v3952_v44 }
 0x552   : > { %v6338_v13 = vpop.eup %6337  ;;  %4760 = vst [vmem:[%s7695_s14 + $0x1ac] sm:$0xff] %v5309_v53  ;;  %v5255_v32 = vpack.c.bf16 %v6336_v18, %v6336_v18  ;;  %6357 = vpow2.f32 %v3966_v23 }
 0x553   : > { %v6340_v58 = vpop.eup %6339  ;;  %4702 = vst.msk [vmem:[%s7695_s14 + $0x18] sm:$0xf] %vm4701_vm1, %v5251_v25  ;;  %v5259_v3 = vpack.c.bf16 %v6338_v13, %v6338_v13  ;;  %6359 = vpow2.f32 %v3980_v21 }
 0x554   : > { %v6342_v43 = vpop.eup %6341  ;;  %4706 = vst.msk [vmem:[%s7695_s14 + $0x34] sm:$0xf] %vm4701_vm1, %v5255_v32  ;;  %v5263_v11 = vpack.c.bf16 %v6340_v58, %v6340_v58  ;;  %6361 = vpow2.f32 %v3994_v9 }
 0x555   : > { %v6344_v46 = vpop.eup %6343  ;;  %4710 = vst.msk [vmem:[%s7695_s14 + $0x50] sm:$0xf] %vm4701_vm1, %v5259_v3  ;;  %v5267_v17 = vpack.c.bf16 %v6342_v43, %v6342_v43  ;;  %6363 = vpow2.f32 %v4008_v39 }
 0x556   : > { %v6346_v5 = vpop.eup %6345  ;;  %4714 = vst.msk [vmem:[%s7695_s14 + $0x6c] sm:$0xf] %vm4701_vm1, %v5263_v11  ;;  %v5271_v52 = vpack.c.bf16 %v6344_v46, %v6344_v46 }
 0x557   : > { %v6348_v48 = vpop.eup %6347  ;;  %4718 = vst.msk [vmem:[%s7695_s14 + $0x88] sm:$0xf] %vm4701_vm1, %v5267_v17  ;;  %v5275_v56 = vpack.c.bf16 %v6346_v5, %v6346_v5 }
 0x558   : > { %v6350_v61 = vpop.eup %6349  ;;  %4722 = vst.msk [vmem:[%s7695_s14 + $0xa4] sm:$0xf] %vm4701_vm1, %v5271_v52  ;;  %v5279_v60 = vpack.c.bf16 %v6348_v48, %v6348_v48 }
 0x559   : > { %v6352_v19 = vpop.eup %6351  ;;  %4726 = vst.msk [vmem:[%s7695_s14 + $0xc0] sm:$0xf] %vm4701_vm1, %v5275_v56  ;;  %v4072_v57 = vadd.f32 1.0, %v6350_v61 }
 0x55a   : > { %v6354_v55 = vpop.eup %6353  ;;  %4730 = vst.msk [vmem:[%s7695_s14 + $0xdc] sm:$0xf] %vm4701_vm1, %v5279_v60  ;;  %v4079_v42 = vadd.f32 1.0, %v6352_v19 }
 0x55b   : > { %v6356_v2 = vpop.eup %6355  ;;  %6365 = vrcp.f32 %v4072_v57  ;;  %v4086_v0 = vadd.f32 1.0, %v6354_v55 }
 0x55c   : > { %v6358_v30 = vpop.eup %6357  ;;  %6367 = vrcp.f32 %v4079_v42  ;;  %v4093_v7 = vadd.f32 1.0, %v6356_v2 }
 0x55d   : > { %v6360_v16 = vpop.eup %6359  ;;  %6369 = vrcp.f32 %v4086_v0  ;;  %v4100_v29 = vadd.f32 1.0, %v6358_v30 }
 0x55e   : > { %v6362_v59 = vpop.eup %6361  ;;  %6371 = vrcp.f32 %v4093_v7  ;;  %v4107_v45 = vadd.f32 1.0, %v6360_v16 }
 0x55f   : > { %v6364_v49 = vpop.eup %6363  ;;  %6373 = vrcp.f32 %v4100_v29  ;;  %v4114_v1 = vadd.f32 1.0, %v6362_v59 }
 0x560   : > { %6375 = vrcp.f32 %v4107_v45  ;;  %v4121_v54 = vadd.f32 1.0, %v6364_v49 }
 0x561   : > { %6377 = vrcp.f32 %v4114_v1 }
 0x562   : > { %6379 = vrcp.f32 %v4121_v54 }
 0x565   : > { %v6366_v38 = vpop.eup %6365 }
 0x566   : > { %v6368_v33 = vpop.eup %6367  ;;  %v5283_v15 = vpack.c.bf16 %v6366_v38, %v6366_v38 }
 0x567   : > { %v6370_v63 = vpop.eup %6369  ;;  %v5287_v31 = vpack.c.bf16 %v6368_v33, %v6368_v33 }
 0x568   : > { %v6372_v34 = vpop.eup %6371  ;;  %4734 = vst.msk [vmem:[%s7695_s14 + $0xf8] sm:$0xf] %vm4701_vm1, %v5283_v15  ;;  %v5291_v62 = vpack.c.bf16 %v6370_v63, %v6370_v63 }
 0x569   : > { %v6374_v35 = vpop.eup %6373  ;;  %4738 = vst.msk [vmem:[%s7695_s14 + $0x114] sm:$0xf] %vm4701_vm1, %v5287_v31  ;;  %v5295_v51 = vpack.c.bf16 %v6372_v34, %v6372_v34 }
 0x56a   : > { %v6376_v27 = vpop.eup %6375  ;;  %4742 = vst.msk [vmem:[%s7695_s14 + $0x130] sm:$0xf] %vm4701_vm1, %v5291_v62  ;;  %v5299_v26 = vpack.c.bf16 %v6374_v35, %v6374_v35 }
 0x56b   : > { %v6378_v22 = vpop.eup %6377  ;;  %4746 = vst.msk [vmem:[%s7695_s14 + $0x14c] sm:$0xf] %vm4701_vm1, %v5295_v51  ;;  %v5303_v10 = vpack.c.bf16 %v6376_v27, %v6376_v27 }
 0x56c   : > { %v6380_v50 = vpop.eup %6379  ;;  %4750 = vst.msk [vmem:[%s7695_s14 + $0x168] sm:$0xf] %vm4701_vm1, %v5299_v26  ;;  %v5307_v40 = vpack.c.bf16 %v6378_v22, %v6378_v22 }
 0x56d   : > { %4754 = vst.msk [vmem:[%s7695_s14 + $0x184] sm:$0xf] %vm4701_vm1, %v5303_v10  ;;  %v5311_v12 = vpack.c.bf16 %v6380_v50, %v6380_v50 }
 0x56e   : > { %4758 = vst.msk [vmem:[%s7695_s14 + $0x1a0] sm:$0xf] %vm4701_vm1, %v5307_v40 }
 0x56f   : > { %4762 = vst.msk [vmem:[%s7695_s14 + $0x1bc] sm:$0xf] %vm4701_vm1, %v5311_v12 }
 0x570 PF: > { %s22_s17 = sadd.s32 1, %s6388_s17  }
 0x571   : > { %p19_p4 = scmp.ge.s32.totalorder %s22_s17, 6  }
 0x573   :  { %21 = sbr.rel (!%p19_p4) target bundleno = 1 (0x1), region = 105 }

</bundles_post_ra>
